<compile_context>
chip_gen: v7x
topology: tpu7x:2x2x1
jax: 0.10.0
libtpu: 0.0.40
codegen_flags: <defaults>
</compile_context>

<pallas_src>
import functools

import jax
import jax.numpy as jnp
from jax.experimental import pallas as pl
from jax.experimental.pallas import tpu as pltpu


def _round_up(x, m):
    return ((x + m - 1) // m) * m


def _conv_block_kernel(xg_ref, w_ref, shift_ref, o_ref, *, hp, wp):
    # xg_ref   : (1, 2, 4, (hp+1)*wp, Cin)  restructured input planes where
    #            xg[0, a, cq, i2*wp + j, c] == x[2*i2 + a, 2*j + cq, c]
    # w_ref    : (9, Cin, CP)  conv taps (kh*3+kw) with BN scale folded in,
    #            Cout zero-padded to lane-dense CP.  VMEM-resident.
    # shift_ref: (1, CP)       folded BN shift (f32).  VMEM-resident.
    # o_ref    : (1, hp*wp, CP) pooled output block for this image.
    m = hp * wp
    pooled = None
    for p in (0, 1):                      # pool-window row offset
        for q in (0, 1):                  # pool-window col offset
            acc = None
            for kh in range(3):
                for kw in range(3):
                    rp = p + kh           # input row offset (0..3)
                    cq = q + kw           # input col offset (0..3)
                    a, ra = rp % 2, rp // 2
                    # Static contiguous 2-D slice: pooled rows i -> plane rows
                    # i2 = i + ra, full width -> flattened range of length m.
                    tap = xg_ref[0, a, cq, ra * wp:ra * wp + m, :]
                    d = jnp.dot(tap, w_ref[kh * 3 + kw],
                                preferred_element_type=jnp.float32)
                    acc = d if acc is None else acc + d
            # MaxPool2d(2): running max over the four pool-window branches keeps
            # <= 2 live (m, CP) f32 intermediates (review item 8).
            pooled = acc if pooled is None else jnp.maximum(pooled, acc)
    # BN shift + ReLU after the max is exact (shift is a per-channel constant,
    # ReLU is monotone; the BN scale is already folded into w).  Dropout(p=0.3)
    # is the identity in inference mode.
    o_ref[0] = jnp.maximum(pooled + shift_ref[...], 0.0).astype(o_ref.dtype)


def conv_block(x_nhwc, w_mat, scale, shift, *, compute_dtype=jnp.float32,
               out_dtype=jnp.float32):
    """One block: Conv2d(3x3, valid, no bias) + BN + ReLU + MaxPool2d(2)."""
    N, H, W, Cin = x_nhwc.shape
    K, Cout = w_mat.shape                  # K = 9 * Cin
    assert K == 9 * Cin
    Ho, Wo = H - 2, W - 2
    Hp, Wp = Ho // 2, Wo // 2              # floor-mode pooling, like PyTorch
    M = Hp * Wp
    CP = _round_up(Cout, 128)              # lane-dense output channels

    # Cheap wrapper restructuring of the raw input (~2x input bytes): split
    # rows by parity `a` and columns by the 4 conv+pool column offsets `cq` so
    # every in-kernel patch is a static contiguous slice.  Cast to the compute
    # dtype FIRST so this construction traffic is halved on the bf16 path.
    x = x_nhwc.astype(compute_dtype)
    xs = x[:, :2 * Hp + 2, :2 * Wp + 2, :]
    xs = xs.reshape(N, Hp + 1, 2, Wp + 1, 2, Cin)          # [n, i2, a, j2, b, c]
    cols = [xs[:, :, :, (cq // 2):(cq // 2) + Wp, cq % 2, :] for cq in range(4)]
    xg = jnp.stack(cols, axis=3)                           # [n, i2, a, cq, j, c]
    xg = xg.transpose(0, 2, 3, 1, 4, 5)                    # [n, a, cq, i2, j, c]
    xg = xg.reshape(N, 2, 4, (Hp + 1) * Wp, Cin)

    # Fold the BN scale into the conv weights; pad channels to CP lanes.
    w9 = (w_mat * scale).astype(compute_dtype).reshape(9, Cin, Cout)
    w9 = jnp.pad(w9, ((0, 0), (0, 0), (0, CP - Cout)))
    shift_p = jnp.pad(shift.astype(jnp.float32), ((0, 0), (0, CP - Cout)))

    kernel = functools.partial(_conv_block_kernel, hp=Hp, wp=Wp)
    out = pl.pallas_call(
        kernel,
        out_shape=jax.ShapeDtypeStruct((N, M, CP), out_dtype),
        grid=(N,),
        in_specs=[
            pl.BlockSpec((1, 2, 4, (Hp + 1) * Wp, Cin),
                         lambda n: (n, 0, 0, 0, 0)),       # streamed per image
            pl.BlockSpec((9, Cin, CP), lambda n: (0, 0, 0)),  # VMEM-resident
            pl.BlockSpec((1, CP), lambda n: (0, 0)),          # VMEM-resident
        ],
        out_specs=pl.BlockSpec((1, M, CP), lambda n: (n, 0, 0)),
        compiler_params=pltpu.CompilerParams(
            dimension_semantics=("parallel",),   # shard batch over v7x's 2 TCs
            vmem_limit_bytes=32 * 1024 * 1024),  # explicit (v5e default 16MiB)
    )(xg, w9, shift_p)

    return out[:, :, :Cout].reshape(N, Hp, Wp, Cout)


def init_params(key, cfg):
    """Deterministic synthetic parameters (Conv weights + folded BN)."""
    params = []
    eps = 1e-5
    for i in range(cfg['num_conv_blocks']):
        c_in = cfg['in_channels'] if i == 0 else cfg['channels'][i][0]
        c_out = cfg['channels'][i][1]
        key, kw_, kg, kb, km, kv = jax.random.split(key, 6)
        bound = 1.0 / (c_in * 9) ** 0.5
        w_oihw = jax.random.uniform(kw_, (c_out, c_in, 3, 3), jnp.float32,
                                    -bound, bound)
        gamma = 1.0 + 0.1 * jax.random.normal(kg, (c_out,), jnp.float32)
        beta = 0.1 * jax.random.normal(kb, (c_out,), jnp.float32)
        r_mean = 0.05 * jax.random.normal(km, (c_out,), jnp.float32)
        r_var = 1.0 + 0.1 * jnp.abs(jax.random.normal(kv, (c_out,), jnp.float32))
        scale = gamma / jnp.sqrt(r_var + eps)
        shift = beta - r_mean * scale
        # (O,I,kh,kw) -> (kh,kw,I,O) -> (9*I, O); tap-major, Cin-minor ordering.
        w_mat = jnp.transpose(w_oihw, (2, 3, 1, 0)).reshape(9 * c_in, c_out)
        params.append(dict(w_oihw=w_oihw, w_mat=w_mat,
                           scale=scale.reshape(1, c_out),
                           shift=shift.reshape(1, c_out)))
    return params


def convnet_forward(x_nchw, params, *, compute_dtype=jnp.float32):
    x = jnp.transpose(x_nchw, (0, 2, 3, 1))   # NCHW -> NHWC
    n_blocks = len(params)
    for i, p in enumerate(params):
        # Intermediate activations in the compute dtype (halves HBM writes on
        # the bf16 path, review item 9); final block output in f32.
        out_dtype = compute_dtype if i + 1 < n_blocks else jnp.float32
        x = conv_block(x, p['w_mat'], p['scale'], p['shift'],
                       compute_dtype=compute_dtype, out_dtype=out_dtype)
    return jnp.transpose(x, (0, 3, 1, 2)).astype(jnp.float32)   # NHWC -> NCHW


def convnet_reference(x_nchw, params):
    """Pure-JAX (XLA) reference with identical semantics, for validation."""
    x = x_nchw
    for p in params:
        z = jax.lax.conv_general_dilated(
            x, p['w_oihw'], window_strides=(1, 1), padding='VALID',
            dimension_numbers=('NCHW', 'OIHW', 'NCHW'))
        z = z * p['scale'].reshape(1, -1, 1, 1) + p['shift'].reshape(1, -1, 1, 1)
        z = jnp.maximum(z, 0.0)
        x = jax.lax.reduce_window(z, -jnp.inf, jax.lax.max,
                                  (1, 1, 2, 2), (1, 1, 2, 2), 'VALID')
    return x


if __name__ == "__main__":
    cfg = {'num_conv_blocks': 2, 'in_channels': 4,
           'channels': [[4, 8], [8, 16]]}
    key = jax.random.PRNGKey(0)
    kx, kp = jax.random.split(key)
    x = jax.random.normal(kx, (2, cfg['in_channels'], 16, 16), jnp.float32)
    params = init_params(kp, cfg)

    fwd = jax.jit(convnet_forward, static_argnames=("compute_dtype",))
    ref = jax.block_until_ready(convnet_reference(x, params))

    # f32 compute path: tight check against the XLA reference.
    out = jax.block_until_ready(fwd(x, params, compute_dtype=jnp.float32))
    assert out.shape == (2, 16, 2, 2), out.shape
    assert jnp.allclose(out, ref, rtol=1e-4, atol=1e-4), \
        float(jnp.max(jnp.abs(out - ref)))

    # bf16 compute path (the performance configuration): halves the dominant
    # HBM stream and uses the bf16-native MXU; validated with a loose tolerance
    # per the review's correctness note.
    out_bf = jax.block_until_ready(fwd(x, params, compute_dtype=jnp.bfloat16))
    assert out_bf.shape == (2, 16, 2, 2), out_bf.shape
    assert jnp.allclose(out_bf, ref, rtol=1e-1, atol=1e-1), \
        float(jnp.max(jnp.abs(out_bf - ref)))

    print("KERNEL_OK")
</pallas_src>

<mosaic_0001>
module attributes {stable_mosaic.version = 11 : i64} {
  func.func @_conv_block_kernel(%arg0: i32, %arg1: memref<1x2x4x56x4xf32, #tpu.memory_space<vmem>>, %arg2: memref<9x4x128xf32, #tpu.memory_space<vmem>>, %arg3: memref<1x128xf32, #tpu.memory_space<vmem>>, %arg4: memref<1x49x128xf32, #tpu.memory_space<vmem>>) attributes {dimension_semantics = [#tpu.dimension_semantics<parallel>], iteration_bounds = array<i64: 2>, scalar_prefetch = 0 : i64, scratch_operands = 0 : i64, tpu.core_type = #tpu.core_type<tc>, window_params = [{transform_indices = @transform_0, window_bounds = array<i64: 1, 2, 4, 56, 4>}, {pipeline_mode = #tpu.pipeline_mode<synchronous>, transform_indices = @transform_1, window_bounds = array<i64: 9, 4, 128>}, {pipeline_mode = #tpu.pipeline_mode<synchronous>, transform_indices = @transform_2, window_bounds = array<i64: 1, 128>}, {transform_indices = @transform_3, window_bounds = array<i64: 1, 49, 128>}]} {
    %c0 = arith.constant 0 : index
    %c0_0 = arith.constant 0 : index
    %c0_1 = arith.constant 0 : index
    %c0_2 = arith.constant 0 : index
    %c0_3 = arith.constant 0 : index
    %0 = vector.load %arg1[%c0, %c0_0, %c0_1, %c0_2, %c0_3] : memref<1x2x4x56x4xf32, #tpu.memory_space<vmem>>, vector<1x1x1x49x4xf32>
    %1 = vector.shape_cast %0 : vector<1x1x1x49x4xf32> to vector<49x4xf32>
    %c0_4 = arith.constant 0 : index
    %c0_5 = arith.constant 0 : index
    %c0_6 = arith.constant 0 : index
    %2 = vector.load %arg2[%c0_4, %c0_5, %c0_6] : memref<9x4x128xf32, #tpu.memory_space<vmem>>, vector<1x4x128xf32>
    %3 = vector.shape_cast %2 : vector<1x4x128xf32> to vector<4x128xf32>
    %cst = arith.constant dense<0.000000e+00> : vector<49x128xf32>
    %4 = tpu.matmul %1, %3, %cst {dimension_numbers = #tpu.dot_dimension_numbers<[1], [0], [0], [1], [0, 0, 1, 1], [], []>} : vector<49x4xf32>, vector<4x128xf32>, vector<49x128xf32> -> vector<49x128xf32>
    %c0_7 = arith.constant 0 : index
    %c0_8 = arith.constant 0 : index
    %c1 = arith.constant 1 : index
    %c0_9 = arith.constant 0 : index
    %c0_10 = arith.constant 0 : index
    %5 = vector.load %arg1[%c0_7, %c0_8, %c1, %c0_9, %c0_10] : memref<1x2x4x56x4xf32, #tpu.memory_space<vmem>>, vector<1x1x1x49x4xf32>
    %6 = vector.shape_cast %5 : vector<1x1x1x49x4xf32> to vector<49x4xf32>
    %c1_11 = arith.constant 1 : index
    %c0_12 = arith.constant 0 : index
    %c0_13 = arith.constant 0 : index
    %7 = vector.load %arg2[%c1_11, %c0_12, %c0_13] : memref<9x4x128xf32, #tpu.memory_space<vmem>>, vector<1x4x128xf32>
    %8 = vector.shape_cast %7 : vector<1x4x128xf32> to vector<4x128xf32>
    %cst_14 = arith.constant dense<0.000000e+00> : vector<49x128xf32>
    %9 = tpu.matmul %6, %8, %cst_14 {dimension_numbers = #tpu.dot_dimension_numbers<[1], [0], [0], [1], [0, 0, 1, 1], [], []>} : vector<49x4xf32>, vector<4x128xf32>, vector<49x128xf32> -> vector<49x128xf32>
    %10 = arith.addf %4, %9 : vector<49x128xf32>
    %c0_15 = arith.constant 0 : index
    %c0_16 = arith.constant 0 : index
    %c2 = arith.constant 2 : index
    %c0_17 = arith.constant 0 : index
    %c0_18 = arith.constant 0 : index
    %11 = vector.load %arg1[%c0_15, %c0_16, %c2, %c0_17, %c0_18] : memref<1x2x4x56x4xf32, #tpu.memory_space<vmem>>, vector<1x1x1x49x4xf32>
    %12 = vector.shape_cast %11 : vector<1x1x1x49x4xf32> to vector<49x4xf32>
    %c2_19 = arith.constant 2 : index
    %c0_20 = arith.constant 0 : index
    %c0_21 = arith.constant 0 : index
    %13 = vector.load %arg2[%c2_19, %c0_20, %c0_21] : memref<9x4x128xf32, #tpu.memory_space<vmem>>, vector<1x4x128xf32>
    %14 = vector.shape_cast %13 : vector<1x4x128xf32> to vector<4x128xf32>
    %cst_22 = arith.constant dense<0.000000e+00> : vector<49x128xf32>
    %15 = tpu.matmul %12, %14, %cst_22 {dimension_numbers = #tpu.dot_dimension_numbers<[1], [0], [0], [1], [0, 0, 1, 1], [], []>} : vector<49x4xf32>, vector<4x128xf32>, vector<49x128xf32> -> vector<49x128xf32>
    %16 = arith.addf %10, %15 : vector<49x128xf32>
    %c0_23 = arith.constant 0 : index
    %c1_24 = arith.constant 1 : index
    %c0_25 = arith.constant 0 : index
    %c0_26 = arith.constant 0 : index
    %c0_27 = arith.constant 0 : index
    %17 = vector.load %arg1[%c0_23, %c1_24, %c0_25, %c0_26, %c0_27] : memref<1x2x4x56x4xf32, #tpu.memory_space<vmem>>, vector<1x1x1x49x4xf32>
    %18 = vector.shape_cast %17 : vector<1x1x1x49x4xf32> to vector<49x4xf32>
    %c3 = arith.constant 3 : index
    %c0_28 = arith.constant 0 : index
    %c0_29 = arith.constant 0 : index
    %19 = vector.load %arg2[%c3, %c0_28, %c0_29] : memref<9x4x128xf32, #tpu.memory_space<vmem>>, vector<1x4x128xf32>
    %20 = vector.shape_cast %19 : vector<1x4x128xf32> to vector<4x128xf32>
    %cst_30 = arith.constant dense<0.000000e+00> : vector<49x128xf32>
    %21 = tpu.matmul %18, %20, %cst_30 {dimension_numbers = #tpu.dot_dimension_numbers<[1], [0], [0], [1], [0, 0, 1, 1], [], []>} : vector<49x4xf32>, vector<4x128xf32>, vector<49x128xf32> -> vector<49x128xf32>
    %22 = arith.addf %16, %21 : vector<49x128xf32>
    %c0_31 = arith.constant 0 : index
    %c1_32 = arith.constant 1 : index
    %c1_33 = arith.constant 1 : index
    %c0_34 = arith.constant 0 : index
    %c0_35 = arith.constant 0 : index
    %23 = vector.load %arg1[%c0_31, %c1_32, %c1_33, %c0_34, %c0_35] : memref<1x2x4x56x4xf32, #tpu.memory_space<vmem>>, vector<1x1x1x49x4xf32>
    %24 = vector.shape_cast %23 : vector<1x1x1x49x4xf32> to vector<49x4xf32>
    %c4 = arith.constant 4 : index
    %c0_36 = arith.constant 0 : index
    %c0_37 = arith.constant 0 : index
    %25 = vector.load %arg2[%c4, %c0_36, %c0_37] : memref<9x4x128xf32, #tpu.memory_space<vmem>>, vector<1x4x128xf32>
    %26 = vector.shape_cast %25 : vector<1x4x128xf32> to vector<4x128xf32>
    %cst_38 = arith.constant dense<0.000000e+00> : vector<49x128xf32>
    %27 = tpu.matmul %24, %26, %cst_38 {dimension_numbers = #tpu.dot_dimension_numbers<[1], [0], [0], [1], [0, 0, 1, 1], [], []>} : vector<49x4xf32>, vector<4x128xf32>, vector<49x128xf32> -> vector<49x128xf32>
    %28 = arith.addf %22, %27 : vector<49x128xf32>
    %c0_39 = arith.constant 0 : index
    %c1_40 = arith.constant 1 : index
    %c2_41 = arith.constant 2 : index
    %c0_42 = arith.constant 0 : index
    %c0_43 = arith.constant 0 : index
    %29 = vector.load %arg1[%c0_39, %c1_40, %c2_41, %c0_42, %c0_43] : memref<1x2x4x56x4xf32, #tpu.memory_space<vmem>>, vector<1x1x1x49x4xf32>
    %30 = vector.shape_cast %29 : vector<1x1x1x49x4xf32> to vector<49x4xf32>
    %c5 = arith.constant 5 : index
    %c0_44 = arith.constant 0 : index
    %c0_45 = arith.constant 0 : index
    %31 = vector.load %arg2[%c5, %c0_44, %c0_45] : memref<9x4x128xf32, #tpu.memory_space<vmem>>, vector<1x4x128xf32>
    %32 = vector.shape_cast %31 : vector<1x4x128xf32> to vector<4x128xf32>
    %cst_46 = arith.constant dense<0.000000e+00> : vector<49x128xf32>
    %33 = tpu.matmul %30, %32, %cst_46 {dimension_numbers = #tpu.dot_dimension_numbers<[1], [0], [0], [1], [0, 0, 1, 1], [], []>} : vector<49x4xf32>, vector<4x128xf32>, vector<49x128xf32> -> vector<49x128xf32>
    %34 = arith.addf %28, %33 : vector<49x128xf32>
    %c0_47 = arith.constant 0 : index
    %c0_48 = arith.constant 0 : index
    %c0_49 = arith.constant 0 : index
    %c7 = arith.constant 7 : index
    %c0_50 = arith.constant 0 : index
    %35 = vector.load %arg1[%c0_47, %c0_48, %c0_49, %c7, %c0_50] : memref<1x2x4x56x4xf32, #tpu.memory_space<vmem>>, vector<1x1x1x49x4xf32>
    %36 = vector.shape_cast %35 : vector<1x1x1x49x4xf32> to vector<49x4xf32>
    %c6 = arith.constant 6 : index
    %c0_51 = arith.constant 0 : index
    %c0_52 = arith.constant 0 : index
    %37 = vector.load %arg2[%c6, %c0_51, %c0_52] : memref<9x4x128xf32, #tpu.memory_space<vmem>>, vector<1x4x128xf32>
    %38 = vector.shape_cast %37 : vector<1x4x128xf32> to vector<4x128xf32>
    %cst_53 = arith.constant dense<0.000000e+00> : vector<49x128xf32>
    %39 = tpu.matmul %36, %38, %cst_53 {dimension_numbers = #tpu.dot_dimension_numbers<[1], [0], [0], [1], [0, 0, 1, 1], [], []>} : vector<49x4xf32>, vector<4x128xf32>, vector<49x128xf32> -> vector<49x128xf32>
    %40 = arith.addf %34, %39 : vector<49x128xf32>
    %c0_54 = arith.constant 0 : index
    %c0_55 = arith.constant 0 : index
    %c1_56 = arith.constant 1 : index
    %c7_57 = arith.constant 7 : index
    %c0_58 = arith.constant 0 : index
    %41 = vector.load %arg1[%c0_54, %c0_55, %c1_56, %c7_57, %c0_58] : memref<1x2x4x56x4xf32, #tpu.memory_space<vmem>>, vector<1x1x1x49x4xf32>
    %42 = vector.shape_cast %41 : vector<1x1x1x49x4xf32> to vector<49x4xf32>
    %c7_59 = arith.constant 7 : index
    %c0_60 = arith.constant 0 : index
    %c0_61 = arith.constant 0 : index
    %43 = vector.load %arg2[%c7_59, %c0_60, %c0_61] : memref<9x4x128xf32, #tpu.memory_space<vmem>>, vector<1x4x128xf32>
    %44 = vector.shape_cast %43 : vector<1x4x128xf32> to vector<4x128xf32>
    %cst_62 = arith.constant dense<0.000000e+00> : vector<49x128xf32>
    %45 = tpu.matmul %42, %44, %cst_62 {dimension_numbers = #tpu.dot_dimension_numbers<[1], [0], [0], [1], [0, 0, 1, 1], [], []>} : vector<49x4xf32>, vector<4x128xf32>, vector<49x128xf32> -> vector<49x128xf32>
    %46 = arith.addf %40, %45 : vector<49x128xf32>
    %c0_63 = arith.constant 0 : index
    %c0_64 = arith.constant 0 : index
    %c2_65 = arith.constant 2 : index
    %c7_66 = arith.constant 7 : index
    %c0_67 = arith.constant 0 : index
    %47 = vector.load %arg1[%c0_63, %c0_64, %c2_65, %c7_66, %c0_67] : memref<1x2x4x56x4xf32, #tpu.memory_space<vmem>>, vector<1x1x1x49x4xf32>
    %48 = vector.shape_cast %47 : vector<1x1x1x49x4xf32> to vector<49x4xf32>
    %c8 = arith.constant 8 : index
    %c0_68 = arith.constant 0 : index
    %c0_69 = arith.constant 0 : index
    %49 = vector.load %arg2[%c8, %c0_68, %c0_69] : memref<9x4x128xf32, #tpu.memory_space<vmem>>, vector<1x4x128xf32>
    %50 = vector.shape_cast %49 : vector<1x4x128xf32> to vector<4x128xf32>
    %cst_70 = arith.constant dense<0.000000e+00> : vector<49x128xf32>
    %51 = tpu.matmul %48, %50, %cst_70 {dimension_numbers = #tpu.dot_dimension_numbers<[1], [0], [0], [1], [0, 0, 1, 1], [], []>} : vector<49x4xf32>, vector<4x128xf32>, vector<49x128xf32> -> vector<49x128xf32>
    %52 = arith.addf %46, %51 : vector<49x128xf32>
    %c0_71 = arith.constant 0 : index
    %c0_72 = arith.constant 0 : index
    %c1_73 = arith.constant 1 : index
    %c0_74 = arith.constant 0 : index
    %c0_75 = arith.constant 0 : index
    %53 = vector.load %arg1[%c0_71, %c0_72, %c1_73, %c0_74, %c0_75] : memref<1x2x4x56x4xf32, #tpu.memory_space<vmem>>, vector<1x1x1x49x4xf32>
    %54 = vector.shape_cast %53 : vector<1x1x1x49x4xf32> to vector<49x4xf32>
    %c0_76 = arith.constant 0 : index
    %c0_77 = arith.constant 0 : index
    %c0_78 = arith.constant 0 : index
    %55 = vector.load %arg2[%c0_76, %c0_77, %c0_78] : memref<9x4x128xf32, #tpu.memory_space<vmem>>, vector<1x4x128xf32>
    %56 = vector.shape_cast %55 : vector<1x4x128xf32> to vector<4x128xf32>
    %cst_79 = arith.constant dense<0.000000e+00> : vector<49x128xf32>
    %57 = tpu.matmul %54, %56, %cst_79 {dimension_numbers = #tpu.dot_dimension_numbers<[1], [0], [0], [1], [0, 0, 1, 1], [], []>} : vector<49x4xf32>, vector<4x128xf32>, vector<49x128xf32> -> vector<49x128xf32>
    %c0_80 = arith.constant 0 : index
    %c0_81 = arith.constant 0 : index
    %c2_82 = arith.constant 2 : index
    %c0_83 = arith.constant 0 : index
    %c0_84 = arith.constant 0 : index
    %58 = vector.load %arg1[%c0_80, %c0_81, %c2_82, %c0_83, %c0_84] : memref<1x2x4x56x4xf32, #tpu.memory_space<vmem>>, vector<1x1x1x49x4xf32>
    %59 = vector.shape_cast %58 : vector<1x1x1x49x4xf32> to vector<49x4xf32>
    %c1_85 = arith.constant 1 : index
    %c0_86 = arith.constant 0 : index
    %c0_87 = arith.constant 0 : index
    %60 = vector.load %arg2[%c1_85, %c0_86, %c0_87] : memref<9x4x128xf32, #tpu.memory_space<vmem>>, vector<1x4x128xf32>
    %61 = vector.shape_cast %60 : vector<1x4x128xf32> to vector<4x128xf32>
    %cst_88 = arith.constant dense<0.000000e+00> : vector<49x128xf32>
    %62 = tpu.matmul %59, %61, %cst_88 {dimension_numbers = #tpu.dot_dimension_numbers<[1], [0], [0], [1], [0, 0, 1, 1], [], []>} : vector<49x4xf32>, vector<4x128xf32>, vector<49x128xf32> -> vector<49x128xf32>
    %63 = arith.addf %57, %62 : vector<49x128xf32>
    %c0_89 = arith.constant 0 : index
    %c0_90 = arith.constant 0 : index
    %c3_91 = arith.constant 3 : index
    %c0_92 = arith.constant 0 : index
    %c0_93 = arith.constant 0 : index
    %64 = vector.load %arg1[%c0_89, %c0_90, %c3_91, %c0_92, %c0_93] : memref<1x2x4x56x4xf32, #tpu.memory_space<vmem>>, vector<1x1x1x49x4xf32>
    %65 = vector.shape_cast %64 : vector<1x1x1x49x4xf32> to vector<49x4xf32>
    %c2_94 = arith.constant 2 : index
    %c0_95 = arith.constant 0 : index
    %c0_96 = arith.constant 0 : index
    %66 = vector.load %arg2[%c2_94, %c0_95, %c0_96] : memref<9x4x128xf32, #tpu.memory_space<vmem>>, vector<1x4x128xf32>
    %67 = vector.shape_cast %66 : vector<1x4x128xf32> to vector<4x128xf32>
    %cst_97 = arith.constant dense<0.000000e+00> : vector<49x128xf32>
    %68 = tpu.matmul %65, %67, %cst_97 {dimension_numbers = #tpu.dot_dimension_numbers<[1], [0], [0], [1], [0, 0, 1, 1], [], []>} : vector<49x4xf32>, vector<4x128xf32>, vector<49x128xf32> -> vector<49x128xf32>
    %69 = arith.addf %63, %68 : vector<49x128xf32>
    %c0_98 = arith.constant 0 : index
    %c1_99 = arith.constant 1 : index
    %c1_100 = arith.constant 1 : index
    %c0_101 = arith.constant 0 : index
    %c0_102 = arith.constant 0 : index
    %70 = vector.load %arg1[%c0_98, %c1_99, %c1_100, %c0_101, %c0_102] : memref<1x2x4x56x4xf32, #tpu.memory_space<vmem>>, vector<1x1x1x49x4xf32>
    %71 = vector.shape_cast %70 : vector<1x1x1x49x4xf32> to vector<49x4xf32>
    %c3_103 = arith.constant 3 : index
    %c0_104 = arith.constant 0 : index
    %c0_105 = arith.constant 0 : index
    %72 = vector.load %arg2[%c3_103, %c0_104, %c0_105] : memref<9x4x128xf32, #tpu.memory_space<vmem>>, vector<1x4x128xf32>
    %73 = vector.shape_cast %72 : vector<1x4x128xf32> to vector<4x128xf32>
    %cst_106 = arith.constant dense<0.000000e+00> : vector<49x128xf32>
    %74 = tpu.matmul %71, %73, %cst_106 {dimension_numbers = #tpu.dot_dimension_numbers<[1], [0], [0], [1], [0, 0, 1, 1], [], []>} : vector<49x4xf32>, vector<4x128xf32>, vector<49x128xf32> -> vector<49x128xf32>
    %75 = arith.addf %69, %74 : vector<49x128xf32>
    %c0_107 = arith.constant 0 : index
    %c1_108 = arith.constant 1 : index
    %c2_109 = arith.constant 2 : index
    %c0_110 = arith.constant 0 : index
    %c0_111 = arith.constant 0 : index
    %76 = vector.load %arg1[%c0_107, %c1_108, %c2_109, %c0_110, %c0_111] : memref<1x2x4x56x4xf32, #tpu.memory_space<vmem>>, vector<1x1x1x49x4xf32>
    %77 = vector.shape_cast %76 : vector<1x1x1x49x4xf32> to vector<49x4xf32>
    %c4_112 = arith.constant 4 : index
    %c0_113 = arith.constant 0 : index
    %c0_114 = arith.constant 0 : index
    %78 = vector.load %arg2[%c4_112, %c0_113, %c0_114] : memref<9x4x128xf32, #tpu.memory_space<vmem>>, vector<1x4x128xf32>
    %79 = vector.shape_cast %78 : vector<1x4x128xf32> to vector<4x128xf32>
    %cst_115 = arith.constant dense<0.000000e+00> : vector<49x128xf32>
    %80 = tpu.matmul %77, %79, %cst_115 {dimension_numbers = #tpu.dot_dimension_numbers<[1], [0], [0], [1], [0, 0, 1, 1], [], []>} : vector<49x4xf32>, vector<4x128xf32>, vector<49x128xf32> -> vector<49x128xf32>
    %81 = arith.addf %75, %80 : vector<49x128xf32>
    %c0_116 = arith.constant 0 : index
    %c1_117 = arith.constant 1 : index
    %c3_118 = arith.constant 3 : index
    %c0_119 = arith.constant 0 : index
    %c0_120 = arith.constant 0 : index
    %82 = vector.load %arg1[%c0_116, %c1_117, %c3_118, %c0_119, %c0_120] : memref<1x2x4x56x4xf32, #tpu.memory_space<vmem>>, vector<1x1x1x49x4xf32>
    %83 = vector.shape_cast %82 : vector<1x1x1x49x4xf32> to vector<49x4xf32>
    %c5_121 = arith.constant 5 : index
    %c0_122 = arith.constant 0 : index
    %c0_123 = arith.constant 0 : index
    %84 = vector.load %arg2[%c5_121, %c0_122, %c0_123] : memref<9x4x128xf32, #tpu.memory_space<vmem>>, vector<1x4x128xf32>
    %85 = vector.shape_cast %84 : vector<1x4x128xf32> to vector<4x128xf32>
    %cst_124 = arith.constant dense<0.000000e+00> : vector<49x128xf32>
    %86 = tpu.matmul %83, %85, %cst_124 {dimension_numbers = #tpu.dot_dimension_numbers<[1], [0], [0], [1], [0, 0, 1, 1], [], []>} : vector<49x4xf32>, vector<4x128xf32>, vector<49x128xf32> -> vector<49x128xf32>
    %87 = arith.addf %81, %86 : vector<49x128xf32>
    %c0_125 = arith.constant 0 : index
    %c0_126 = arith.constant 0 : index
    %c1_127 = arith.constant 1 : index
    %c7_128 = arith.constant 7 : index
    %c0_129 = arith.constant 0 : index
    %88 = vector.load %arg1[%c0_125, %c0_126, %c1_127, %c7_128, %c0_129] : memref<1x2x4x56x4xf32, #tpu.memory_space<vmem>>, vector<1x1x1x49x4xf32>
    %89 = vector.shape_cast %88 : vector<1x1x1x49x4xf32> to vector<49x4xf32>
    %c6_130 = arith.constant 6 : index
    %c0_131 = arith.constant 0 : index
    %c0_132 = arith.constant 0 : index
    %90 = vector.load %arg2[%c6_130, %c0_131, %c0_132] : memref<9x4x128xf32, #tpu.memory_space<vmem>>, vector<1x4x128xf32>
    %91 = vector.shape_cast %90 : vector<1x4x128xf32> to vector<4x128xf32>
    %cst_133 = arith.constant dense<0.000000e+00> : vector<49x128xf32>
    %92 = tpu.matmul %89, %91, %cst_133 {dimension_numbers = #tpu.dot_dimension_numbers<[1], [0], [0], [1], [0, 0, 1, 1], [], []>} : vector<49x4xf32>, vector<4x128xf32>, vector<49x128xf32> -> vector<49x128xf32>
    %93 = arith.addf %87, %92 : vector<49x128xf32>
    %c0_134 = arith.constant 0 : index
    %c0_135 = arith.constant 0 : index
    %c2_136 = arith.constant 2 : index
    %c7_137 = arith.constant 7 : index
    %c0_138 = arith.constant 0 : index
    %94 = vector.load %arg1[%c0_134, %c0_135, %c2_136, %c7_137, %c0_138] : memref<1x2x4x56x4xf32, #tpu.memory_space<vmem>>, vector<1x1x1x49x4xf32>
    %95 = vector.shape_cast %94 : vector<1x1x1x49x4xf32> to vector<49x4xf32>
    %c7_139 = arith.constant 7 : index
    %c0_140 = arith.constant 0 : index
    %c0_141 = arith.constant 0 : index
    %96 = vector.load %arg2[%c7_139, %c0_140, %c0_141] : memref<9x4x128xf32, #tpu.memory_space<vmem>>, vector<1x4x128xf32>
    %97 = vector.shape_cast %96 : vector<1x4x128xf32> to vector<4x128xf32>
    %cst_142 = arith.constant dense<0.000000e+00> : vector<49x128xf32>
    %98 = tpu.matmul %95, %97, %cst_142 {dimension_numbers = #tpu.dot_dimension_numbers<[1], [0], [0], [1], [0, 0, 1, 1], [], []>} : vector<49x4xf32>, vector<4x128xf32>, vector<49x128xf32> -> vector<49x128xf32>
    %99 = arith.addf %93, %98 : vector<49x128xf32>
    %c0_143 = arith.constant 0 : index
    %c0_144 = arith.constant 0 : index
    %c3_145 = arith.constant 3 : index
    %c7_146 = arith.constant 7 : index
    %c0_147 = arith.constant 0 : index
    %100 = vector.load %arg1[%c0_143, %c0_144, %c3_145, %c7_146, %c0_147] : memref<1x2x4x56x4xf32, #tpu.memory_space<vmem>>, vector<1x1x1x49x4xf32>
    %101 = vector.shape_cast %100 : vector<1x1x1x49x4xf32> to vector<49x4xf32>
    %c8_148 = arith.constant 8 : index
    %c0_149 = arith.constant 0 : index
    %c0_150 = arith.constant 0 : index
    %102 = vector.load %arg2[%c8_148, %c0_149, %c0_150] : memref<9x4x128xf32, #tpu.memory_space<vmem>>, vector<1x4x128xf32>
    %103 = vector.shape_cast %102 : vector<1x4x128xf32> to vector<4x128xf32>
    %cst_151 = arith.constant dense<0.000000e+00> : vector<49x128xf32>
    %104 = tpu.matmul %101, %103, %cst_151 {dimension_numbers = #tpu.dot_dimension_numbers<[1], [0], [0], [1], [0, 0, 1, 1], [], []>} : vector<49x4xf32>, vector<4x128xf32>, vector<49x128xf32> -> vector<49x128xf32>
    %105 = arith.addf %99, %104 : vector<49x128xf32>
    %106 = arith.maximumf %52, %105 : vector<49x128xf32>
    %c0_152 = arith.constant 0 : index
    %c1_153 = arith.constant 1 : index
    %c0_154 = arith.constant 0 : index
    %c0_155 = arith.constant 0 : index
    %c0_156 = arith.constant 0 : index
    %107 = vector.load %arg1[%c0_152, %c1_153, %c0_154, %c0_155, %c0_156] : memref<1x2x4x56x4xf32, #tpu.memory_space<vmem>>, vector<1x1x1x49x4xf32>
    %108 = vector.shape_cast %107 : vector<1x1x1x49x4xf32> to vector<49x4xf32>
    %c0_157 = arith.constant 0 : index
    %c0_158 = arith.constant 0 : index
    %c0_159 = arith.constant 0 : index
    %109 = vector.load %arg2[%c0_157, %c0_158, %c0_159] : memref<9x4x128xf32, #tpu.memory_space<vmem>>, vector<1x4x128xf32>
    %110 = vector.shape_cast %109 : vector<1x4x128xf32> to vector<4x128xf32>
    %cst_160 = arith.constant dense<0.000000e+00> : vector<49x128xf32>
    %111 = tpu.matmul %108, %110, %cst_160 {dimension_numbers = #tpu.dot_dimension_numbers<[1], [0], [0], [1], [0, 0, 1, 1], [], []>} : vector<49x4xf32>, vector<4x128xf32>, vector<49x128xf32> -> vector<49x128xf32>
    %c0_161 = arith.constant 0 : index
    %c1_162 = arith.constant 1 : index
    %c1_163 = arith.constant 1 : index
    %c0_164 = arith.constant 0 : index
    %c0_165 = arith.constant 0 : index
    %112 = vector.load %arg1[%c0_161, %c1_162, %c1_163, %c0_164, %c0_165] : memref<1x2x4x56x4xf32, #tpu.memory_space<vmem>>, vector<1x1x1x49x4xf32>
    %113 = vector.shape_cast %112 : vector<1x1x1x49x4xf32> to vector<49x4xf32>
    %c1_166 = arith.constant 1 : index
    %c0_167 = arith.constant 0 : index
    %c0_168 = arith.constant 0 : index
    %114 = vector.load %arg2[%c1_166, %c0_167, %c0_168] : memref<9x4x128xf32, #tpu.memory_space<vmem>>, vector<1x4x128xf32>
    %115 = vector.shape_cast %114 : vector<1x4x128xf32> to vector<4x128xf32>
    %cst_169 = arith.constant dense<0.000000e+00> : vector<49x128xf32>
    %116 = tpu.matmul %113, %115, %cst_169 {dimension_numbers = #tpu.dot_dimension_numbers<[1], [0], [0], [1], [0, 0, 1, 1], [], []>} : vector<49x4xf32>, vector<4x128xf32>, vector<49x128xf32> -> vector<49x128xf32>
    %117 = arith.addf %111, %116 : vector<49x128xf32>
    %c0_170 = arith.constant 0 : index
    %c1_171 = arith.constant 1 : index
    %c2_172 = arith.constant 2 : index
    %c0_173 = arith.constant 0 : index
    %c0_174 = arith.constant 0 : index
    %118 = vector.load %arg1[%c0_170, %c1_171, %c2_172, %c0_173, %c0_174] : memref<1x2x4x56x4xf32, #tpu.memory_space<vmem>>, vector<1x1x1x49x4xf32>
    %119 = vector.shape_cast %118 : vector<1x1x1x49x4xf32> to vector<49x4xf32>
    %c2_175 = arith.constant 2 : index
    %c0_176 = arith.constant 0 : index
    %c0_177 = arith.constant 0 : index
    %120 = vector.load %arg2[%c2_175, %c0_176, %c0_177] : memref<9x4x128xf32, #tpu.memory_space<vmem>>, vector<1x4x128xf32>
    %121 = vector.shape_cast %120 : vector<1x4x128xf32> to vector<4x128xf32>
    %cst_178 = arith.constant dense<0.000000e+00> : vector<49x128xf32>
    %122 = tpu.matmul %119, %121, %cst_178 {dimension_numbers = #tpu.dot_dimension_numbers<[1], [0], [0], [1], [0, 0, 1, 1], [], []>} : vector<49x4xf32>, vector<4x128xf32>, vector<49x128xf32> -> vector<49x128xf32>
    %123 = arith.addf %117, %122 : vector<49x128xf32>
    %c0_179 = arith.constant 0 : index
    %c0_180 = arith.constant 0 : index
    %c0_181 = arith.constant 0 : index
    %c7_182 = arith.constant 7 : index
    %c0_183 = arith.constant 0 : index
    %124 = vector.load %arg1[%c0_179, %c0_180, %c0_181, %c7_182, %c0_183] : memref<1x2x4x56x4xf32, #tpu.memory_space<vmem>>, vector<1x1x1x49x4xf32>
    %125 = vector.shape_cast %124 : vector<1x1x1x49x4xf32> to vector<49x4xf32>
    %c3_184 = arith.constant 3 : index
    %c0_185 = arith.constant 0 : index
    %c0_186 = arith.constant 0 : index
    %126 = vector.load %arg2[%c3_184, %c0_185, %c0_186] : memref<9x4x128xf32, #tpu.memory_space<vmem>>, vector<1x4x128xf32>
    %127 = vector.shape_cast %126 : vector<1x4x128xf32> to vector<4x128xf32>
    %cst_187 = arith.constant dense<0.000000e+00> : vector<49x128xf32>
    %128 = tpu.matmul %125, %127, %cst_187 {dimension_numbers = #tpu.dot_dimension_numbers<[1], [0], [0], [1], [0, 0, 1, 1], [], []>} : vector<49x4xf32>, vector<4x128xf32>, vector<49x128xf32> -> vector<49x128xf32>
    %129 = arith.addf %123, %128 : vector<49x128xf32>
    %c0_188 = arith.constant 0 : index
    %c0_189 = arith.constant 0 : index
    %c1_190 = arith.constant 1 : index
    %c7_191 = arith.constant 7 : index
    %c0_192 = arith.constant 0 : index
    %130 = vector.load %arg1[%c0_188, %c0_189, %c1_190, %c7_191, %c0_192] : memref<1x2x4x56x4xf32, #tpu.memory_space<vmem>>, vector<1x1x1x49x4xf32>
    %131 = vector.shape_cast %130 : vector<1x1x1x49x4xf32> to vector<49x4xf32>
    %c4_193 = arith.constant 4 : index
    %c0_194 = arith.constant 0 : index
    %c0_195 = arith.constant 0 : index
    %132 = vector.load %arg2[%c4_193, %c0_194, %c0_195] : memref<9x4x128xf32, #tpu.memory_space<vmem>>, vector<1x4x128xf32>
    %133 = vector.shape_cast %132 : vector<1x4x128xf32> to vector<4x128xf32>
    %cst_196 = arith.constant dense<0.000000e+00> : vector<49x128xf32>
    %134 = tpu.matmul %131, %133, %cst_196 {dimension_numbers = #tpu.dot_dimension_numbers<[1], [0], [0], [1], [0, 0, 1, 1], [], []>} : vector<49x4xf32>, vector<4x128xf32>, vector<49x128xf32> -> vector<49x128xf32>
    %135 = arith.addf %129, %134 : vector<49x128xf32>
    %c0_197 = arith.constant 0 : index
    %c0_198 = arith.constant 0 : index
    %c2_199 = arith.constant 2 : index
    %c7_200 = arith.constant 7 : index
    %c0_201 = arith.constant 0 : index
    %136 = vector.load %arg1[%c0_197, %c0_198, %c2_199, %c7_200, %c0_201] : memref<1x2x4x56x4xf32, #tpu.memory_space<vmem>>, vector<1x1x1x49x4xf32>
    %137 = vector.shape_cast %136 : vector<1x1x1x49x4xf32> to vector<49x4xf32>
    %c5_202 = arith.constant 5 : index
    %c0_203 = arith.constant 0 : index
    %c0_204 = arith.constant 0 : index
    %138 = vector.load %arg2[%c5_202, %c0_203, %c0_204] : memref<9x4x128xf32, #tpu.memory_space<vmem>>, vector<1x4x128xf32>
    %139 = vector.shape_cast %138 : vector<1x4x128xf32> to vector<4x128xf32>
    %cst_205 = arith.constant dense<0.000000e+00> : vector<49x128xf32>
    %140 = tpu.matmul %137, %139, %cst_205 {dimension_numbers = #tpu.dot_dimension_numbers<[1], [0], [0], [1], [0, 0, 1, 1], [], []>} : vector<49x4xf32>, vector<4x128xf32>, vector<49x128xf32> -> vector<49x128xf32>
    %141 = arith.addf %135, %140 : vector<49x128xf32>
    %c0_206 = arith.constant 0 : index
    %c1_207 = arith.constant 1 : index
    %c0_208 = arith.constant 0 : index
    %c7_209 = arith.constant 7 : index
    %c0_210 = arith.constant 0 : index
    %142 = vector.load %arg1[%c0_206, %c1_207, %c0_208, %c7_209, %c0_210] : memref<1x2x4x56x4xf32, #tpu.memory_space<vmem>>, vector<1x1x1x49x4xf32>
    %143 = vector.shape_cast %142 : vector<1x1x1x49x4xf32> to vector<49x4xf32>
    %c6_211 = arith.constant 6 : index
    %c0_212 = arith.constant 0 : index
    %c0_213 = arith.constant 0 : index
    %144 = vector.load %arg2[%c6_211, %c0_212, %c0_213] : memref<9x4x128xf32, #tpu.memory_space<vmem>>, vector<1x4x128xf32>
    %145 = vector.shape_cast %144 : vector<1x4x128xf32> to vector<4x128xf32>
    %cst_214 = arith.constant dense<0.000000e+00> : vector<49x128xf32>
    %146 = tpu.matmul %143, %145, %cst_214 {dimension_numbers = #tpu.dot_dimension_numbers<[1], [0], [0], [1], [0, 0, 1, 1], [], []>} : vector<49x4xf32>, vector<4x128xf32>, vector<49x128xf32> -> vector<49x128xf32>
    %147 = arith.addf %141, %146 : vector<49x128xf32>
    %c0_215 = arith.constant 0 : index
    %c1_216 = arith.constant 1 : index
    %c1_217 = arith.constant 1 : index
    %c7_218 = arith.constant 7 : index
    %c0_219 = arith.constant 0 : index
    %148 = vector.load %arg1[%c0_215, %c1_216, %c1_217, %c7_218, %c0_219] : memref<1x2x4x56x4xf32, #tpu.memory_space<vmem>>, vector<1x1x1x49x4xf32>
    %149 = vector.shape_cast %148 : vector<1x1x1x49x4xf32> to vector<49x4xf32>
    %c7_220 = arith.constant 7 : index
    %c0_221 = arith.constant 0 : index
    %c0_222 = arith.constant 0 : index
    %150 = vector.load %arg2[%c7_220, %c0_221, %c0_222] : memref<9x4x128xf32, #tpu.memory_space<vmem>>, vector<1x4x128xf32>
    %151 = vector.shape_cast %150 : vector<1x4x128xf32> to vector<4x128xf32>
    %cst_223 = arith.constant dense<0.000000e+00> : vector<49x128xf32>
    %152 = tpu.matmul %149, %151, %cst_223 {dimension_numbers = #tpu.dot_dimension_numbers<[1], [0], [0], [1], [0, 0, 1, 1], [], []>} : vector<49x4xf32>, vector<4x128xf32>, vector<49x128xf32> -> vector<49x128xf32>
    %153 = arith.addf %147, %152 : vector<49x128xf32>
    %c0_224 = arith.constant 0 : index
    %c1_225 = arith.constant 1 : index
    %c2_226 = arith.constant 2 : index
    %c7_227 = arith.constant 7 : index
    %c0_228 = arith.constant 0 : index
    %154 = vector.load %arg1[%c0_224, %c1_225, %c2_226, %c7_227, %c0_228] : memref<1x2x4x56x4xf32, #tpu.memory_space<vmem>>, vector<1x1x1x49x4xf32>
    %155 = vector.shape_cast %154 : vector<1x1x1x49x4xf32> to vector<49x4xf32>
    %c8_229 = arith.constant 8 : index
    %c0_230 = arith.constant 0 : index
    %c0_231 = arith.constant 0 : index
    %156 = vector.load %arg2[%c8_229, %c0_230, %c0_231] : memref<9x4x128xf32, #tpu.memory_space<vmem>>, vector<1x4x128xf32>
    %157 = vector.shape_cast %156 : vector<1x4x128xf32> to vector<4x128xf32>
    %cst_232 = arith.constant dense<0.000000e+00> : vector<49x128xf32>
    %158 = tpu.matmul %155, %157, %cst_232 {dimension_numbers = #tpu.dot_dimension_numbers<[1], [0], [0], [1], [0, 0, 1, 1], [], []>} : vector<49x4xf32>, vector<4x128xf32>, vector<49x128xf32> -> vector<49x128xf32>
    %159 = arith.addf %153, %158 : vector<49x128xf32>
    %160 = arith.maximumf %106, %159 : vector<49x128xf32>
    %c0_233 = arith.constant 0 : index
    %c1_234 = arith.constant 1 : index
    %c1_235 = arith.constant 1 : index
    %c0_236 = arith.constant 0 : index
    %c0_237 = arith.constant 0 : index
    %161 = vector.load %arg1[%c0_233, %c1_234, %c1_235, %c0_236, %c0_237] : memref<1x2x4x56x4xf32, #tpu.memory_space<vmem>>, vector<1x1x1x49x4xf32>
    %162 = vector.shape_cast %161 : vector<1x1x1x49x4xf32> to vector<49x4xf32>
    %c0_238 = arith.constant 0 : index
    %c0_239 = arith.constant 0 : index
    %c0_240 = arith.constant 0 : index
    %163 = vector.load %arg2[%c0_238, %c0_239, %c0_240] : memref<9x4x128xf32, #tpu.memory_space<vmem>>, vector<1x4x128xf32>
    %164 = vector.shape_cast %163 : vector<1x4x128xf32> to vector<4x128xf32>
    %cst_241 = arith.constant dense<0.000000e+00> : vector<49x128xf32>
    %165 = tpu.matmul %162, %164, %cst_241 {dimension_numbers = #tpu.dot_dimension_numbers<[1], [0], [0], [1], [0, 0, 1, 1], [], []>} : vector<49x4xf32>, vector<4x128xf32>, vector<49x128xf32> -> vector<49x128xf32>
    %c0_242 = arith.constant 0 : index
    %c1_243 = arith.constant 1 : index
    %c2_244 = arith.constant 2 : index
    %c0_245 = arith.constant 0 : index
    %c0_246 = arith.constant 0 : index
    %166 = vector.load %arg1[%c0_242, %c1_243, %c2_244, %c0_245, %c0_246] : memref<1x2x4x56x4xf32, #tpu.memory_space<vmem>>, vector<1x1x1x49x4xf32>
    %167 = vector.shape_cast %166 : vector<1x1x1x49x4xf32> to vector<49x4xf32>
    %c1_247 = arith.constant 1 : index
    %c0_248 = arith.constant 0 : index
    %c0_249 = arith.constant 0 : index
    %168 = vector.load %arg2[%c1_247, %c0_248, %c0_249] : memref<9x4x128xf32, #tpu.memory_space<vmem>>, vector<1x4x128xf32>
    %169 = vector.shape_cast %168 : vector<1x4x128xf32> to vector<4x128xf32>
    %cst_250 = arith.constant dense<0.000000e+00> : vector<49x128xf32>
    %170 = tpu.matmul %167, %169, %cst_250 {dimension_numbers = #tpu.dot_dimension_numbers<[1], [0], [0], [1], [0, 0, 1, 1], [], []>} : vector<49x4xf32>, vector<4x128xf32>, vector<49x128xf32> -> vector<49x128xf32>
    %171 = arith.addf %165, %170 : vector<49x128xf32>
    %c0_251 = arith.constant 0 : index
    %c1_252 = arith.constant 1 : index
    %c3_253 = arith.constant 3 : index
    %c0_254 = arith.constant 0 : index
    %c0_255 = arith.constant 0 : index
    %172 = vector.load %arg1[%c0_251, %c1_252, %c3_253, %c0_254, %c0_255] : memref<1x2x4x56x4xf32, #tpu.memory_space<vmem>>, vector<1x1x1x49x4xf32>
    %173 = vector.shape_cast %172 : vector<1x1x1x49x4xf32> to vector<49x4xf32>
    %c2_256 = arith.constant 2 : index
    %c0_257 = arith.constant 0 : index
    %c0_258 = arith.constant 0 : index
    %174 = vector.load %arg2[%c2_256, %c0_257, %c0_258] : memref<9x4x128xf32, #tpu.memory_space<vmem>>, vector<1x4x128xf32>
    %175 = vector.shape_cast %174 : vector<1x4x128xf32> to vector<4x128xf32>
    %cst_259 = arith.constant dense<0.000000e+00> : vector<49x128xf32>
    %176 = tpu.matmul %173, %175, %cst_259 {dimension_numbers = #tpu.dot_dimension_numbers<[1], [0], [0], [1], [0, 0, 1, 1], [], []>} : vector<49x4xf32>, vector<4x128xf32>, vector<49x128xf32> -> vector<49x128xf32>
    %177 = arith.addf %171, %176 : vector<49x128xf32>
    %c0_260 = arith.constant 0 : index
    %c0_261 = arith.constant 0 : index
    %c1_262 = arith.constant 1 : index
    %c7_263 = arith.constant 7 : index
    %c0_264 = arith.constant 0 : index
    %178 = vector.load %arg1[%c0_260, %c0_261, %c1_262, %c7_263, %c0_264] : memref<1x2x4x56x4xf32, #tpu.memory_space<vmem>>, vector<1x1x1x49x4xf32>
    %179 = vector.shape_cast %178 : vector<1x1x1x49x4xf32> to vector<49x4xf32>
    %c3_265 = arith.constant 3 : index
    %c0_266 = arith.constant 0 : index
    %c0_267 = arith.constant 0 : index
    %180 = vector.load %arg2[%c3_265, %c0_266, %c0_267] : memref<9x4x128xf32, #tpu.memory_space<vmem>>, vector<1x4x128xf32>
    %181 = vector.shape_cast %180 : vector<1x4x128xf32> to vector<4x128xf32>
    %cst_268 = arith.constant dense<0.000000e+00> : vector<49x128xf32>
    %182 = tpu.matmul %179, %181, %cst_268 {dimension_numbers = #tpu.dot_dimension_numbers<[1], [0], [0], [1], [0, 0, 1, 1], [], []>} : vector<49x4xf32>, vector<4x128xf32>, vector<49x128xf32> -> vector<49x128xf32>
    %183 = arith.addf %177, %182 : vector<49x128xf32>
    %c0_269 = arith.constant 0 : index
    %c0_270 = arith.constant 0 : index
    %c2_271 = arith.constant 2 : index
    %c7_272 = arith.constant 7 : index
    %c0_273 = arith.constant 0 : index
    %184 = vector.load %arg1[%c0_269, %c0_270, %c2_271, %c7_272, %c0_273] : memref<1x2x4x56x4xf32, #tpu.memory_space<vmem>>, vector<1x1x1x49x4xf32>
    %185 = vector.shape_cast %184 : vector<1x1x1x49x4xf32> to vector<49x4xf32>
    %c4_274 = arith.constant 4 : index
    %c0_275 = arith.constant 0 : index
    %c0_276 = arith.constant 0 : index
    %186 = vector.load %arg2[%c4_274, %c0_275, %c0_276] : memref<9x4x128xf32, #tpu.memory_space<vmem>>, vector<1x4x128xf32>
    %187 = vector.shape_cast %186 : vector<1x4x128xf32> to vector<4x128xf32>
    %cst_277 = arith.constant dense<0.000000e+00> : vector<49x128xf32>
    %188 = tpu.matmul %185, %187, %cst_277 {dimension_numbers = #tpu.dot_dimension_numbers<[1], [0], [0], [1], [0, 0, 1, 1], [], []>} : vector<49x4xf32>, vector<4x128xf32>, vector<49x128xf32> -> vector<49x128xf32>
    %189 = arith.addf %183, %188 : vector<49x128xf32>
    %c0_278 = arith.constant 0 : index
    %c0_279 = arith.constant 0 : index
    %c3_280 = arith.constant 3 : index
    %c7_281 = arith.constant 7 : index
    %c0_282 = arith.constant 0 : index
    %190 = vector.load %arg1[%c0_278, %c0_279, %c3_280, %c7_281, %c0_282] : memref<1x2x4x56x4xf32, #tpu.memory_space<vmem>>, vector<1x1x1x49x4xf32>
    %191 = vector.shape_cast %190 : vector<1x1x1x49x4xf32> to vector<49x4xf32>
    %c5_283 = arith.constant 5 : index
    %c0_284 = arith.constant 0 : index
    %c0_285 = arith.constant 0 : index
    %192 = vector.load %arg2[%c5_283, %c0_284, %c0_285] : memref<9x4x128xf32, #tpu.memory_space<vmem>>, vector<1x4x128xf32>
    %193 = vector.shape_cast %192 : vector<1x4x128xf32> to vector<4x128xf32>
    %cst_286 = arith.constant dense<0.000000e+00> : vector<49x128xf32>
    %194 = tpu.matmul %191, %193, %cst_286 {dimension_numbers = #tpu.dot_dimension_numbers<[1], [0], [0], [1], [0, 0, 1, 1], [], []>} : vector<49x4xf32>, vector<4x128xf32>, vector<49x128xf32> -> vector<49x128xf32>
    %195 = arith.addf %189, %194 : vector<49x128xf32>
    %c0_287 = arith.constant 0 : index
    %c1_288 = arith.constant 1 : index
    %c1_289 = arith.constant 1 : index
    %c7_290 = arith.constant 7 : index
    %c0_291 = arith.constant 0 : index
    %196 = vector.load %arg1[%c0_287, %c1_288, %c1_289, %c7_290, %c0_291] : memref<1x2x4x56x4xf32, #tpu.memory_space<vmem>>, vector<1x1x1x49x4xf32>
    %197 = vector.shape_cast %196 : vector<1x1x1x49x4xf32> to vector<49x4xf32>
    %c6_292 = arith.constant 6 : index
    %c0_293 = arith.constant 0 : index
    %c0_294 = arith.constant 0 : index
    %198 = vector.load %arg2[%c6_292, %c0_293, %c0_294] : memref<9x4x128xf32, #tpu.memory_space<vmem>>, vector<1x4x128xf32>
    %199 = vector.shape_cast %198 : vector<1x4x128xf32> to vector<4x128xf32>
    %cst_295 = arith.constant dense<0.000000e+00> : vector<49x128xf32>
    %200 = tpu.matmul %197, %199, %cst_295 {dimension_numbers = #tpu.dot_dimension_numbers<[1], [0], [0], [1], [0, 0, 1, 1], [], []>} : vector<49x4xf32>, vector<4x128xf32>, vector<49x128xf32> -> vector<49x128xf32>
    %201 = arith.addf %195, %200 : vector<49x128xf32>
    %c0_296 = arith.constant 0 : index
    %c1_297 = arith.constant 1 : index
    %c2_298 = arith.constant 2 : index
    %c7_299 = arith.constant 7 : index
    %c0_300 = arith.constant 0 : index
    %202 = vector.load %arg1[%c0_296, %c1_297, %c2_298, %c7_299, %c0_300] : memref<1x2x4x56x4xf32, #tpu.memory_space<vmem>>, vector<1x1x1x49x4xf32>
    %203 = vector.shape_cast %202 : vector<1x1x1x49x4xf32> to vector<49x4xf32>
    %c7_301 = arith.constant 7 : index
    %c0_302 = arith.constant 0 : index
    %c0_303 = arith.constant 0 : index
    %204 = vector.load %arg2[%c7_301, %c0_302, %c0_303] : memref<9x4x128xf32, #tpu.memory_space<vmem>>, vector<1x4x128xf32>
    %205 = vector.shape_cast %204 : vector<1x4x128xf32> to vector<4x128xf32>
    %cst_304 = arith.constant dense<0.000000e+00> : vector<49x128xf32>
    %206 = tpu.matmul %203, %205, %cst_304 {dimension_numbers = #tpu.dot_dimension_numbers<[1], [0], [0], [1], [0, 0, 1, 1], [], []>} : vector<49x4xf32>, vector<4x128xf32>, vector<49x128xf32> -> vector<49x128xf32>
    %207 = arith.addf %201, %206 : vector<49x128xf32>
    %c0_305 = arith.constant 0 : index
    %c1_306 = arith.constant 1 : index
    %c3_307 = arith.constant 3 : index
    %c7_308 = arith.constant 7 : index
    %c0_309 = arith.constant 0 : index
    %208 = vector.load %arg1[%c0_305, %c1_306, %c3_307, %c7_308, %c0_309] : memref<1x2x4x56x4xf32, #tpu.memory_space<vmem>>, vector<1x1x1x49x4xf32>
    %209 = vector.shape_cast %208 : vector<1x1x1x49x4xf32> to vector<49x4xf32>
    %c8_310 = arith.constant 8 : index
    %c0_311 = arith.constant 0 : index
    %c0_312 = arith.constant 0 : index
    %210 = vector.load %arg2[%c8_310, %c0_311, %c0_312] : memref<9x4x128xf32, #tpu.memory_space<vmem>>, vector<1x4x128xf32>
    %211 = vector.shape_cast %210 : vector<1x4x128xf32> to vector<4x128xf32>
    %cst_313 = arith.constant dense<0.000000e+00> : vector<49x128xf32>
    %212 = tpu.matmul %209, %211, %cst_313 {dimension_numbers = #tpu.dot_dimension_numbers<[1], [0], [0], [1], [0, 0, 1, 1], [], []>} : vector<49x4xf32>, vector<4x128xf32>, vector<49x128xf32> -> vector<49x128xf32>
    %213 = arith.addf %207, %212 : vector<49x128xf32>
    %214 = arith.maximumf %160, %213 : vector<49x128xf32>
    %c0_314 = arith.constant 0 : index
    %c0_315 = arith.constant 0 : index
    %215 = vector.load %arg3[%c0_314, %c0_315] : memref<1x128xf32, #tpu.memory_space<vmem>>, vector<1x128xf32>
    %216 = vector.broadcast %215 : vector<1x128xf32> to vector<49x128xf32>
    %217 = arith.addf %214, %216 : vector<49x128xf32>
    %cst_316 = arith.constant 0.000000e+00 : f32
    %218 = vector.broadcast %cst_316 : f32 to vector<49x128xf32>
    %219 = arith.maximumf %217, %218 : vector<49x128xf32>
    %c0_317 = arith.constant 0 : index
    %c0_318 = arith.constant 0 : index
    %c0_319 = arith.constant 0 : index
    %220 = vector.load %arg4[%c0_317, %c0_318, %c0_319] : memref<1x49x128xf32, #tpu.memory_space<vmem>>, vector<1x49x128xf32>
    %221 = vector.shape_cast %220 : vector<1x49x128xf32> to vector<49x128xf32>
    %222 = vector.shape_cast %219 : vector<49x128xf32> to vector<1x49x128xf32>
    tpu.vector_store %arg4[%c0_317, %c0_318, %c0_319], %222 {strides = array<i32>} : memref<1x49x128xf32, #tpu.memory_space<vmem>>, vector<1x49x128xf32>,
    return
  }
  func.func @transform_0(%arg0: i32) -> (i32, i32, i32, i32, i32) {
    %c0_i32 = arith.constant 0 : i32
    %c0_i32_0 = arith.constant 0 : i32
    %c0_i32_1 = arith.constant 0 : i32
    %c0_i32_2 = arith.constant 0 : i32
    %c0_i32_3 = arith.constant 0 : i32
    return %arg0, %c0_i32, %c0_i32_0, %c0_i32_1, %c0_i32_2 : i32, i32, i32, i32, i32
  }
  func.func @transform_1(%arg0: i32) -> (i32, i32, i32) {
    %c0_i32 = arith.constant 0 : i32
    %c0_i32_0 = arith.constant 0 : i32
    %c0_i32_1 = arith.constant 0 : i32
    %c0_i32_2 = arith.constant 0 : i32
    return %c0_i32, %c0_i32_0, %c0_i32_1 : i32, i32, i32
  }
  func.func @transform_2(%arg0: i32) -> (i32, i32) {
    %c0_i32 = arith.constant 0 : i32
    %c0_i32_0 = arith.constant 0 : i32
    %c0_i32_1 = arith.constant 0 : i32
    return %c0_i32, %c0_i32_0 : i32, i32
  }
  func.func @transform_3(%arg0: i32) -> (i32, i32, i32) {
    %c0_i32 = arith.constant 0 : i32
    %c0_i32_0 = arith.constant 0 : i32
    %c0_i32_1 = arith.constant 0 : i32
    return %arg0, %c0_i32, %c0_i32_0 : i32, i32, i32
  }
}

module attributes {stable_mosaic.version = 11 : i64} {
  func.func @_conv_block_kernel(%arg0: i32, %arg1: memref<1x2x4x6x8xf32, #tpu.memory_space<vmem>>, %arg2: memref<9x8x128xf32, #tpu.memory_space<vmem>>, %arg3: memref<1x128xf32, #tpu.memory_space<vmem>>, %arg4: memref<1x4x128xf32, #tpu.memory_space<vmem>>) attributes {dimension_semantics = [#tpu.dimension_semantics<parallel>], iteration_bounds = array<i64: 2>, scalar_prefetch = 0 : i64, scratch_operands = 0 : i64, tpu.core_type = #tpu.core_type<tc>, window_params = [{transform_indices = @transform_0, window_bounds = array<i64: 1, 2, 4, 6, 8>}, {pipeline_mode = #tpu.pipeline_mode<synchronous>, transform_indices = @transform_1, window_bounds = array<i64: 9, 8, 128>}, {pipeline_mode = #tpu.pipeline_mode<synchronous>, transform_indices = @transform_2, window_bounds = array<i64: 1, 128>}, {transform_indices = @transform_3, window_bounds = array<i64: 1, 4, 128>}]} {
    %c0 = arith.constant 0 : index
    %c0_0 = arith.constant 0 : index
    %c0_1 = arith.constant 0 : index
    %c0_2 = arith.constant 0 : index
    %c0_3 = arith.constant 0 : index
    %0 = vector.load %arg1[%c0, %c0_0, %c0_1, %c0_2, %c0_3] : memref<1x2x4x6x8xf32, #tpu.memory_space<vmem>>, vector<1x1x1x4x8xf32>
    %1 = vector.shape_cast %0 : vector<1x1x1x4x8xf32> to vector<4x8xf32>
    %c0_4 = arith.constant 0 : index
    %c0_5 = arith.constant 0 : index
    %c0_6 = arith.constant 0 : index
    %2 = vector.load %arg2[%c0_4, %c0_5, %c0_6] : memref<9x8x128xf32, #tpu.memory_space<vmem>>, vector<1x8x128xf32>
    %3 = vector.shape_cast %2 : vector<1x8x128xf32> to vector<8x128xf32>
    %cst = arith.constant dense<0.000000e+00> : vector<4x128xf32>
    %4 = tpu.matmul %1, %3, %cst {dimension_numbers = #tpu.dot_dimension_numbers<[1], [0], [0], [1], [0, 0, 1, 1], [], []>} : vector<4x8xf32>, vector<8x128xf32>, vector<4x128xf32> -> vector<4x128xf32>
    %c0_7 = arith.constant 0 : index
    %c0_8 = arith.constant 0 : index
    %c1 = arith.constant 1 : index
    %c0_9 = arith.constant 0 : index
    %c0_10 = arith.constant 0 : index
    %5 = vector.load %arg1[%c0_7, %c0_8, %c1, %c0_9, %c0_10] : memref<1x2x4x6x8xf32, #tpu.memory_space<vmem>>, vector<1x1x1x4x8xf32>
    %6 = vector.shape_cast %5 : vector<1x1x1x4x8xf32> to vector<4x8xf32>
    %c1_11 = arith.constant 1 : index
    %c0_12 = arith.constant 0 : index
    %c0_13 = arith.constant 0 : index
    %7 = vector.load %arg2[%c1_11, %c0_12, %c0_13] : memref<9x8x128xf32, #tpu.memory_space<vmem>>, vector<1x8x128xf32>
    %8 = vector.shape_cast %7 : vector<1x8x128xf32> to vector<8x128xf32>
    %cst_14 = arith.constant dense<0.000000e+00> : vector<4x128xf32>
    %9 = tpu.matmul %6, %8, %cst_14 {dimension_numbers = #tpu.dot_dimension_numbers<[1], [0], [0], [1], [0, 0, 1, 1], [], []>} : vector<4x8xf32>, vector<8x128xf32>, vector<4x128xf32> -> vector<4x128xf32>
    %10 = arith.addf %4, %9 : vector<4x128xf32>
    %c0_15 = arith.constant 0 : index
    %c0_16 = arith.constant 0 : index
    %c2 = arith.constant 2 : index
    %c0_17 = arith.constant 0 : index
    %c0_18 = arith.constant 0 : index
    %11 = vector.load %arg1[%c0_15, %c0_16, %c2, %c0_17, %c0_18] : memref<1x2x4x6x8xf32, #tpu.memory_space<vmem>>, vector<1x1x1x4x8xf32>
    %12 = vector.shape_cast %11 : vector<1x1x1x4x8xf32> to vector<4x8xf32>
    %c2_19 = arith.constant 2 : index
    %c0_20 = arith.constant 0 : index
    %c0_21 = arith.constant 0 : index
    %13 = vector.load %arg2[%c2_19, %c0_20, %c0_21] : memref<9x8x128xf32, #tpu.memory_space<vmem>>, vector<1x8x128xf32>
    %14 = vector.shape_cast %13 : vector<1x8x128xf32> to vector<8x128xf32>
    %cst_22 = arith.constant dense<0.000000e+00> : vector<4x128xf32>
    %15 = tpu.matmul %12, %14, %cst_22 {dimension_numbers = #tpu.dot_dimension_numbers<[1], [0], [0], [1], [0, 0, 1, 1], [], []>} : vector<4x8xf32>, vector<8x128xf32>, vector<4x128xf32> -> vector<4x128xf32>
    %16 = arith.addf %10, %15 : vector<4x128xf32>
    %c0_23 = arith.constant 0 : index
    %c1_24 = arith.constant 1 : index
    %c0_25 = arith.constant 0 : index
    %c0_26 = arith.constant 0 : index
    %c0_27 = arith.constant 0 : index
    %17 = vector.load %arg1[%c0_23, %c1_24, %c0_25, %c0_26, %c0_27] : memref<1x2x4x6x8xf32, #tpu.memory_space<vmem>>, vector<1x1x1x4x8xf32>
    %18 = vector.shape_cast %17 : vector<1x1x1x4x8xf32> to vector<4x8xf32>
    %c3 = arith.constant 3 : index
    %c0_28 = arith.constant 0 : index
    %c0_29 = arith.constant 0 : index
    %19 = vector.load %arg2[%c3, %c0_28, %c0_29] : memref<9x8x128xf32, #tpu.memory_space<vmem>>, vector<1x8x128xf32>
    %20 = vector.shape_cast %19 : vector<1x8x128xf32> to vector<8x128xf32>
    %cst_30 = arith.constant dense<0.000000e+00> : vector<4x128xf32>
    %21 = tpu.matmul %18, %20, %cst_30 {dimension_numbers = #tpu.dot_dimension_numbers<[1], [0], [0], [1], [0, 0, 1, 1], [], []>} : vector<4x8xf32>, vector<8x128xf32>, vector<4x128xf32> -> vector<4x128xf32>
    %22 = arith.addf %16, %21 : vector<4x128xf32>
    %c0_31 = arith.constant 0 : index
    %c1_32 = arith.constant 1 : index
    %c1_33 = arith.constant 1 : index
    %c0_34 = arith.constant 0 : index
    %c0_35 = arith.constant 0 : index
    %23 = vector.load %arg1[%c0_31, %c1_32, %c1_33, %c0_34, %c0_35] : memref<1x2x4x6x8xf32, #tpu.memory_space<vmem>>, vector<1x1x1x4x8xf32>
    %24 = vector.shape_cast %23 : vector<1x1x1x4x8xf32> to vector<4x8xf32>
    %c4 = arith.constant 4 : index
    %c0_36 = arith.constant 0 : index
    %c0_37 = arith.constant 0 : index
    %25 = vector.load %arg2[%c4, %c0_36, %c0_37] : memref<9x8x128xf32, #tpu.memory_space<vmem>>, vector<1x8x128xf32>
    %26 = vector.shape_cast %25 : vector<1x8x128xf32> to vector<8x128xf32>
    %cst_38 = arith.constant dense<0.000000e+00> : vector<4x128xf32>
    %27 = tpu.matmul %24, %26, %cst_38 {dimension_numbers = #tpu.dot_dimension_numbers<[1], [0], [0], [1], [0, 0, 1, 1], [], []>} : vector<4x8xf32>, vector<8x128xf32>, vector<4x128xf32> -> vector<4x128xf32>
    %28 = arith.addf %22, %27 : vector<4x128xf32>
    %c0_39 = arith.constant 0 : index
    %c1_40 = arith.constant 1 : index
    %c2_41 = arith.constant 2 : index
    %c0_42 = arith.constant 0 : index
    %c0_43 = arith.constant 0 : index
    %29 = vector.load %arg1[%c0_39, %c1_40, %c2_41, %c0_42, %c0_43] : memref<1x2x4x6x8xf32, #tpu.memory_space<vmem>>, vector<1x1x1x4x8xf32>
    %30 = vector.shape_cast %29 : vector<1x1x1x4x8xf32> to vector<4x8xf32>
    %c5 = arith.constant 5 : index
    %c0_44 = arith.constant 0 : index
    %c0_45 = arith.constant 0 : index
    %31 = vector.load %arg2[%c5, %c0_44, %c0_45] : memref<9x8x128xf32, #tpu.memory_space<vmem>>, vector<1x8x128xf32>
    %32 = vector.shape_cast %31 : vector<1x8x128xf32> to vector<8x128xf32>
    %cst_46 = arith.constant dense<0.000000e+00> : vector<4x128xf32>
    %33 = tpu.matmul %30, %32, %cst_46 {dimension_numbers = #tpu.dot_dimension_numbers<[1], [0], [0], [1], [0, 0, 1, 1], [], []>} : vector<4x8xf32>, vector<8x128xf32>, vector<4x128xf32> -> vector<4x128xf32>
    %34 = arith.addf %28, %33 : vector<4x128xf32>
    %c0_47 = arith.constant 0 : index
    %c0_48 = arith.constant 0 : index
    %c0_49 = arith.constant 0 : index
    %c2_50 = arith.constant 2 : index
    %c0_51 = arith.constant 0 : index
    %35 = vector.load %arg1[%c0_47, %c0_48, %c0_49, %c2_50, %c0_51] : memref<1x2x4x6x8xf32, #tpu.memory_space<vmem>>, vector<1x1x1x4x8xf32>
    %36 = vector.shape_cast %35 : vector<1x1x1x4x8xf32> to vector<4x8xf32>
    %c6 = arith.constant 6 : index
    %c0_52 = arith.constant 0 : index
    %c0_53 = arith.constant 0 : index
    %37 = vector.load %arg2[%c6, %c0_52, %c0_53] : memref<9x8x128xf32, #tpu.memory_space<vmem>>, vector<1x8x128xf32>
    %38 = vector.shape_cast %37 : vector<1x8x128xf32> to vector<8x128xf32>
    %cst_54 = arith.constant dense<0.000000e+00> : vector<4x128xf32>
    %39 = tpu.matmul %36, %38, %cst_54 {dimension_numbers = #tpu.dot_dimension_numbers<[1], [0], [0], [1], [0, 0, 1, 1], [], []>} : vector<4x8xf32>, vector<8x128xf32>, vector<4x128xf32> -> vector<4x128xf32>
    %40 = arith.addf %34, %39 : vector<4x128xf32>
    %c0_55 = arith.constant 0 : index
    %c0_56 = arith.constant 0 : index
    %c1_57 = arith.constant 1 : index
    %c2_58 = arith.constant 2 : index
    %c0_59 = arith.constant 0 : index
    %41 = vector.load %arg1[%c0_55, %c0_56, %c1_57, %c2_58, %c0_59] : memref<1x2x4x6x8xf32, #tpu.memory_space<vmem>>, vector<1x1x1x4x8xf32>
    %42 = vector.shape_cast %41 : vector<1x1x1x4x8xf32> to vector<4x8xf32>
    %c7 = arith.constant 7 : index
    %c0_60 = arith.constant 0 : index
    %c0_61 = arith.constant 0 : index
    %43 = vector.load %arg2[%c7, %c0_60, %c0_61] : memref<9x8x128xf32, #tpu.memory_space<vmem>>, vector<1x8x128xf32>
    %44 = vector.shape_cast %43 : vector<1x8x128xf32> to vector<8x128xf32>
    %cst_62 = arith.constant dense<0.000000e+00> : vector<4x128xf32>
    %45 = tpu.matmul %42, %44, %cst_62 {dimension_numbers = #tpu.dot_dimension_numbers<[1], [0], [0], [1], [0, 0, 1, 1], [], []>} : vector<4x8xf32>, vector<8x128xf32>, vector<4x128xf32> -> vector<4x128xf32>
    %46 = arith.addf %40, %45 : vector<4x128xf32>
    %c0_63 = arith.constant 0 : index
    %c0_64 = arith.constant 0 : index
    %c2_65 = arith.constant 2 : index
    %c2_66 = arith.constant 2 : index
    %c0_67 = arith.constant 0 : index
    %47 = vector.load %arg1[%c0_63, %c0_64, %c2_65, %c2_66, %c0_67] : memref<1x2x4x6x8xf32, #tpu.memory_space<vmem>>, vector<1x1x1x4x8xf32>
    %48 = vector.shape_cast %47 : vector<1x1x1x4x8xf32> to vector<4x8xf32>
    %c8 = arith.constant 8 : index
    %c0_68 = arith.constant 0 : index
    %c0_69 = arith.constant 0 : index
    %49 = vector.load %arg2[%c8, %c0_68, %c0_69] : memref<9x8x128xf32, #tpu.memory_space<vmem>>, vector<1x8x128xf32>
    %50 = vector.shape_cast %49 : vector<1x8x128xf32> to vector<8x128xf32>
    %cst_70 = arith.constant dense<0.000000e+00> : vector<4x128xf32>
    %51 = tpu.matmul %48, %50, %cst_70 {dimension_numbers = #tpu.dot_dimension_numbers<[1], [0], [0], [1], [0, 0, 1, 1], [], []>} : vector<4x8xf32>, vector<8x128xf32>, vector<4x128xf32> -> vector<4x128xf32>
    %52 = arith.addf %46, %51 : vector<4x128xf32>
    %c0_71 = arith.constant 0 : index
    %c0_72 = arith.constant 0 : index
    %c1_73 = arith.constant 1 : index
    %c0_74 = arith.constant 0 : index
    %c0_75 = arith.constant 0 : index
    %53 = vector.load %arg1[%c0_71, %c0_72, %c1_73, %c0_74, %c0_75] : memref<1x2x4x6x8xf32, #tpu.memory_space<vmem>>, vector<1x1x1x4x8xf32>
    %54 = vector.shape_cast %53 : vector<1x1x1x4x8xf32> to vector<4x8xf32>
    %c0_76 = arith.constant 0 : index
    %c0_77 = arith.constant 0 : index
    %c0_78 = arith.constant 0 : index
    %55 = vector.load %arg2[%c0_76, %c0_77, %c0_78] : memref<9x8x128xf32, #tpu.memory_space<vmem>>, vector<1x8x128xf32>
    %56 = vector.shape_cast %55 : vector<1x8x128xf32> to vector<8x128xf32>
    %cst_79 = arith.constant dense<0.000000e+00> : vector<4x128xf32>
    %57 = tpu.matmul %54, %56, %cst_79 {dimension_numbers = #tpu.dot_dimension_numbers<[1], [0], [0], [1], [0, 0, 1, 1], [], []>} : vector<4x8xf32>, vector<8x128xf32>, vector<4x128xf32> -> vector<4x128xf32>
    %c0_80 = arith.constant 0 : index
    %c0_81 = arith.constant 0 : index
    %c2_82 = arith.constant 2 : index
    %c0_83 = arith.constant 0 : index
    %c0_84 = arith.constant 0 : index
    %58 = vector.load %arg1[%c0_80, %c0_81, %c2_82, %c0_83, %c0_84] : memref<1x2x4x6x8xf32, #tpu.memory_space<vmem>>, vector<1x1x1x4x8xf32>
    %59 = vector.shape_cast %58 : vector<1x1x1x4x8xf32> to vector<4x8xf32>
    %c1_85 = arith.constant 1 : index
    %c0_86 = arith.constant 0 : index
    %c0_87 = arith.constant 0 : index
    %60 = vector.load %arg2[%c1_85, %c0_86, %c0_87] : memref<9x8x128xf32, #tpu.memory_space<vmem>>, vector<1x8x128xf32>
    %61 = vector.shape_cast %60 : vector<1x8x128xf32> to vector<8x128xf32>
    %cst_88 = arith.constant dense<0.000000e+00> : vector<4x128xf32>
    %62 = tpu.matmul %59, %61, %cst_88 {dimension_numbers = #tpu.dot_dimension_numbers<[1], [0], [0], [1], [0, 0, 1, 1], [], []>} : vector<4x8xf32>, vector<8x128xf32>, vector<4x128xf32> -> vector<4x128xf32>
    %63 = arith.addf %57, %62 : vector<4x128xf32>
    %c0_89 = arith.constant 0 : index
    %c0_90 = arith.constant 0 : index
    %c3_91 = arith.constant 3 : index
    %c0_92 = arith.constant 0 : index
    %c0_93 = arith.constant 0 : index
    %64 = vector.load %arg1[%c0_89, %c0_90, %c3_91, %c0_92, %c0_93] : memref<1x2x4x6x8xf32, #tpu.memory_space<vmem>>, vector<1x1x1x4x8xf32>
    %65 = vector.shape_cast %64 : vector<1x1x1x4x8xf32> to vector<4x8xf32>
    %c2_94 = arith.constant 2 : index
    %c0_95 = arith.constant 0 : index
    %c0_96 = arith.constant 0 : index
    %66 = vector.load %arg2[%c2_94, %c0_95, %c0_96] : memref<9x8x128xf32, #tpu.memory_space<vmem>>, vector<1x8x128xf32>
    %67 = vector.shape_cast %66 : vector<1x8x128xf32> to vector<8x128xf32>
    %cst_97 = arith.constant dense<0.000000e+00> : vector<4x128xf32>
    %68 = tpu.matmul %65, %67, %cst_97 {dimension_numbers = #tpu.dot_dimension_numbers<[1], [0], [0], [1], [0, 0, 1, 1], [], []>} : vector<4x8xf32>, vector<8x128xf32>, vector<4x128xf32> -> vector<4x128xf32>
    %69 = arith.addf %63, %68 : vector<4x128xf32>
    %c0_98 = arith.constant 0 : index
    %c1_99 = arith.constant 1 : index
    %c1_100 = arith.constant 1 : index
    %c0_101 = arith.constant 0 : index
    %c0_102 = arith.constant 0 : index
    %70 = vector.load %arg1[%c0_98, %c1_99, %c1_100, %c0_101, %c0_102] : memref<1x2x4x6x8xf32, #tpu.memory_space<vmem>>, vector<1x1x1x4x8xf32>
    %71 = vector.shape_cast %70 : vector<1x1x1x4x8xf32> to vector<4x8xf32>
    %c3_103 = arith.constant 3 : index
    %c0_104 = arith.constant 0 : index
    %c0_105 = arith.constant 0 : index
    %72 = vector.load %arg2[%c3_103, %c0_104, %c0_105] : memref<9x8x128xf32, #tpu.memory_space<vmem>>, vector<1x8x128xf32>
    %73 = vector.shape_cast %72 : vector<1x8x128xf32> to vector<8x128xf32>
    %cst_106 = arith.constant dense<0.000000e+00> : vector<4x128xf32>
    %74 = tpu.matmul %71, %73, %cst_106 {dimension_numbers = #tpu.dot_dimension_numbers<[1], [0], [0], [1], [0, 0, 1, 1], [], []>} : vector<4x8xf32>, vector<8x128xf32>, vector<4x128xf32> -> vector<4x128xf32>
    %75 = arith.addf %69, %74 : vector<4x128xf32>
    %c0_107 = arith.constant 0 : index
    %c1_108 = arith.constant 1 : index
    %c2_109 = arith.constant 2 : index
    %c0_110 = arith.constant 0 : index
    %c0_111 = arith.constant 0 : index
    %76 = vector.load %arg1[%c0_107, %c1_108, %c2_109, %c0_110, %c0_111] : memref<1x2x4x6x8xf32, #tpu.memory_space<vmem>>, vector<1x1x1x4x8xf32>
    %77 = vector.shape_cast %76 : vector<1x1x1x4x8xf32> to vector<4x8xf32>
    %c4_112 = arith.constant 4 : index
    %c0_113 = arith.constant 0 : index
    %c0_114 = arith.constant 0 : index
    %78 = vector.load %arg2[%c4_112, %c0_113, %c0_114] : memref<9x8x128xf32, #tpu.memory_space<vmem>>, vector<1x8x128xf32>
    %79 = vector.shape_cast %78 : vector<1x8x128xf32> to vector<8x128xf32>
    %cst_115 = arith.constant dense<0.000000e+00> : vector<4x128xf32>
    %80 = tpu.matmul %77, %79, %cst_115 {dimension_numbers = #tpu.dot_dimension_numbers<[1], [0], [0], [1], [0, 0, 1, 1], [], []>} : vector<4x8xf32>, vector<8x128xf32>, vector<4x128xf32> -> vector<4x128xf32>
    %81 = arith.addf %75, %80 : vector<4x128xf32>
    %c0_116 = arith.constant 0 : index
    %c1_117 = arith.constant 1 : index
    %c3_118 = arith.constant 3 : index
    %c0_119 = arith.constant 0 : index
    %c0_120 = arith.constant 0 : index
    %82 = vector.load %arg1[%c0_116, %c1_117, %c3_118, %c0_119, %c0_120] : memref<1x2x4x6x8xf32, #tpu.memory_space<vmem>>, vector<1x1x1x4x8xf32>
    %83 = vector.shape_cast %82 : vector<1x1x1x4x8xf32> to vector<4x8xf32>
    %c5_121 = arith.constant 5 : index
    %c0_122 = arith.constant 0 : index
    %c0_123 = arith.constant 0 : index
    %84 = vector.load %arg2[%c5_121, %c0_122, %c0_123] : memref<9x8x128xf32, #tpu.memory_space<vmem>>, vector<1x8x128xf32>
    %85 = vector.shape_cast %84 : vector<1x8x128xf32> to vector<8x128xf32>
    %cst_124 = arith.constant dense<0.000000e+00> : vector<4x128xf32>
    %86 = tpu.matmul %83, %85, %cst_124 {dimension_numbers = #tpu.dot_dimension_numbers<[1], [0], [0], [1], [0, 0, 1, 1], [], []>} : vector<4x8xf32>, vector<8x128xf32>, vector<4x128xf32> -> vector<4x128xf32>
    %87 = arith.addf %81, %86 : vector<4x128xf32>
    %c0_125 = arith.constant 0 : index
    %c0_126 = arith.constant 0 : index
    %c1_127 = arith.constant 1 : index
    %c2_128 = arith.constant 2 : index
    %c0_129 = arith.constant 0 : index
    %88 = vector.load %arg1[%c0_125, %c0_126, %c1_127, %c2_128, %c0_129] : memref<1x2x4x6x8xf32, #tpu.memory_space<vmem>>, vector<1x1x1x4x8xf32>
    %89 = vector.shape_cast %88 : vector<1x1x1x4x8xf32> to vector<4x8xf32>
    %c6_130 = arith.constant 6 : index
    %c0_131 = arith.constant 0 : index
    %c0_132 = arith.constant 0 : index
    %90 = vector.load %arg2[%c6_130, %c0_131, %c0_132] : memref<9x8x128xf32, #tpu.memory_space<vmem>>, vector<1x8x128xf32>
    %91 = vector.shape_cast %90 : vector<1x8x128xf32> to vector<8x128xf32>
    %cst_133 = arith.constant dense<0.000000e+00> : vector<4x128xf32>
    %92 = tpu.matmul %89, %91, %cst_133 {dimension_numbers = #tpu.dot_dimension_numbers<[1], [0], [0], [1], [0, 0, 1, 1], [], []>} : vector<4x8xf32>, vector<8x128xf32>, vector<4x128xf32> -> vector<4x128xf32>
    %93 = arith.addf %87, %92 : vector<4x128xf32>
    %c0_134 = arith.constant 0 : index
    %c0_135 = arith.constant 0 : index
    %c2_136 = arith.constant 2 : index
    %c2_137 = arith.constant 2 : index
    %c0_138 = arith.constant 0 : index
    %94 = vector.load %arg1[%c0_134, %c0_135, %c2_136, %c2_137, %c0_138] : memref<1x2x4x6x8xf32, #tpu.memory_space<vmem>>, vector<1x1x1x4x8xf32>
    %95 = vector.shape_cast %94 : vector<1x1x1x4x8xf32> to vector<4x8xf32>
    %c7_139 = arith.constant 7 : index
    %c0_140 = arith.constant 0 : index
    %c0_141 = arith.constant 0 : index
    %96 = vector.load %arg2[%c7_139, %c0_140, %c0_141] : memref<9x8x128xf32, #tpu.memory_space<vmem>>, vector<1x8x128xf32>
    %97 = vector.shape_cast %96 : vector<1x8x128xf32> to vector<8x128xf32>
    %cst_142 = arith.constant dense<0.000000e+00> : vector<4x128xf32>
    %98 = tpu.matmul %95, %97, %cst_142 {dimension_numbers = #tpu.dot_dimension_numbers<[1], [0], [0], [1], [0, 0, 1, 1], [], []>} : vector<4x8xf32>, vector<8x128xf32>, vector<4x128xf32> -> vector<4x128xf32>
    %99 = arith.addf %93, %98 : vector<4x128xf32>
    %c0_143 = arith.constant 0 : index
    %c0_144 = arith.constant 0 : index
    %c3_145 = arith.constant 3 : index
    %c2_146 = arith.constant 2 : index
    %c0_147 = arith.constant 0 : index
    %100 = vector.load %arg1[%c0_143, %c0_144, %c3_145, %c2_146, %c0_147] : memref<1x2x4x6x8xf32, #tpu.memory_space<vmem>>, vector<1x1x1x4x8xf32>
    %101 = vector.shape_cast %100 : vector<1x1x1x4x8xf32> to vector<4x8xf32>
    %c8_148 = arith.constant 8 : index
    %c0_149 = arith.constant 0 : index
    %c0_150 = arith.constant 0 : index
    %102 = vector.load %arg2[%c8_148, %c0_149, %c0_150] : memref<9x8x128xf32, #tpu.memory_space<vmem>>, vector<1x8x128xf32>
    %103 = vector.shape_cast %102 : vector<1x8x128xf32> to vector<8x128xf32>
    %cst_151 = arith.constant dense<0.000000e+00> : vector<4x128xf32>
    %104 = tpu.matmul %101, %103, %cst_151 {dimension_numbers = #tpu.dot_dimension_numbers<[1], [0], [0], [1], [0, 0, 1, 1], [], []>} : vector<4x8xf32>, vector<8x128xf32>, vector<4x128xf32> -> vector<4x128xf32>
    %105 = arith.addf %99, %104 : vector<4x128xf32>
    %106 = arith.maximumf %52, %105 : vector<4x128xf32>
    %c0_152 = arith.constant 0 : index
    %c1_153 = arith.constant 1 : index
    %c0_154 = arith.constant 0 : index
    %c0_155 = arith.constant 0 : index
    %c0_156 = arith.constant 0 : index
    %107 = vector.load %arg1[%c0_152, %c1_153, %c0_154, %c0_155, %c0_156] : memref<1x2x4x6x8xf32, #tpu.memory_space<vmem>>, vector<1x1x1x4x8xf32>
    %108 = vector.shape_cast %107 : vector<1x1x1x4x8xf32> to vector<4x8xf32>
    %c0_157 = arith.constant 0 : index
    %c0_158 = arith.constant 0 : index
    %c0_159 = arith.constant 0 : index
    %109 = vector.load %arg2[%c0_157, %c0_158, %c0_159] : memref<9x8x128xf32, #tpu.memory_space<vmem>>, vector<1x8x128xf32>
    %110 = vector.shape_cast %109 : vector<1x8x128xf32> to vector<8x128xf32>
    %cst_160 = arith.constant dense<0.000000e+00> : vector<4x128xf32>
    %111 = tpu.matmul %108, %110, %cst_160 {dimension_numbers = #tpu.dot_dimension_numbers<[1], [0], [0], [1], [0, 0, 1, 1], [], []>} : vector<4x8xf32>, vector<8x128xf32>, vector<4x128xf32> -> vector<4x128xf32>
    %c0_161 = arith.constant 0 : index
    %c1_162 = arith.constant 1 : index
    %c1_163 = arith.constant 1 : index
    %c0_164 = arith.constant 0 : index
    %c0_165 = arith.constant 0 : index
    %112 = vector.load %arg1[%c0_161, %c1_162, %c1_163, %c0_164, %c0_165] : memref<1x2x4x6x8xf32, #tpu.memory_space<vmem>>, vector<1x1x1x4x8xf32>
    %113 = vector.shape_cast %112 : vector<1x1x1x4x8xf32> to vector<4x8xf32>
    %c1_166 = arith.constant 1 : index
    %c0_167 = arith.constant 0 : index
    %c0_168 = arith.constant 0 : index
    %114 = vector.load %arg2[%c1_166, %c0_167, %c0_168] : memref<9x8x128xf32, #tpu.memory_space<vmem>>, vector<1x8x128xf32>
    %115 = vector.shape_cast %114 : vector<1x8x128xf32> to vector<8x128xf32>
    %cst_169 = arith.constant dense<0.000000e+00> : vector<4x128xf32>
    %116 = tpu.matmul %113, %115, %cst_169 {dimension_numbers = #tpu.dot_dimension_numbers<[1], [0], [0], [1], [0, 0, 1, 1], [], []>} : vector<4x8xf32>, vector<8x128xf32>, vector<4x128xf32> -> vector<4x128xf32>
    %117 = arith.addf %111, %116 : vector<4x128xf32>
    %c0_170 = arith.constant 0 : index
    %c1_171 = arith.constant 1 : index
    %c2_172 = arith.constant 2 : index
    %c0_173 = arith.constant 0 : index
    %c0_174 = arith.constant 0 : index
    %118 = vector.load %arg1[%c0_170, %c1_171, %c2_172, %c0_173, %c0_174] : memref<1x2x4x6x8xf32, #tpu.memory_space<vmem>>, vector<1x1x1x4x8xf32>
    %119 = vector.shape_cast %118 : vector<1x1x1x4x8xf32> to vector<4x8xf32>
    %c2_175 = arith.constant 2 : index
    %c0_176 = arith.constant 0 : index
    %c0_177 = arith.constant 0 : index
    %120 = vector.load %arg2[%c2_175, %c0_176, %c0_177] : memref<9x8x128xf32, #tpu.memory_space<vmem>>, vector<1x8x128xf32>
    %121 = vector.shape_cast %120 : vector<1x8x128xf32> to vector<8x128xf32>
    %cst_178 = arith.constant dense<0.000000e+00> : vector<4x128xf32>
    %122 = tpu.matmul %119, %121, %cst_178 {dimension_numbers = #tpu.dot_dimension_numbers<[1], [0], [0], [1], [0, 0, 1, 1], [], []>} : vector<4x8xf32>, vector<8x128xf32>, vector<4x128xf32> -> vector<4x128xf32>
    %123 = arith.addf %117, %122 : vector<4x128xf32>
    %c0_179 = arith.constant 0 : index
    %c0_180 = arith.constant 0 : index
    %c0_181 = arith.constant 0 : index
    %c2_182 = arith.constant 2 : index
    %c0_183 = arith.constant 0 : index
    %124 = vector.load %arg1[%c0_179, %c0_180, %c0_181, %c2_182, %c0_183] : memref<1x2x4x6x8xf32, #tpu.memory_space<vmem>>, vector<1x1x1x4x8xf32>
    %125 = vector.shape_cast %124 : vector<1x1x1x4x8xf32> to vector<4x8xf32>
    %c3_184 = arith.constant 3 : index
    %c0_185 = arith.constant 0 : index
    %c0_186 = arith.constant 0 : index
    %126 = vector.load %arg2[%c3_184, %c0_185, %c0_186] : memref<9x8x128xf32, #tpu.memory_space<vmem>>, vector<1x8x128xf32>
    %127 = vector.shape_cast %126 : vector<1x8x128xf32> to vector<8x128xf32>
    %cst_187 = arith.constant dense<0.000000e+00> : vector<4x128xf32>
    %128 = tpu.matmul %125, %127, %cst_187 {dimension_numbers = #tpu.dot_dimension_numbers<[1], [0], [0], [1], [0, 0, 1, 1], [], []>} : vector<4x8xf32>, vector<8x128xf32>, vector<4x128xf32> -> vector<4x128xf32>
    %129 = arith.addf %123, %128 : vector<4x128xf32>
    %c0_188 = arith.constant 0 : index
    %c0_189 = arith.constant 0 : index
    %c1_190 = arith.constant 1 : index
    %c2_191 = arith.constant 2 : index
    %c0_192 = arith.constant 0 : index
    %130 = vector.load %arg1[%c0_188, %c0_189, %c1_190, %c2_191, %c0_192] : memref<1x2x4x6x8xf32, #tpu.memory_space<vmem>>, vector<1x1x1x4x8xf32>
    %131 = vector.shape_cast %130 : vector<1x1x1x4x8xf32> to vector<4x8xf32>
    %c4_193 = arith.constant 4 : index
    %c0_194 = arith.constant 0 : index
    %c0_195 = arith.constant 0 : index
    %132 = vector.load %arg2[%c4_193, %c0_194, %c0_195] : memref<9x8x128xf32, #tpu.memory_space<vmem>>, vector<1x8x128xf32>
    %133 = vector.shape_cast %132 : vector<1x8x128xf32> to vector<8x128xf32>
    %cst_196 = arith.constant dense<0.000000e+00> : vector<4x128xf32>
    %134 = tpu.matmul %131, %133, %cst_196 {dimension_numbers = #tpu.dot_dimension_numbers<[1], [0], [0], [1], [0, 0, 1, 1], [], []>} : vector<4x8xf32>, vector<8x128xf32>, vector<4x128xf32> -> vector<4x128xf32>
    %135 = arith.addf %129, %134 : vector<4x128xf32>
    %c0_197 = arith.constant 0 : index
    %c0_198 = arith.constant 0 : index
    %c2_199 = arith.constant 2 : index
    %c2_200 = arith.constant 2 : index
    %c0_201 = arith.constant 0 : index
    %136 = vector.load %arg1[%c0_197, %c0_198, %c2_199, %c2_200, %c0_201] : memref<1x2x4x6x8xf32, #tpu.memory_space<vmem>>, vector<1x1x1x4x8xf32>
    %137 = vector.shape_cast %136 : vector<1x1x1x4x8xf32> to vector<4x8xf32>
    %c5_202 = arith.constant 5 : index
    %c0_203 = arith.constant 0 : index
    %c0_204 = arith.constant 0 : index
    %138 = vector.load %arg2[%c5_202, %c0_203, %c0_204] : memref<9x8x128xf32, #tpu.memory_space<vmem>>, vector<1x8x128xf32>
    %139 = vector.shape_cast %138 : vector<1x8x128xf32> to vector<8x128xf32>
    %cst_205 = arith.constant dense<0.000000e+00> : vector<4x128xf32>
    %140 = tpu.matmul %137, %139, %cst_205 {dimension_numbers = #tpu.dot_dimension_numbers<[1], [0], [0], [1], [0, 0, 1, 1], [], []>} : vector<4x8xf32>, vector<8x128xf32>, vector<4x128xf32> -> vector<4x128xf32>
    %141 = arith.addf %135, %140 : vector<4x128xf32>
    %c0_206 = arith.constant 0 : index
    %c1_207 = arith.constant 1 : index
    %c0_208 = arith.constant 0 : index
    %c2_209 = arith.constant 2 : index
    %c0_210 = arith.constant 0 : index
    %142 = vector.load %arg1[%c0_206, %c1_207, %c0_208, %c2_209, %c0_210] : memref<1x2x4x6x8xf32, #tpu.memory_space<vmem>>, vector<1x1x1x4x8xf32>
    %143 = vector.shape_cast %142 : vector<1x1x1x4x8xf32> to vector<4x8xf32>
    %c6_211 = arith.constant 6 : index
    %c0_212 = arith.constant 0 : index
    %c0_213 = arith.constant 0 : index
    %144 = vector.load %arg2[%c6_211, %c0_212, %c0_213] : memref<9x8x128xf32, #tpu.memory_space<vmem>>, vector<1x8x128xf32>
    %145 = vector.shape_cast %144 : vector<1x8x128xf32> to vector<8x128xf32>
    %cst_214 = arith.constant dense<0.000000e+00> : vector<4x128xf32>
    %146 = tpu.matmul %143, %145, %cst_214 {dimension_numbers = #tpu.dot_dimension_numbers<[1], [0], [0], [1], [0, 0, 1, 1], [], []>} : vector<4x8xf32>, vector<8x128xf32>, vector<4x128xf32> -> vector<4x128xf32>
    %147 = arith.addf %141, %146 : vector<4x128xf32>
    %c0_215 = arith.constant 0 : index
    %c1_216 = arith.constant 1 : index
    %c1_217 = arith.constant 1 : index
    %c2_218 = arith.constant 2 : index
    %c0_219 = arith.constant 0 : index
    %148 = vector.load %arg1[%c0_215, %c1_216, %c1_217, %c2_218, %c0_219] : memref<1x2x4x6x8xf32, #tpu.memory_space<vmem>>, vector<1x1x1x4x8xf32>
    %149 = vector.shape_cast %148 : vector<1x1x1x4x8xf32> to vector<4x8xf32>
    %c7_220 = arith.constant 7 : index
    %c0_221 = arith.constant 0 : index
    %c0_222 = arith.constant 0 : index
    %150 = vector.load %arg2[%c7_220, %c0_221, %c0_222] : memref<9x8x128xf32, #tpu.memory_space<vmem>>, vector<1x8x128xf32>
    %151 = vector.shape_cast %150 : vector<1x8x128xf32> to vector<8x128xf32>
    %cst_223 = arith.constant dense<0.000000e+00> : vector<4x128xf32>
    %152 = tpu.matmul %149, %151, %cst_223 {dimension_numbers = #tpu.dot_dimension_numbers<[1], [0], [0], [1], [0, 0, 1, 1], [], []>} : vector<4x8xf32>, vector<8x128xf32>, vector<4x128xf32> -> vector<4x128xf32>
    %153 = arith.addf %147, %152 : vector<4x128xf32>
    %c0_224 = arith.constant 0 : index
    %c1_225 = arith.constant 1 : index
    %c2_226 = arith.constant 2 : index
    %c2_227 = arith.constant 2 : index
    %c0_228 = arith.constant 0 : index
    %154 = vector.load %arg1[%c0_224, %c1_225, %c2_226, %c2_227, %c0_228] : memref<1x2x4x6x8xf32, #tpu.memory_space<vmem>>, vector<1x1x1x4x8xf32>
    %155 = vector.shape_cast %154 : vector<1x1x1x4x8xf32> to vector<4x8xf32>
    %c8_229 = arith.constant 8 : index
    %c0_230 = arith.constant 0 : index
    %c0_231 = arith.constant 0 : index
    %156 = vector.load %arg2[%c8_229, %c0_230, %c0_231] : memref<9x8x128xf32, #tpu.memory_space<vmem>>, vector<1x8x128xf32>
    %157 = vector.shape_cast %156 : vector<1x8x128xf32> to vector<8x128xf32>
    %cst_232 = arith.constant dense<0.000000e+00> : vector<4x128xf32>
    %158 = tpu.matmul %155, %157, %cst_232 {dimension_numbers = #tpu.dot_dimension_numbers<[1], [0], [0], [1], [0, 0, 1, 1], [], []>} : vector<4x8xf32>, vector<8x128xf32>, vector<4x128xf32> -> vector<4x128xf32>
    %159 = arith.addf %153, %158 : vector<4x128xf32>
    %160 = arith.maximumf %106, %159 : vector<4x128xf32>
    %c0_233 = arith.constant 0 : index
    %c1_234 = arith.constant 1 : index
    %c1_235 = arith.constant 1 : index
    %c0_236 = arith.constant 0 : index
    %c0_237 = arith.constant 0 : index
    %161 = vector.load %arg1[%c0_233, %c1_234, %c1_235, %c0_236, %c0_237] : memref<1x2x4x6x8xf32, #tpu.memory_space<vmem>>, vector<1x1x1x4x8xf32>
    %162 = vector.shape_cast %161 : vector<1x1x1x4x8xf32> to vector<4x8xf32>
    %c0_238 = arith.constant 0 : index
    %c0_239 = arith.constant 0 : index
    %c0_240 = arith.constant 0 : index
    %163 = vector.load %arg2[%c0_238, %c0_239, %c0_240] : memref<9x8x128xf32, #tpu.memory_space<vmem>>, vector<1x8x128xf32>
    %164 = vector.shape_cast %163 : vector<1x8x128xf32> to vector<8x128xf32>
    %cst_241 = arith.constant dense<0.000000e+00> : vector<4x128xf32>
    %165 = tpu.matmul %162, %164, %cst_241 {dimension_numbers = #tpu.dot_dimension_numbers<[1], [0], [0], [1], [0, 0, 1, 1], [], []>} : vector<4x8xf32>, vector<8x128xf32>, vector<4x128xf32> -> vector<4x128xf32>
    %c0_242 = arith.constant 0 : index
    %c1_243 = arith.constant 1 : index
    %c2_244 = arith.constant 2 : index
    %c0_245 = arith.constant 0 : index
    %c0_246 = arith.constant 0 : index
    %166 = vector.load %arg1[%c0_242, %c1_243, %c2_244, %c0_245, %c0_246] : memref<1x2x4x6x8xf32, #tpu.memory_space<vmem>>, vector<1x1x1x4x8xf32>
    %167 = vector.shape_cast %166 : vector<1x1x1x4x8xf32> to vector<4x8xf32>
    %c1_247 = arith.constant 1 : index
    %c0_248 = arith.constant 0 : index
    %c0_249 = arith.constant 0 : index
    %168 = vector.load %arg2[%c1_247, %c0_248, %c0_249] : memref<9x8x128xf32, #tpu.memory_space<vmem>>, vector<1x8x128xf32>
    %169 = vector.shape_cast %168 : vector<1x8x128xf32> to vector<8x128xf32>
    %cst_250 = arith.constant dense<0.000000e+00> : vector<4x128xf32>
    %170 = tpu.matmul %167, %169, %cst_250 {dimension_numbers = #tpu.dot_dimension_numbers<[1], [0], [0], [1], [0, 0, 1, 1], [], []>} : vector<4x8xf32>, vector<8x128xf32>, vector<4x128xf32> -> vector<4x128xf32>
    %171 = arith.addf %165, %170 : vector<4x128xf32>
    %c0_251 = arith.constant 0 : index
    %c1_252 = arith.constant 1 : index
    %c3_253 = arith.constant 3 : index
    %c0_254 = arith.constant 0 : index
    %c0_255 = arith.constant 0 : index
    %172 = vector.load %arg1[%c0_251, %c1_252, %c3_253, %c0_254, %c0_255] : memref<1x2x4x6x8xf32, #tpu.memory_space<vmem>>, vector<1x1x1x4x8xf32>
    %173 = vector.shape_cast %172 : vector<1x1x1x4x8xf32> to vector<4x8xf32>
    %c2_256 = arith.constant 2 : index
    %c0_257 = arith.constant 0 : index
    %c0_258 = arith.constant 0 : index
    %174 = vector.load %arg2[%c2_256, %c0_257, %c0_258] : memref<9x8x128xf32, #tpu.memory_space<vmem>>, vector<1x8x128xf32>
    %175 = vector.shape_cast %174 : vector<1x8x128xf32> to vector<8x128xf32>
    %cst_259 = arith.constant dense<0.000000e+00> : vector<4x128xf32>
    %176 = tpu.matmul %173, %175, %cst_259 {dimension_numbers = #tpu.dot_dimension_numbers<[1], [0], [0], [1], [0, 0, 1, 1], [], []>} : vector<4x8xf32>, vector<8x128xf32>, vector<4x128xf32> -> vector<4x128xf32>
    %177 = arith.addf %171, %176 : vector<4x128xf32>
    %c0_260 = arith.constant 0 : index
    %c0_261 = arith.constant 0 : index
    %c1_262 = arith.constant 1 : index
    %c2_263 = arith.constant 2 : index
    %c0_264 = arith.constant 0 : index
    %178 = vector.load %arg1[%c0_260, %c0_261, %c1_262, %c2_263, %c0_264] : memref<1x2x4x6x8xf32, #tpu.memory_space<vmem>>, vector<1x1x1x4x8xf32>
    %179 = vector.shape_cast %178 : vector<1x1x1x4x8xf32> to vector<4x8xf32>
    %c3_265 = arith.constant 3 : index
    %c0_266 = arith.constant 0 : index
    %c0_267 = arith.constant 0 : index
    %180 = vector.load %arg2[%c3_265, %c0_266, %c0_267] : memref<9x8x128xf32, #tpu.memory_space<vmem>>, vector<1x8x128xf32>
    %181 = vector.shape_cast %180 : vector<1x8x128xf32> to vector<8x128xf32>
    %cst_268 = arith.constant dense<0.000000e+00> : vector<4x128xf32>
    %182 = tpu.matmul %179, %181, %cst_268 {dimension_numbers = #tpu.dot_dimension_numbers<[1], [0], [0], [1], [0, 0, 1, 1], [], []>} : vector<4x8xf32>, vector<8x128xf32>, vector<4x128xf32> -> vector<4x128xf32>
    %183 = arith.addf %177, %182 : vector<4x128xf32>
    %c0_269 = arith.constant 0 : index
    %c0_270 = arith.constant 0 : index
    %c2_271 = arith.constant 2 : index
    %c2_272 = arith.constant 2 : index
    %c0_273 = arith.constant 0 : index
    %184 = vector.load %arg1[%c0_269, %c0_270, %c2_271, %c2_272, %c0_273] : memref<1x2x4x6x8xf32, #tpu.memory_space<vmem>>, vector<1x1x1x4x8xf32>
    %185 = vector.shape_cast %184 : vector<1x1x1x4x8xf32> to vector<4x8xf32>
    %c4_274 = arith.constant 4 : index
    %c0_275 = arith.constant 0 : index
    %c0_276 = arith.constant 0 : index
    %186 = vector.load %arg2[%c4_274, %c0_275, %c0_276] : memref<9x8x128xf32, #tpu.memory_space<vmem>>, vector<1x8x128xf32>
    %187 = vector.shape_cast %186 : vector<1x8x128xf32> to vector<8x128xf32>
    %cst_277 = arith.constant dense<0.000000e+00> : vector<4x128xf32>
    %188 = tpu.matmul %185, %187, %cst_277 {dimension_numbers = #tpu.dot_dimension_numbers<[1], [0], [0], [1], [0, 0, 1, 1], [], []>} : vector<4x8xf32>, vector<8x128xf32>, vector<4x128xf32> -> vector<4x128xf32>
    %189 = arith.addf %183, %188 : vector<4x128xf32>
    %c0_278 = arith.constant 0 : index
    %c0_279 = arith.constant 0 : index
    %c3_280 = arith.constant 3 : index
    %c2_281 = arith.constant 2 : index
    %c0_282 = arith.constant 0 : index
    %190 = vector.load %arg1[%c0_278, %c0_279, %c3_280, %c2_281, %c0_282] : memref<1x2x4x6x8xf32, #tpu.memory_space<vmem>>, vector<1x1x1x4x8xf32>
    %191 = vector.shape_cast %190 : vector<1x1x1x4x8xf32> to vector<4x8xf32>
    %c5_283 = arith.constant 5 : index
    %c0_284 = arith.constant 0 : index
    %c0_285 = arith.constant 0 : index
    %192 = vector.load %arg2[%c5_283, %c0_284, %c0_285] : memref<9x8x128xf32, #tpu.memory_space<vmem>>, vector<1x8x128xf32>
    %193 = vector.shape_cast %192 : vector<1x8x128xf32> to vector<8x128xf32>
    %cst_286 = arith.constant dense<0.000000e+00> : vector<4x128xf32>
    %194 = tpu.matmul %191, %193, %cst_286 {dimension_numbers = #tpu.dot_dimension_numbers<[1], [0], [0], [1], [0, 0, 1, 1], [], []>} : vector<4x8xf32>, vector<8x128xf32>, vector<4x128xf32> -> vector<4x128xf32>
    %195 = arith.addf %189, %194 : vector<4x128xf32>
    %c0_287 = arith.constant 0 : index
    %c1_288 = arith.constant 1 : index
    %c1_289 = arith.constant 1 : index
    %c2_290 = arith.constant 2 : index
    %c0_291 = arith.constant 0 : index
    %196 = vector.load %arg1[%c0_287, %c1_288, %c1_289, %c2_290, %c0_291] : memref<1x2x4x6x8xf32, #tpu.memory_space<vmem>>, vector<1x1x1x4x8xf32>
    %197 = vector.shape_cast %196 : vector<1x1x1x4x8xf32> to vector<4x8xf32>
    %c6_292 = arith.constant 6 : index
    %c0_293 = arith.constant 0 : index
    %c0_294 = arith.constant 0 : index
    %198 = vector.load %arg2[%c6_292, %c0_293, %c0_294] : memref<9x8x128xf32, #tpu.memory_space<vmem>>, vector<1x8x128xf32>
    %199 = vector.shape_cast %198 : vector<1x8x128xf32> to vector<8x128xf32>
    %cst_295 = arith.constant dense<0.000000e+00> : vector<4x128xf32>
    %200 = tpu.matmul %197, %199, %cst_295 {dimension_numbers = #tpu.dot_dimension_numbers<[1], [0], [0], [1], [0, 0, 1, 1], [], []>} : vector<4x8xf32>, vector<8x128xf32>, vector<4x128xf32> -> vector<4x128xf32>
    %201 = arith.addf %195, %200 : vector<4x128xf32>
    %c0_296 = arith.constant 0 : index
    %c1_297 = arith.constant 1 : index
    %c2_298 = arith.constant 2 : index
    %c2_299 = arith.constant 2 : index
    %c0_300 = arith.constant 0 : index
    %202 = vector.load %arg1[%c0_296, %c1_297, %c2_298, %c2_299, %c0_300] : memref<1x2x4x6x8xf32, #tpu.memory_space<vmem>>, vector<1x1x1x4x8xf32>
    %203 = vector.shape_cast %202 : vector<1x1x1x4x8xf32> to vector<4x8xf32>
    %c7_301 = arith.constant 7 : index
    %c0_302 = arith.constant 0 : index
    %c0_303 = arith.constant 0 : index
    %204 = vector.load %arg2[%c7_301, %c0_302, %c0_303] : memref<9x8x128xf32, #tpu.memory_space<vmem>>, vector<1x8x128xf32>
    %205 = vector.shape_cast %204 : vector<1x8x128xf32> to vector<8x128xf32>
    %cst_304 = arith.constant dense<0.000000e+00> : vector<4x128xf32>
    %206 = tpu.matmul %203, %205, %cst_304 {dimension_numbers = #tpu.dot_dimension_numbers<[1], [0], [0], [1], [0, 0, 1, 1], [], []>} : vector<4x8xf32>, vector<8x128xf32>, vector<4x128xf32> -> vector<4x128xf32>
    %207 = arith.addf %201, %206 : vector<4x128xf32>
    %c0_305 = arith.constant 0 : index
    %c1_306 = arith.constant 1 : index
    %c3_307 = arith.constant 3 : index
    %c2_308 = arith.constant 2 : index
    %c0_309 = arith.constant 0 : index
    %208 = vector.load %arg1[%c0_305, %c1_306, %c3_307, %c2_308, %c0_309] : memref<1x2x4x6x8xf32, #tpu.memory_space<vmem>>, vector<1x1x1x4x8xf32>
    %209 = vector.shape_cast %208 : vector<1x1x1x4x8xf32> to vector<4x8xf32>
    %c8_310 = arith.constant 8 : index
    %c0_311 = arith.constant 0 : index
    %c0_312 = arith.constant 0 : index
    %210 = vector.load %arg2[%c8_310, %c0_311, %c0_312] : memref<9x8x128xf32, #tpu.memory_space<vmem>>, vector<1x8x128xf32>
    %211 = vector.shape_cast %210 : vector<1x8x128xf32> to vector<8x128xf32>
    %cst_313 = arith.constant dense<0.000000e+00> : vector<4x128xf32>
    %212 = tpu.matmul %209, %211, %cst_313 {dimension_numbers = #tpu.dot_dimension_numbers<[1], [0], [0], [1], [0, 0, 1, 1], [], []>} : vector<4x8xf32>, vector<8x128xf32>, vector<4x128xf32> -> vector<4x128xf32>
    %213 = arith.addf %207, %212 : vector<4x128xf32>
    %214 = arith.maximumf %160, %213 : vector<4x128xf32>
    %c0_314 = arith.constant 0 : index
    %c0_315 = arith.constant 0 : index
    %215 = vector.load %arg3[%c0_314, %c0_315] : memref<1x128xf32, #tpu.memory_space<vmem>>, vector<1x128xf32>
    %216 = vector.broadcast %215 : vector<1x128xf32> to vector<4x128xf32>
    %217 = arith.addf %214, %216 : vector<4x128xf32>
    %cst_316 = arith.constant 0.000000e+00 : f32
    %218 = vector.broadcast %cst_316 : f32 to vector<4x128xf32>
    %219 = arith.maximumf %217, %218 : vector<4x128xf32>
    %c0_317 = arith.constant 0 : index
    %c0_318 = arith.constant 0 : index
    %c0_319 = arith.constant 0 : index
    %220 = vector.load %arg4[%c0_317, %c0_318, %c0_319] : memref<1x4x128xf32, #tpu.memory_space<vmem>>, vector<1x4x128xf32>
    %221 = vector.shape_cast %220 : vector<1x4x128xf32> to vector<4x128xf32>
    %222 = vector.shape_cast %219 : vector<4x128xf32> to vector<1x4x128xf32>
    tpu.vector_store %arg4[%c0_317, %c0_318, %c0_319], %222 {strides = array<i32>} : memref<1x4x128xf32, #tpu.memory_space<vmem>>, vector<1x4x128xf32>,
    return
  }
  func.func @transform_0(%arg0: i32) -> (i32, i32, i32, i32, i32) {
    %c0_i32 = arith.constant 0 : i32
    %c0_i32_0 = arith.constant 0 : i32
    %c0_i32_1 = arith.constant 0 : i32
    %c0_i32_2 = arith.constant 0 : i32
    %c0_i32_3 = arith.constant 0 : i32
    return %arg0, %c0_i32, %c0_i32_0, %c0_i32_1, %c0_i32_2 : i32, i32, i32, i32, i32
  }
  func.func @transform_1(%arg0: i32) -> (i32, i32, i32) {
    %c0_i32 = arith.constant 0 : i32
    %c0_i32_0 = arith.constant 0 : i32
    %c0_i32_1 = arith.constant 0 : i32
    %c0_i32_2 = arith.constant 0 : i32
    return %c0_i32, %c0_i32_0, %c0_i32_1 : i32, i32, i32
  }
  func.func @transform_2(%arg0: i32) -> (i32, i32) {
    %c0_i32 = arith.constant 0 : i32
    %c0_i32_0 = arith.constant 0 : i32
    %c0_i32_1 = arith.constant 0 : i32
    return %c0_i32, %c0_i32_0 : i32, i32
  }
  func.func @transform_3(%arg0: i32) -> (i32, i32, i32) {
    %c0_i32 = arith.constant 0 : i32
    %c0_i32_0 = arith.constant 0 : i32
    %c0_i32_1 = arith.constant 0 : i32
    return %arg0, %c0_i32, %c0_i32_0 : i32, i32, i32
  }
}

</mosaic_0001>

<bundles_post_ra>
// kernel: convnet_forward.3
= control target key start
LH: loop header
LB: loop body
LE: loop exit
PB: predicated region body
PF: predicated region fallthrough
CT: control target
= control target key end

     0   :  { %8 = vsyncpa [#allocation3], 0  ;;  %s3769_s0 = inlined_call_operand.vmem [shape: f32[2,2,4,6,8], index: 0, kind: input, shape index: {}]   ;;  %s3770_s1 = inlined_call_operand.vmem [shape: f32[9,8,128], index: 1, kind: input, shape index: {}]   ;;  %s3771_s2 = inlined_call_operand.vmem [shape: f32[1,128], index: 2, kind: input, shape index: {}]   ;;  %s3772_s3 = inlined_call_operand.hbm [shape: f32[2,4,128], index: 3, kind: output, shape index: {}]  }
   0x1   :  { %10 = vsyncpa [#allocation3 + $0x1], 0  ;;  %s3407_s12 = smov 0   ;;  %s3409_s13 = smov 0  }
   0x2   :  { %s3411_s14 = smov 0   ;;  %s3413_s15 = smov 0  }
   0x3 LB: > { %s3428_s16 = sadd.s32 4294967295, %s3382_s15   ;;  %s2892_s17 = sadd.s32 4294967294, %s3382_s15   ;;  %s3382_s15 = sphi %s3413_s15, %s3778_s15   ;;  %s3378_s14 = sphi %s3411_s14, %s3777_s14   ;;  %s3374_s13 = sphi %s3409_s13, %s3776_s13   ;;  %s3370_s12 = sphi %s3407_s12, %s3775_s12  }
   0x4   : > { %s3432_s18 = sadd.s32 1, %s3382_s15   ;;  %s91_s19 = sadd.s32 1, %s3378_s14 }
   0x5   : > { %s88_s20 = ssub.s32 %s3382_s15, %s3432_s18  ;;  %p101_p0 = scmp.ne.s32.totalorder %s3378_s14, %s3374_s13 }
   0x6   : > { %p89_p1 = scmp.eq.s32.totalorder %s88_s20, 0  ;;  %p102_p2 = scmp.eq.s32.totalorder %s3428_s16, 1 }
   0x7   : > { %p107_p3 = scmp.ne.s32.totalorder %s3374_s13, %s3370_s12  ;;  %p108_p4 = scmp.eq.s32.totalorder %s2892_s17, 1 }
   0x8   : > { %s3443_s21 = scalar_select %p89_p1, %s3378_s14, %s91_s19  }
   0x9   : > { %p3445_p5 = por %p102_p2, %p101_p0  ;;  %p3449_p6 = por %p108_p4, %p107_p3 }
   0xa   : > { %p2895_p7 = scmp.ge.s32.totalorder %s3382_s15, 1  ;;  %p140_p8 = scmp.lt.s32.totalorder %s3382_s15, 3 }
   0xc   : > { %p141_p9 = pnand %p2895_p7, %p140_p8 }
   0xd   : > { %v3458_v0 = vld [vmem:[%s3770_s1 + $0x8] sm:$0xff] (!%p141_p9)  ;;  %p164_p10 = scmp.lt.s32.totalorder (!%p141_p9), %s3428_s16, 1  ;;  %v3384_v1 = vmov (!%p141_p9), 0.0   ;;  %vm3385_vm0 = vmmov (!%p141_p9), 0   ;;  %vm175_vm1 = vcmask (!%p141_p9), 64512   ;;  %v3480_v2 = vld [vmem:[%s3770_s1] sm:$0xff] (!%p141_p9) }
   0xe   : > { %144 = sbr.rel (%p141_p9) target bundleno = 392 (0x188), region = 32  ;;  %3035 = vmatprep.subr.mxu0 (!%p141_p9), %v3384_v1  ;;  %3080 = vmatprep.subr.mxu1 (!%p141_p9), %v3384_v1  ;;  %v3498_v6 = vld [vmem:[%s3770_s1 + $0x10] sm:$0xff] (!%p141_p9)  ;;  %v3514_v8 = vld [vmem:[%s3770_s1 + $0x18] sm:$0xff] (!%p141_p9)  ;;  %v3535_v11 = vld [vmem:[%s3770_s1 + $0x20] sm:$0xff] (!%p141_p9)  ;;  %s161_s29 = sand.u32 (!%p141_p9), 1, %s3374_s13  }
   0xf   : > { %3036 = vmatpush3.msra.mxu0 (!%p141_p9), %v3458_v0  ;;  %3037 = vmatprep.mubr.msk.f32.mxu0 (!%p141_p9), %vm3385_vm0, %v3384_v1  ;;  %v3555_v13 = vld [vmem:[%s3770_s1 + $0x28] sm:$0xff] (!%p141_p9)  ;;  %v3573_v15 = vld [vmem:[%s3770_s1 + $0x30] sm:$0xff] (!%p141_p9)  ;;  %v3591_v18 = vld [vmem:[%s3770_s1 + $0x38] sm:$0xff] (!%p141_p9)  ;;  %s2896_s4 = sshll.u32 (!%p141_p9), %s161_s29, 2  ;;  %s2959_s6 = sshll.u32 (!%p141_p9), %s3428_s16, 6 }
  0x10   : > { %3040 = vmatprep.subr.mxu0 (!%p141_p9), %v3384_v1  ;;  %3081 = vmatpush3.msra.mxu1 (!%p141_p9), %v3458_v0  ;;  %v3607_v20 = vld [vmem:[%s3770_s1 + $0x40] sm:$0xff] (!%p141_p9)  ;;  %s163_s7 = scalar_lea.vmem (!%p141_p9), [#allocation2], %s2896_s4  ;;  %s3727_s11 = scalar_lea.hbm (!%p141_p9), %s3772_s3, %s2959_s6 }
  0x11   : > { %3082 = vmatprep.mubr.msk.f32.mxu1 (!%p141_p9), %vm3385_vm0, %v3384_v1  ;;  %3085 = vmatprep.subr.mxu1 (!%p141_p9), %v3384_v1  ;;  %v2957_v36 = vld [vmem:[%s3771_s2] ss:$0 sm:$0xff] (!%p141_p9)  ;;  %s2833_s8 = sshll.u32 (!%p141_p9), %s163_s7, 4  ;;  %s2820_s17 = scalar_lea.sflag (!%p141_p9), [#allocation3], %s161_s29  ;;  %s3729_s8 = int_to_ptr.vmem [resolvable:$true] %s2833_s8 }
  0x12   : > { %s3320_s19 = scalar_lea.vmem (!%p141_p9), %s3729_s8, 64 }
  0x13   : > { %p3321_p11 = scmp.ne.s32.totalorder (!%p141_p9), %s3729_s8, %s3320_s19 }
  0x15   : > { %s165_s26 = scalar_select %p164_p10, %s3428_s16, 1 }
  0x16   : > { %p3322_p12 = pnand %p3321_p11, %p3445_p5  ;;  %s3386_s16 = smov [#allocation2]  }
  0x17   : > { %s2962_s27 = sshll.u32 %s165_s26, 6  ;;  %s3324_s20 = sshll.u32 %s3386_s16, 4  ;;  %s3325_s20 = int_to_ptr.vmem [resolvable:$false] %s3324_s20 }
  0x18   : > { %s3475_s30 = scalar_lea.vmem %s3769_s0, %s2962_s27  ;;  %p3323_p13 = pneg %p3322_p12 }
  0x19   : > { %v2899_v3 = vld [vmem:[%s3475_s30 + $0x8] sm:$0xf]  ;;  %v2903_v4 = vld [vmem:[%s3475_s30 + $0x10] sm:$0xf]  ;;  %v169_v5 = vld [vmem:[%s3475_s30] sm:$0xf]  ;;  %p3327_p0 = scmp.lt.s32.totalorder %s3729_s8, %s3325_s20 }
  0x1a   : > { %3038 = vmatmul.mubr.msk.f32.vlgmr.msra.gmra.mrb[0].mxu0 %vm175_vm1, %v2899_v3  ;;  %3083 = vmatmul.mubr.msk.f32.vlgmr.msra.gmra.mrb[0].mxu1 %vm175_vm1, %v2903_v4  ;;  %v2925_v7 = vld [vmem:[%s3475_s30 + $0x18] sm:$0xf]  ;;  %v3527_v9 = vld [vmem:[%s3475_s30 + $0x20] sm:$0xf]  ;;  %v3530_v10 = vld [vmem:[%s3475_s30 + $0x28] sm:$0xf] }
  0x1b   : > { %3041 = vmatpush3.msra.mxu0 %v3480_v2  ;;  %3086 = vmatpush3.msra.mxu1 %v3480_v2  ;;  %v3550_v12 = vld [vmem:[%s3475_s30 + $0x30] sm:$0xf]  ;;  %v2929_v14 = vld [vmem:[%s3475_s30 + $0x38] sm:$0xf]  ;;  %v634_v16 = vld [vmem:[%s3475_s30 + $0x2] sm:$0xf] }
  0x1c   : > { %3042 = vmatprep.mubr.msk.f32.mxu0 %vm3385_vm0, %v3384_v1  ;;  %3045 = vmatprep.subr.mxu0 %v3384_v1  ;;  %v2917_v17 = vld [vmem:[%s3475_s30 + $0xa] sm:$0xf]  ;;  %v2920_v19 = vld [vmem:[%s3475_s30 + $0x12] sm:$0xf]  ;;  %v2933_v21 = vld [vmem:[%s3475_s30 + $0x1a] sm:$0xf] }
  0x1d   : > { %3087 = vmatprep.mubr.msk.f32.mxu1 %vm3385_vm0, %v3384_v1  ;;  %3090 = vmatprep.subr.mxu1 %v3384_v1  ;;  %v2941_v22 = vld [vmem:[%s3475_s30 + $0x22] sm:$0xf]  ;;  %v2943_v23 = vld [vmem:[%s3475_s30 + $0x2a] sm:$0xf]  ;;  %v2945_v24 = vld [vmem:[%s3475_s30 + $0x32] sm:$0xf] }
  0x1e   : > { %v2955_v25 = vld [vmem:[%s3475_s30 + $0x3a] sm:$0xf]  ;;  %s3326_s24 = scalar_lea.vmem %s3325_s20, 128 }
  0x1f   : > { %p3328_p1 = scmp.lt.s32.totalorder %s3326_s24, %s3320_s19 }
  0x21   : > { %p3329_p2 = por %p3328_p1, %p3327_p0 }
  0x22   : > { %3043 = vmatmul.mubr.msk.f32.vlgmr.msra.gmra.mrb[0].mxu0 %vm175_vm1, %v169_v5  ;;  %3088 = vmatmul.mubr.msk.f32.vlgmr.msra.gmra.mrb[0].mxu1 %vm175_vm1, %v2899_v3 }
  0x23   : > { %3046 = vmatpush3.msra.mxu0 %v3498_v6  ;;  %3091 = vmatpush3.msra.mxu1 %v3498_v6  ;;  %p3330_p3 = pnand %p3329_p2, %p3323_p13 }
  0x24   : > { %3047 = vmatprep.mubr.msk.f32.mxu0 %vm3385_vm0, %v3384_v1  ;;  %3050 = vmatprep.subr.mxu0 %v3384_v1 }
  0x25   : > { %3092 = vmatprep.mubr.msk.f32.mxu1 %vm3385_vm0, %v3384_v1  ;;  %3095 = vmatprep.subr.mxu1 %v3384_v1 }
  0x2a   : > { %3048 = vmatmul.mubr.msk.f32.vlgmr.msra.gmra.mrb[0].mxu0 %vm175_vm1, %v2903_v4  ;;  %3093 = vmatmul.mubr.msk.f32.vlgmr.msra.gmra.mrb[0].mxu1 %vm175_vm1, %v2925_v7 }
  0x2b   : > { %3051 = vmatpush3.msra.mxu0 %v3514_v8  ;;  %3096 = vmatpush3.msra.mxu1 %v3514_v8 }
  0x2c   : > { %3052 = vmatprep.mubr.msk.f32.mxu0 %vm3385_vm0, %v3384_v1  ;;  %3055 = vmatprep.subr.mxu0 %v3384_v1 }
  0x2d   : > { %3097 = vmatprep.mubr.msk.f32.mxu1 %vm3385_vm0, %v3384_v1  ;;  %3100 = vmatprep.subr.mxu1 %v3384_v1 }
  0x32   : > { %3053 = vmatmul.mubr.msk.f32.vlgmr.msra.gmra.mrb[0].mxu0 %vm175_vm1, %v3527_v9  ;;  %3098 = vmatmul.mubr.msk.f32.vlgmr.msra.gmra.mrb[0].mxu1 %vm175_vm1, %v3530_v10 }
  0x33   : > { %3056 = vmatpush3.msra.mxu0 %v3535_v11  ;;  %3101 = vmatpush3.msra.mxu1 %v3535_v11 }
  0x34   : > { %3057 = vmatprep.mubr.msk.f32.mxu0 %vm3385_vm0, %v3384_v1  ;;  %3060 = vmatprep.subr.mxu0 %v3384_v1 }
  0x35   : > { %3102 = vmatprep.mubr.msk.f32.mxu1 %vm3385_vm0, %v3384_v1  ;;  %3105 = vmatprep.subr.mxu1 %v3384_v1 }
  0x3a   : > { %3058 = vmatmul.mubr.msk.f32.vlgmr.msra.gmra.mrb[0].mxu0 %vm175_vm1, %v3530_v10  ;;  %3103 = vmatmul.mubr.msk.f32.vlgmr.msra.gmra.mrb[0].mxu1 %vm175_vm1, %v3550_v12 }
  0x3b   : > { %3061 = vmatpush3.msra.mxu0 %v3555_v13  ;;  %3106 = vmatpush3.msra.mxu1 %v3555_v13 }
  0x3c   : > { %3062 = vmatprep.mubr.msk.f32.mxu0 %vm3385_vm0, %v3384_v1  ;;  %3065 = vmatprep.subr.mxu0 %v3384_v1 }
  0x3d   : > { %3107 = vmatprep.mubr.msk.f32.mxu1 %vm3385_vm0, %v3384_v1  ;;  %3110 = vmatprep.subr.mxu1 %v3384_v1 }
  0x42   : > { %3063 = vmatmul.mubr.msk.f32.vlgmr.msra.gmra.mrb[0].mxu0 %vm175_vm1, %v3550_v12  ;;  %3108 = vmatmul.mubr.msk.f32.vlgmr.msra.gmra.mrb[0].mxu1 %vm175_vm1, %v2929_v14 }
  0x43   : > { %3066 = vmatpush3.msra.mxu0 %v3573_v15  ;;  %3111 = vmatpush3.msra.mxu1 %v3573_v15 }
  0x44   : > { %3067 = vmatprep.mubr.msk.f32.mxu0 %vm3385_vm0, %v3384_v1  ;;  %3070 = vmatprep.subr.mxu0 %v3384_v1 }
  0x45   : > { %3112 = vmatprep.mubr.msk.f32.mxu1 %vm3385_vm0, %v3384_v1  ;;  %3115 = vmatprep.subr.mxu1 %v3384_v1 }
  0x4a   : > { %3068 = vmatmul.mubr.msk.f32.vlgmr.msra.gmra.mrb[0].mxu0 %vm175_vm1, %v634_v16  ;;  %3113 = vmatmul.mubr.msk.f32.vlgmr.msra.gmra.mrb[0].mxu1 %vm175_vm1, %v2917_v17 }
  0x4b   : > { %3071 = vmatpush3.msra.mxu0 %v3591_v18  ;;  %3116 = vmatpush3.msra.mxu1 %v3591_v18 }
  0x4c   : > { %3072 = vmatprep.mubr.msk.f32.mxu0 %vm3385_vm0, %v3384_v1  ;;  %3075 = vmatprep.subr.mxu0 %v3384_v1 }
  0x4d   : > { %3117 = vmatprep.mubr.msk.f32.mxu1 %vm3385_vm0, %v3384_v1  ;;  %3120 = vmatprep.subr.mxu1 %v3384_v1 }
  0x52   : > { %3073 = vmatmul.mubr.msk.f32.vlgmr.msra.gmra.mrb[0].mxu0 %vm175_vm1, %v2917_v17  ;;  %3118 = vmatmul.mubr.msk.f32.vlgmr.msra.gmra.mrb[0].mxu1 %vm175_vm1, %v2920_v19 }
  0x53   : > { %3076 = vmatpush3.msra.mxu0 %v3607_v20  ;;  %3121 = vmatpush3.msra.mxu1 %v3607_v20 }
  0x54   : > { %3077 = vmatprep.mubr.msk.f32.mxu0 %vm3385_vm0, %v3384_v1  ;;  %3122 = vmatprep.mubr.msk.f32.mxu1 %vm3385_vm0, %v3384_v1 }
  0x55   : > { %3125 = vmatprep.subr.mxu0 %v3384_v1  ;;  %3170 = vmatprep.subr.mxu1 %v3384_v1 }
  0x5a   : > { %3078 = vmatmul.mubr.msk.f32.vlgmr.msra.gmra.mrb[0].mxu0 %vm175_vm1, %v2920_v19  ;;  %3123 = vmatmul.mubr.msk.f32.vlgmr.msra.gmra.mrb[0].mxu1 %vm175_vm1, %v2933_v21 }
  0x5b   : > { %3126 = vmatpush3.msra.mxu0 %v3458_v0  ;;  %3171 = vmatpush3.msra.mxu1 %v3458_v0 }
  0x5c   : > { %3127 = vmatprep.mubr.msk.f32.mxu0 %vm3385_vm0, %v3384_v1  ;;  %3130 = vmatprep.subr.mxu0 %v3384_v1 }
  0x5d   : > { %3172 = vmatprep.mubr.msk.f32.mxu1 %vm3385_vm0, %v3384_v1  ;;  %3175 = vmatprep.subr.mxu1 %v3384_v1 }
  0x5e   : > { %3128 = vmatmul.mubr.msk.f32.vlgmr.msra.gmra.mrb[2].mxu0 %vm175_vm1, %v3530_v10  ;;  %3173 = vmatmul.mubr.msk.f32.vlgmr.msra.gmra.mrb[2].mxu1 %vm175_vm1, %v3550_v12 }
  0x5f   : > { %3131 = vmatpush3.msra.mxu0 %v3480_v2  ;;  %3176 = vmatpush3.msra.mxu1 %v3480_v2 }
  0x60   : > { %3132 = vmatprep.mubr.msk.f32.mxu0 %vm3385_vm0, %v3384_v1  ;;  %3135 = vmatprep.subr.mxu0 %v3384_v1 }
  0x61   : > { %3177 = vmatprep.mubr.msk.f32.mxu1 %vm3385_vm0, %v3384_v1  ;;  %3180 = vmatprep.subr.mxu1 %v3384_v1 }
  0x66   : > { %3133 = vmatmul.mubr.msk.f32.vlgmr.msra.gmra.mrb[2].mxu0 %vm175_vm1, %v3527_v9  ;;  %3178 = vmatmul.mubr.msk.f32.vlgmr.msra.gmra.mrb[2].mxu1 %vm175_vm1, %v3530_v10 }
  0x67   : > { %3136 = vmatpush3.msra.mxu0 %v3498_v6  ;;  %3181 = vmatpush3.msra.mxu1 %v3498_v6 }
  0x68   : > { %3137 = vmatprep.mubr.msk.f32.mxu0 %vm3385_vm0, %v3384_v1  ;;  %3140 = vmatprep.subr.mxu0 %v3384_v1 }
  0x69   : > { %3182 = vmatprep.mubr.msk.f32.mxu1 %vm3385_vm0, %v3384_v1  ;;  %3185 = vmatprep.subr.mxu1 %v3384_v1 }
  0x6e   : > { %3138 = vmatmul.mubr.msk.f32.vlgmr.msra.gmra.mrb[2].mxu0 %vm175_vm1, %v3550_v12  ;;  %3183 = vmatmul.mubr.msk.f32.vlgmr.msra.gmra.mrb[2].mxu1 %vm175_vm1, %v2929_v14 }
  0x6f   : > { %3141 = vmatpush3.msra.mxu0 %v3514_v8  ;;  %3186 = vmatpush3.msra.mxu1 %v3514_v8 }
  0x70   : > { %3142 = vmatprep.mubr.msk.f32.mxu0 %vm3385_vm0, %v3384_v1  ;;  %3145 = vmatprep.subr.mxu0 %v3384_v1 }
  0x71   : > { %3187 = vmatprep.mubr.msk.f32.mxu1 %vm3385_vm0, %v3384_v1  ;;  %3190 = vmatprep.subr.mxu1 %v3384_v1 }
  0x76   : > { %3143 = vmatmul.mubr.msk.f32.vlgmr.msra.gmra.mrb[2].mxu0 %vm175_vm1, %v634_v16  ;;  %3188 = vmatmul.mubr.msk.f32.vlgmr.msra.gmra.mrb[2].mxu1 %vm175_vm1, %v2917_v17 }
  0x77   : > { %3146 = vmatpush3.msra.mxu0 %v3535_v11  ;;  %3191 = vmatpush3.msra.mxu1 %v3535_v11 }
  0x78   : > { %3147 = vmatprep.mubr.msk.f32.mxu0 %vm3385_vm0, %v3384_v1  ;;  %3150 = vmatprep.subr.mxu0 %v3384_v1 }
  0x79   : > { %3192 = vmatprep.mubr.msk.f32.mxu1 %vm3385_vm0, %v3384_v1  ;;  %3195 = vmatprep.subr.mxu1 %v3384_v1 }
  0x7e   : > { %3148 = vmatmul.mubr.msk.f32.vlgmr.msra.gmra.mrb[2].mxu0 %vm175_vm1, %v2917_v17  ;;  %3193 = vmatmul.mubr.msk.f32.vlgmr.msra.gmra.mrb[2].mxu1 %vm175_vm1, %v2920_v19 }
  0x7f   : > { %3151 = vmatpush3.msra.mxu0 %v3555_v13  ;;  %3196 = vmatpush3.msra.mxu1 %v3555_v13 }
  0x80   : > { %3152 = vmatprep.mubr.msk.f32.mxu0 %vm3385_vm0, %v3384_v1  ;;  %3155 = vmatprep.subr.mxu0 %v3384_v1 }
  0x81   : > { %3197 = vmatprep.mubr.msk.f32.mxu1 %vm3385_vm0, %v3384_v1  ;;  %3200 = vmatprep.subr.mxu1 %v3384_v1 }
  0x86   : > { %3153 = vmatmul.mubr.msk.f32.vlgmr.msra.gmra.mrb[2].mxu0 %vm175_vm1, %v2920_v19  ;;  %3198 = vmatmul.mubr.msk.f32.vlgmr.msra.gmra.mrb[2].mxu1 %vm175_vm1, %v2933_v21 }
  0x87   : > { %3156 = vmatpush3.msra.mxu0 %v3573_v15  ;;  %3201 = vmatpush3.msra.mxu1 %v3573_v15 }
  0x88   : > { %3157 = vmatprep.mubr.msk.f32.mxu0 %vm3385_vm0, %v3384_v1  ;;  %3160 = vmatprep.subr.mxu0 %v3384_v1 }
  0x89   : > { %3202 = vmatprep.mubr.msk.f32.mxu1 %vm3385_vm0, %v3384_v1  ;;  %3205 = vmatprep.subr.mxu1 %v3384_v1 }
  0x8e   : > { %3158 = vmatmul.mubr.msk.f32.vlgmr.msra.gmra.mrb[2].mxu0 %vm175_vm1, %v2941_v22  ;;  %3203 = vmatmul.mubr.msk.f32.vlgmr.msra.gmra.mrb[2].mxu1 %vm175_vm1, %v2943_v23 }
  0x8f   : > { %3161 = vmatpush3.msra.mxu0 %v3591_v18  ;;  %3206 = vmatpush3.msra.mxu1 %v3591_v18 }
  0x90   : > { %3162 = vmatprep.mubr.msk.f32.mxu0 %vm3385_vm0, %v3384_v1  ;;  %3165 = vmatprep.subr.mxu0 %v3384_v1 }
  0x91   : > { %3207 = vmatprep.mubr.msk.f32.mxu1 %vm3385_vm0, %v3384_v1  ;;  %3210 = vmatprep.subr.mxu1 %v3384_v1 }
  0x96   : > { %3163 = vmatmul.mubr.msk.f32.vlgmr.msra.gmra.mrb[2].mxu0 %vm175_vm1, %v2943_v23  ;;  %3208 = vmatmul.mubr.msk.f32.vlgmr.msra.gmra.mrb[2].mxu1 %vm175_vm1, %v2945_v24 }
  0x97   : > { %3166 = vmatpush3.msra.mxu0 %v3607_v20  ;;  %3211 = vmatpush3.msra.mxu1 %v3607_v20 }
  0x98   : > { %3167 = vmatprep.mubr.msk.f32.mxu0 %vm3385_vm0, %v3384_v1  ;;  %3212 = vmatprep.mubr.msk.f32.mxu1 %vm3385_vm0, %v3384_v1 }
  0x9e   : > { %3168 = vmatmul.mubr.msk.f32.vlgmr.msra.gmra.mrb[2].mxu0 %vm175_vm1, %v2945_v24  ;;  %3213 = vmatmul.mubr.msk.f32.vlgmr.msra.gmra.mrb[2].mxu1 %vm175_vm1, %v2955_v25 }
 0x12d   : > { %v860_v26 = vpop.f32.mrb[0].mxu0  ;;  %v1511_v27 = vpop.f32.mrb[0].mxu1 }
 0x12e   : > { %v1516_v28 = vmax.f32 %v860_v26, %v1511_v27  ;;  %v3079_v29 = vpop.f32.mrb[1].mxu0  ;;  %v3124_v30 = vpop.f32.mrb[1].mxu1 }
 0x171   : > { %v2161_v31 = vpop.f32.mrb[2].mxu0  ;;  %v2803_v32 = vpop.f32.mrb[2].mxu1 }
 0x172   : > { %v2166_v33 = vmax.f32 %v1516_v28, %v2161_v31  ;;  %v3169_v34 = vpop.f32.mrb[3].mxu0  ;;  %v3214_v35 = vpop.f32.mrb[3].mxu1 }
 0x174   : > { %v2808_v37 = vmax.f32 %v2166_v33, %v2803_v32 }
 0x176   : > { %v2816_v38 = vadd.f32 %v2957_v36, %v2808_v37 }
 0x178   : > { %v2817_v39 = vmax.f32 %v2816_v38, 0.0 }
 0x17a   : > { %2818 = vst [vmem:[%s163_s7] sm:$0xf] %v2817_v39 }
 0x17b   : > { %3333 = shalt.err (!%p3330_p3)
}
 0x17c   : > { %s3334_s25 = scalar_lea.hbm %s3727_s11, 64  ;;  %s3338_s28 = scalar_lea.hbm %s3772_s3, 128 }
 0x17d   : > { %p3335_p4 = scmp.ne.s32.totalorder %s3727_s11, %s3334_s25  ;;  %p3339_p9 = scmp.lt.u32.totalorder %s3727_s11, %s3772_s3 }
 0x17e   : > { %p3340_p10 = scmp.lt.u32.totalorder %s3338_s28, %s3334_s25  ;;  %p3342_p12 = scmp.lt.u32.totalorder %s3334_s25, %s3727_s11 }
 0x17f   : > { %p3336_p7 = pnand %p3335_p4, %p3445_p5 }
 0x180   : > { %p3341_p11 = por %p3340_p10, %p3339_p9 }
 0x181   : > { %p3337_p8 = pneg %p3336_p7 }
 0x182   : > { %p3343_p13 = por %p3342_p12, %p3341_p11 }
 0x184   : > { %p3344_p0 = pnand %p3343_p13, %p3337_p8 }
 0x186   : > { %3347 = shalt.err (!%p3344_p0)
}
 0x187   : > { %3279 = dma.vmem_to_hbm [thread:$0]  (%p3445_p5), %s3729_s8, 64, %s3727_s11, %s2820_s17  }
 0x188 PF: > { %p3285_p1 = scmp.ge.s32.totalorder %s3382_s15, 2  ;;  %s2845_s5 = sand.u32 1, %s3370_s12  }
 0x189   : > { %s2846_s30 = scalar_lea.sflag [#allocation3], %s2845_s5 }
 0x18a   : > { %p3282_p2 = pnand %p3285_p1, %p3449_p6 }
 0x18c   : > { %3365 = dma.done.wait (!%p3282_p2), %s2846_s30, 64  }
 0x18d   : > { %3367 = vsyncadd (!%p3282_p2), %s2846_s30, 4294967232  ;;  %p13_p3 = scmp.ge.s32.totalorder %s3432_s18, 4   ;;  %s3775_s12 = smov %s3374_s13 }
 0x18e   : > { %s3776_s13 = smov %s3378_s14  ;;  %s3777_s14 = smov %s3443_s21 }
 0x18f   : > { %s3778_s15 = smov %s3432_s18  ;;  %15 = sbr.rel (!%p13_p3) target bundleno = 3 (0x3), region = 82 }
 0x196   :  { %2851 = vsyncpa [#allocation3], 1 }
 0x197   :  { %2853 = vsyncpa [#allocation3 + $0x1], 1 }

// kernel: convnet_forward.2
= control target key start
LH: loop header
LB: loop body
LE: loop exit
PB: predicated region body
PF: predicated region fallthrough
CT: control target
= control target key end

     0   :  { %s6582_s12 = smov 0   ;;  %s8037_s0 = inlined_call_operand.vmem [shape: f32[2,2,4,56,4], index: 0, kind: input, shape index: {}]   ;;  %s8038_s1 = inlined_call_operand.vmem [shape: f32[9,4,128], index: 1, kind: input, shape index: {}]   ;;  %s8039_s2 = inlined_call_operand.vmem [shape: f32[1,128], index: 2, kind: input, shape index: {}]   ;;  %s8040_s3 = inlined_call_operand.vmem [shape: f32[2,49,128], index: 3, kind: output, shape index: {}]  }
   0x1 LB: > { %s4572_s13 = sadd.s32 4294967295, %s6558_s12   ;;  %p4576_p0 = scmp.ge.s32.totalorder %s6558_s12, 1  ;;  %s6558_s12 = sphi %s6582_s12, %s13_s12  }
   0x2   : > { %p137_p1 = scmp.lt.s32.totalorder %s6558_s12, 3 }
   0x4   : > { %p138_p2 = pnand %p4576_p0, %p137_p1 }
   0x6   : > { %141 = sbr.rel (%p138_p2) target bundleno = 741 (0x2e5), region = 32 }
   0xd   : > { %v6593_v0 = vld [vmem:[%s8038_s1 + $0x4] sm:$0xf]  ;;  %vm211_vm0 = vcmask 1043456   ;;  %p161_p3 = scmp.lt.s32.totalorder %s4572_s13, 1  ;;  %v6560_v1 = vmov 0.0   ;;  %vm6561_vm1 = vmmov 0  }
   0xe   : > { %5264 = vmatprep.subr.mxu0 %v6560_v1  ;;  %5471 = vmatprep.subr.mxu1 %v6560_v1  ;;  %vm189_vm2 = vcmask 31744   ;;  %v6618_v2 = vld [vmem:[%s8038_s1] sm:$0xf]  ;;  %v6707_v18 = vld [vmem:[%s8038_s1 + $0x8] sm:$0xf] }
   0xf   : > { %5265 = vmatpush3.msk.msra.mxu0 %vm211_vm0, %v6593_v0  ;;  %5266 = vmatprep.mubr.msk.f32.mxu0 %vm6561_vm1, %v6560_v1  ;;  %s8046_s13 = smov (!%p161_p3, %s4572_s13), 1  ;;  %v6767_v26 = vld [vmem:[%s8038_s1 + $0xc] sm:$0xf]  ;;  %v6839_v35 = vld [vmem:[%s8038_s1 + $0x10] sm:$0xf] }
  0x10   : > { %5287 = vmatprep.subr.mxu0 %v6560_v1  ;;  %5472 = vmatpush3.msk.msra.mxu1 %vm211_vm0, %v6593_v0  ;;  %s6540_s16 = smul.u32 448, %s8046_s13  ;;  %v6945_v49 = vld [vmem:[%s8038_s1 + $0x14] sm:$0xf]  ;;  %v7033_v57 = vld [vmem:[%s8038_s1 + $0x18] sm:$0xf] }
  0x11   : > { %5473 = vmatprep.mubr.msk.f32.mxu1 %vm6561_vm1, %v6560_v1  ;;  %5494 = vmatprep.subr.mxu1 %v6560_v1  ;;  %s6541_s9 = smul.u32 56, %s8046_s13 }
  0x12   : > { %s6613_s19 = scalar_lea.vmem %s8037_s0, %s6540_s16 }
  0x13   : > { %v4579_v3 = vld [vmem:[%s6613_s19 + $0x38] sm:$0xff]  ;;  %v6622_v4 = vld [vmem:[%s6613_s19 + $0x70] sm:$0xff]  ;;  %v4580_v5 = vld [vmem:[%s6613_s19 + $0x40] sm:$0xff]  ;;  %s8010_s16 = scalar_lea.vmem %s8040_s3, %s6541_s9 }
  0x14   : > { %5267 = vmatmul.mubr.msk.f32.vlgmr.msra.gmra.mrb[0].mxu0 %vm189_vm2, %v4579_v3  ;;  %5474 = vmatmul.mubr.msk.f32.vlgmr.msra.gmra.mrb[0].mxu1 %vm189_vm2, %v6622_v4  ;;  %v6633_v6 = vld [vmem:[%s6613_s19 + $0x78] sm:$0xff]  ;;  %v4581_v7 = vld [vmem:[%s6613_s19 + $0x48] sm:$0xff]  ;;  %v6650_v8 = vld [vmem:[%s6613_s19 + $0x80] sm:$0xff] }
  0x15   : > { %5288 = vmatpush3.msk.msra.mxu0 %vm211_vm0, %v6618_v2  ;;  %5495 = vmatpush3.msk.msra.mxu1 %vm211_vm0, %v6618_v2  ;;  %v4582_v9 = vld [vmem:[%s6613_s19 + $0x50] sm:$0xff]  ;;  %v6661_v10 = vld [vmem:[%s6613_s19 + $0x88] sm:$0xff]  ;;  %v4583_v11 = vld [vmem:[%s6613_s19 + $0x58] sm:$0xff] }
  0x16   : > { %5269 = vmatprep.mubr.msk.f32.mxu0 %vm6561_vm1, %v6560_v1  ;;  %5476 = vmatprep.mubr.msk.f32.mxu1 %vm6561_vm1, %v6560_v1  ;;  %v6672_v12 = vld [vmem:[%s6613_s19 + $0x90] sm:$0xff]  ;;  %v4584_v13 = vld [vmem:[%s6613_s19 + $0x60] sm:$0xff]  ;;  %v6683_v14 = vld [vmem:[%s6613_s19 + $0x98] sm:$0xff] }
  0x17   : > { %5310 = vmatprep.subr.mxu0 %v6560_v1  ;;  %5517 = vmatprep.subr.mxu1 %v6560_v1  ;;  %v4585_v15 = vld [vmem:[%s6613_s19 + $0x68] sm:$0x1]  ;;  %v6694_v16 = vld [vmem:[%s6613_s19 + $0xa0] sm:$0x1]  ;;  %v173_v20 = vld [vmem:[%s6613_s19 + $0x10] sm:$0xff] }
  0x18   : > { %5270 = vmatmul.mubr.msk.f32.gmra.mrb[2].mxu0 %vm189_vm2, %v4580_v5  ;;  %5477 = vmatmul.mubr.msk.f32.gmra.mrb[2].mxu1 %vm189_vm2, %v6633_v6  ;;  %v171_v17 = vld [vmem:[%s6613_s19] sm:$0xff]  ;;  %v172_v19 = vld [vmem:[%s6613_s19 + $0x8] sm:$0xff]  ;;  %v174_v21 = vld [vmem:[%s6613_s19 + $0x18] sm:$0xff] }
  0x19   : > { %5272 = vmatprep.mubr.msk.f32.mxu0 %vm6561_vm1, %v6560_v1  ;;  %5479 = vmatprep.mubr.msk.f32.mxu1 %vm6561_vm1, %v6560_v1  ;;  %v175_v22 = vld [vmem:[%s6613_s19 + $0x20] sm:$0xff]  ;;  %v176_v23 = vld [vmem:[%s6613_s19 + $0x28] sm:$0xff]  ;;  %v177_v24 = vld [vmem:[%s6613_s19 + $0x30] sm:$0x1] }
  0x1a   : > { %v4724_v25 = vld [vmem:[%s6613_s19 + $0xa8] sm:$0xff]  ;;  %v4725_v27 = vld [vmem:[%s6613_s19 + $0xb0] sm:$0xff]  ;;  %v4726_v28 = vld [vmem:[%s6613_s19 + $0xb8] sm:$0xff] }
  0x1b   : > { %v4727_v29 = vld [vmem:[%s6613_s19 + $0xc0] sm:$0xff]  ;;  %v4728_v30 = vld [vmem:[%s6613_s19 + $0xc8] sm:$0xff]  ;;  %v4729_v31 = vld [vmem:[%s6613_s19 + $0xd0] sm:$0xff] }
  0x1c   : > { %5273 = vmatmul.mubr.msk.f32.gmra.mrb[4].mxu0 %vm189_vm2, %v4581_v7  ;;  %5480 = vmatmul.mubr.msk.f32.gmra.mrb[4].mxu1 %vm189_vm2, %v6650_v8  ;;  %v4730_v32 = vld [vmem:[%s6613_s19 + $0xd8] sm:$0x1]  ;;  %v6831_v33 = vld [vmem:[%s6613_s19 + $0xe0] sm:$0xff]  ;;  %v6850_v36 = vld [vmem:[%s6613_s19 + $0xe8] sm:$0xff] }
  0x1d   : > { %5275 = vmatprep.mubr.msk.f32.mxu0 %vm6561_vm1, %v6560_v1  ;;  %5482 = vmatprep.mubr.msk.f32.mxu1 %vm6561_vm1, %v6560_v1  ;;  %v6834_v34 = vld [vmem:[%s6613_s19 + $0x118] sm:$0xff]  ;;  %v6853_v37 = vld [vmem:[%s6613_s19 + $0x120] sm:$0xff]  ;;  %v6870_v38 = vld [vmem:[%s6613_s19 + $0xf0] sm:$0xff] }
  0x1e   : > { %v6873_v39 = vld [vmem:[%s6613_s19 + $0x128] sm:$0xff]  ;;  %v6884_v40 = vld [vmem:[%s6613_s19 + $0xf8] sm:$0xff]  ;;  %v6887_v41 = vld [vmem:[%s6613_s19 + $0x130] sm:$0xff] }
  0x1f   : > { %v6898_v42 = vld [vmem:[%s6613_s19 + $0x100] sm:$0xff]  ;;  %v6901_v43 = vld [vmem:[%s6613_s19 + $0x138] sm:$0xff]  ;;  %v6912_v44 = vld [vmem:[%s6613_s19 + $0x108] sm:$0xff] }
  0x20   : > { %5276 = vmatmul.mubr.msk.f32.gmra.mrb[6].mxu0 %vm189_vm2, %v4582_v9  ;;  %5483 = vmatmul.mubr.msk.f32.gmra.mrb[6].mxu1 %vm189_vm2, %v6661_v10  ;;  %v6915_v45 = vld [vmem:[%s6613_s19 + $0x140] sm:$0xff]  ;;  %v6926_v46 = vld [vmem:[%s6613_s19 + $0x110] sm:$0x1]  ;;  %v6929_v47 = vld [vmem:[%s6613_s19 + $0x148] sm:$0x1] }
  0x21   : > { %5278 = vmatprep.mubr.msk.f32.mxu0 %vm6561_vm1, %v6560_v1  ;;  %5485 = vmatprep.mubr.msk.f32.mxu1 %vm6561_vm1, %v6560_v1  ;;  %v6940_v48 = vld [vmem:[%s6613_s19 + $0x150] sm:$0xff]  ;;  %v6956_v50 = vld [vmem:[%s6613_s19 + $0x158] sm:$0xff]  ;;  %v6973_v51 = vld [vmem:[%s6613_s19 + $0x160] sm:$0xff] }
  0x22   : > { %v6984_v52 = vld [vmem:[%s6613_s19 + $0x168] sm:$0xff]  ;;  %v6995_v53 = vld [vmem:[%s6613_s19 + $0x170] sm:$0xff]  ;;  %v7006_v54 = vld [vmem:[%s6613_s19 + $0x178] sm:$0xff] }
  0x23   : > { %v7017_v55 = vld [vmem:[%s6613_s19 + $0x180] sm:$0x1]  ;;  %v7028_v56 = vld [vmem:[%s6613_s19 + $0x188] sm:$0xff]  ;;  %v7044_v58 = vld [vmem:[%s6613_s19 + $0x190] sm:$0xff] }
  0x24   : > { %5279 = vmatmul.mubr.msk.f32.gmra.mrb[8].mxu0 %vm189_vm2, %v4583_v11  ;;  %5486 = vmatmul.mubr.msk.f32.gmra.mrb[8].mxu1 %vm189_vm2, %v6672_v12  ;;  %v7061_v59 = vld [vmem:[%s6613_s19 + $0x198] sm:$0xff]  ;;  %v7072_v60 = vld [vmem:[%s6613_s19 + $0x1a0] sm:$0xff]  ;;  %v7083_v61 = vld [vmem:[%s6613_s19 + $0x1a8] sm:$0xff] }
  0x25   : > { %5281 = vmatprep.mubr.msk.f32.mxu0 %vm6561_vm1, %v6560_v1  ;;  %5488 = vmatprep.mubr.msk.f32.mxu1 %vm6561_vm1, %v6560_v1  ;;  %v7094_v62 = vld [vmem:[%s6613_s19 + $0x1b0] sm:$0xff]  ;;  %v7105_v63 = vld [vmem:[%s6613_s19 + $0x1b8] sm:$0x1] }
  0x28   : > { %5282 = vmatmul.mubr.msk.f32.gmra.mrb[10].mxu0 %vm189_vm2, %v4584_v13  ;;  %5489 = vmatmul.mubr.msk.f32.gmra.mrb[10].mxu1 %vm189_vm2, %v6683_v14 }
  0x29   : > { %5284 = vmatprep.mubr.msk.f32.mxu0 %vm6561_vm1, %v6560_v1  ;;  %5491 = vmatprep.mubr.msk.f32.mxu1 %vm6561_vm1, %v6560_v1 }
  0x2c   : > { %5285 = vmatmul.mubr.msk.f32.gmra.mrb[12].mxu0 %vm189_vm2, %v4585_v15  ;;  %5492 = vmatmul.mubr.msk.f32.gmra.mrb[12].mxu1 %vm189_vm2, %v6694_v16 }
  0x2d   : > { %5289 = vmatprep.mubr.msk.f32.mxu0 %vm6561_vm1, %v6560_v1  ;;  %5496 = vmatprep.mubr.msk.f32.mxu1 %vm6561_vm1, %v6560_v1 }
  0x30   : > { %5290 = vmatmul.mubr.msk.f32.vlgmr.msra.gmra.mrb[0].mxu0 %vm189_vm2, %v171_v17  ;;  %5497 = vmatmul.mubr.msk.f32.vlgmr.msra.gmra.mrb[0].mxu1 %vm189_vm2, %v4579_v3  ;;  %v7116_v3 = vld [vmem:[%s6613_s19 + $0x7] sm:$0xff]  ;;  %v7214_v17 = vld [vmem:[%s6613_s19 + $0x6f] sm:$0x1] }
  0x31   : > { %5311 = vmatpush3.msk.msra.mxu0 %vm211_vm0, %v6707_v18  ;;  %5518 = vmatpush3.msk.msra.mxu1 %vm211_vm0, %v6707_v18 }
  0x32   : > { %5292 = vmatprep.mubr.msk.f32.mxu0 %vm6561_vm1, %v6560_v1  ;;  %5499 = vmatprep.mubr.msk.f32.mxu1 %vm6561_vm1, %v6560_v1 }
  0x33   : > { %5333 = vmatprep.subr.mxu0 %v6560_v1  ;;  %5540 = vmatprep.subr.mxu1 %v6560_v1 }
  0x34   : > { %5293 = vmatmul.mubr.msk.f32.gmra.mrb[2].mxu0 %vm189_vm2, %v172_v19  ;;  %5500 = vmatmul.mubr.msk.f32.gmra.mrb[2].mxu1 %vm189_vm2, %v4580_v5  ;;  %v7124_v5 = vld [vmem:[%s8038_s1 + $0x1c] sm:$0xf] }
  0x35   : > { %5295 = vmatprep.mubr.msk.f32.mxu0 %vm6561_vm1, %v6560_v1  ;;  %5502 = vmatprep.mubr.msk.f32.mxu1 %vm6561_vm1, %v6560_v1  ;;  %v7225_v19 = vld [vmem:[%s6613_s19 + $0x77] sm:$0xff] }
  0x38   : > { %5296 = vmatmul.mubr.msk.f32.gmra.mrb[4].mxu0 %vm189_vm2, %v173_v20  ;;  %5503 = vmatmul.mubr.msk.f32.gmra.mrb[4].mxu1 %vm189_vm2, %v4581_v7  ;;  %v7138_v7 = vld [vmem:[%s6613_s19 + $0x47] sm:$0xff]  ;;  %v7230_v20 = vld [vmem:[%s8038_s1 + $0x20] sm:$0xf] }
  0x39   : > { %5298 = vmatprep.mubr.msk.f32.mxu0 %vm6561_vm1, %v6560_v1  ;;  %5505 = vmatprep.mubr.msk.f32.mxu1 %vm6561_vm1, %v6560_v1  ;;  %8043 = vst [vmem:[#allocation2_spill] sm:$0xff] %v7230_v20 }
  0x3c   : > { %5299 = vmatmul.mubr.msk.f32.gmra.mrb[6].mxu0 %vm189_vm2, %v174_v21  ;;  %5506 = vmatmul.mubr.msk.f32.gmra.mrb[6].mxu1 %vm189_vm2, %v4582_v9  ;;  %v7158_v9 = vld [vmem:[%s6613_s19 + $0x4f] sm:$0xff]  ;;  %v7241_v21 = vld [vmem:[%s6613_s19 + $0x7f] sm:$0xff] }
  0x3d   : > { %5301 = vmatprep.mubr.msk.f32.mxu0 %vm6561_vm1, %v6560_v1  ;;  %5508 = vmatprep.mubr.msk.f32.mxu1 %vm6561_vm1, %v6560_v1 }
  0x40   : > { %5302 = vmatmul.mubr.msk.f32.gmra.mrb[8].mxu0 %vm189_vm2, %v175_v22  ;;  %5509 = vmatmul.mubr.msk.f32.gmra.mrb[8].mxu1 %vm189_vm2, %v4583_v11  ;;  %v7172_v11 = vld [vmem:[%s6613_s19 + $0x57] sm:$0xff]  ;;  %v7258_v22 = vld [vmem:[%s6613_s19 + $0x87] sm:$0xff] }
  0x41   : > { %5304 = vmatprep.mubr.msk.f32.mxu0 %vm6561_vm1, %v6560_v1  ;;  %5511 = vmatprep.mubr.msk.f32.mxu1 %vm6561_vm1, %v6560_v1 }
  0x44   : > { %5305 = vmatmul.mubr.msk.f32.gmra.mrb[10].mxu0 %vm189_vm2, %v176_v23  ;;  %5512 = vmatmul.mubr.msk.f32.gmra.mrb[10].mxu1 %vm189_vm2, %v4584_v13  ;;  %v7186_v13 = vld [vmem:[%s6613_s19 + $0x5f] sm:$0xff]  ;;  %v7269_v23 = vld [vmem:[%s6613_s19 + $0x8f] sm:$0xff] }
  0x45   : > { %5307 = vmatprep.mubr.msk.f32.mxu0 %vm6561_vm1, %v6560_v1  ;;  %5514 = vmatprep.mubr.msk.f32.mxu1 %vm6561_vm1, %v6560_v1 }
  0x48   : > { %5308 = vmatmul.mubr.msk.f32.gmra.mrb[12].mxu0 %vm189_vm2, %v177_v24  ;;  %5515 = vmatmul.mubr.msk.f32.gmra.mrb[12].mxu1 %vm189_vm2, %v4585_v15  ;;  %v7200_v15 = vld [vmem:[%s6613_s19 + $0x67] sm:$0xff]  ;;  %v7280_v24 = vld [vmem:[%s6613_s19 + $0x97] sm:$0xff] }
  0x49   : > { %5312 = vmatprep.mubr.msk.f32.mxu0 %vm6561_vm1, %v6560_v1  ;;  %5519 = vmatprep.mubr.msk.f32.mxu1 %vm6561_vm1, %v6560_v1 }
  0x4c   : > { %5313 = vmatmul.mubr.msk.f32.vlgmr.msra.gmra.mrb[0].mxu0 %vm189_vm2, %v6622_v4  ;;  %5520 = vmatmul.mubr.msk.f32.vlgmr.msra.gmra.mrb[0].mxu1 %vm189_vm2, %v4724_v25  ;;  %v7119_v4 = vld [vmem:[%s6613_s19 + $0x3f] sm:$0xff] }
  0x4d   : > { %5334 = vmatpush3.msk.msra.mxu0 %vm211_vm0, %v6767_v26  ;;  %5541 = vmatpush3.msk.msra.mxu1 %vm211_vm0, %v6767_v26  ;;  %v7291_v25 = vld [vmem:[%s6613_s19 + $0x9f] sm:$0xff] }
  0x4e   : > { %5315 = vmatprep.mubr.msk.f32.mxu0 %vm6561_vm1, %v6560_v1  ;;  %5522 = vmatprep.mubr.msk.f32.mxu1 %vm6561_vm1, %v6560_v1 }
  0x4f   : > { %5356 = vmatprep.subr.mxu0 %v6560_v1  ;;  %5563 = vmatprep.subr.mxu1 %v6560_v1 }
  0x50   : > { %5316 = vmatmul.mubr.msk.f32.gmra.mrb[2].mxu0 %vm189_vm2, %v6633_v6  ;;  %5523 = vmatmul.mubr.msk.f32.gmra.mrb[2].mxu1 %vm189_vm2, %v4725_v27  ;;  %v7135_v6 = vld [vmem:[%s6613_s19 + $0xf] sm:$0xff]  ;;  %v7302_v27 = vld [vmem:[%s6613_s19 + $0xa7] sm:$0x1] }
  0x51   : > { %5318 = vmatprep.mubr.msk.f32.mxu0 %vm6561_vm1, %v6560_v1  ;;  %5525 = vmatprep.mubr.msk.f32.mxu1 %vm6561_vm1, %v6560_v1 }
  0x54   : > { %5319 = vmatmul.mubr.msk.f32.gmra.mrb[4].mxu0 %vm189_vm2, %v6650_v8  ;;  %5526 = vmatmul.mubr.msk.f32.gmra.mrb[4].mxu1 %vm189_vm2, %v4726_v28  ;;  %v7155_v8 = vld [vmem:[%s6613_s19 + $0x17] sm:$0xff]  ;;  %v7313_v28 = vld [vmem:[%s6613_s19 + $0xaf] sm:$0xff] }
  0x55   : > { %5321 = vmatprep.mubr.msk.f32.mxu0 %vm6561_vm1, %v6560_v1  ;;  %5528 = vmatprep.mubr.msk.f32.mxu1 %vm6561_vm1, %v6560_v1 }
  0x58   : > { %5322 = vmatmul.mubr.msk.f32.gmra.mrb[6].mxu0 %vm189_vm2, %v6661_v10  ;;  %5529 = vmatmul.mubr.msk.f32.gmra.mrb[6].mxu1 %vm189_vm2, %v4727_v29  ;;  %v7169_v10 = vld [vmem:[%s6613_s19 + $0x1f] sm:$0xff]  ;;  %v7324_v29 = vld [vmem:[%s6613_s19 + $0xb7] sm:$0xff] }
  0x59   : > { %5324 = vmatprep.mubr.msk.f32.mxu0 %vm6561_vm1, %v6560_v1  ;;  %5531 = vmatprep.mubr.msk.f32.mxu1 %vm6561_vm1, %v6560_v1 }
  0x5c   : > { %5325 = vmatmul.mubr.msk.f32.gmra.mrb[8].mxu0 %vm189_vm2, %v6672_v12  ;;  %5532 = vmatmul.mubr.msk.f32.gmra.mrb[8].mxu1 %vm189_vm2, %v4728_v30  ;;  %v7183_v12 = vld [vmem:[%s6613_s19 + $0x27] sm:$0xff] }
  0x5d   : > { %5327 = vmatprep.mubr.msk.f32.mxu0 %vm6561_vm1, %v6560_v1  ;;  %5534 = vmatprep.mubr.msk.f32.mxu1 %vm6561_vm1, %v6560_v1  ;;  %v7352_v30 = vld [vmem:[%s6613_s19 + $0xc7] sm:$0xff] }
  0x60   : > { %5328 = vmatmul.mubr.msk.f32.gmra.mrb[10].mxu0 %vm189_vm2, %v6683_v14  ;;  %5535 = vmatmul.mubr.msk.f32.gmra.mrb[10].mxu1 %vm189_vm2, %v4729_v31  ;;  %v7197_v14 = vld [vmem:[%s6613_s19 + $0x2f] sm:$0xff] }
  0x61   : > { %5330 = vmatprep.mubr.msk.f32.mxu0 %vm6561_vm1, %v6560_v1  ;;  %5537 = vmatprep.mubr.msk.f32.mxu1 %vm6561_vm1, %v6560_v1  ;;  %v7363_v31 = vld [vmem:[%s6613_s19 + $0xcf] sm:$0xff] }
  0x64   : > { %5331 = vmatmul.mubr.msk.f32.gmra.mrb[12].mxu0 %vm189_vm2, %v6694_v16  ;;  %5538 = vmatmul.mubr.msk.f32.gmra.mrb[12].mxu1 %vm189_vm2, %v4730_v32  ;;  %v7211_v16 = vld [vmem:[%s6613_s19 + $0x37] sm:$0x1] }
  0x65   : > { %5335 = vmatprep.mubr.msk.f32.mxu0 %vm6561_vm1, %v6560_v1  ;;  %5542 = vmatprep.mubr.msk.f32.mxu1 %vm6561_vm1, %v6560_v1  ;;  %v7374_v32 = vld [vmem:[%s6613_s19 + $0xd7] sm:$0xff] }
  0x68   : > { %5336 = vmatmul.mubr.msk.f32.vlgmr.msra.gmra.mrb[0].mxu0 %vm189_vm2, %v6831_v33  ;;  %5543 = vmatmul.mubr.msk.f32.vlgmr.msra.gmra.mrb[0].mxu1 %vm189_vm2, %v6834_v34 }
  0x69   : > { %5357 = vmatpush3.msk.msra.mxu0 %vm211_vm0, %v6839_v35  ;;  %5564 = vmatpush3.msk.msra.mxu1 %vm211_vm0, %v6839_v35 }
  0x6a   : > { %5338 = vmatprep.mubr.msk.f32.mxu0 %vm6561_vm1, %v6560_v1  ;;  %5545 = vmatprep.mubr.msk.f32.mxu1 %vm6561_vm1, %v6560_v1 }
  0x6b   : > { %5379 = vmatprep.subr.mxu0 %v6560_v1  ;;  %5586 = vmatprep.subr.mxu1 %v6560_v1 }
  0x6c   : > { %5339 = vmatmul.mubr.msk.f32.gmra.mrb[2].mxu0 %vm189_vm2, %v6850_v36  ;;  %5546 = vmatmul.mubr.msk.f32.gmra.mrb[2].mxu1 %vm189_vm2, %v6853_v37 }
  0x6d   : > { %5341 = vmatprep.mubr.msk.f32.mxu0 %vm6561_vm1, %v6560_v1  ;;  %5548 = vmatprep.mubr.msk.f32.mxu1 %vm6561_vm1, %v6560_v1 }
  0x70   : > { %5342 = vmatmul.mubr.msk.f32.gmra.mrb[4].mxu0 %vm189_vm2, %v6870_v38  ;;  %5549 = vmatmul.mubr.msk.f32.gmra.mrb[4].mxu1 %vm189_vm2, %v6873_v39 }
  0x71   : > { %5344 = vmatprep.mubr.msk.f32.mxu0 %vm6561_vm1, %v6560_v1  ;;  %5551 = vmatprep.mubr.msk.f32.mxu1 %vm6561_vm1, %v6560_v1 }
  0x74   : > { %5345 = vmatmul.mubr.msk.f32.gmra.mrb[6].mxu0 %vm189_vm2, %v6884_v40  ;;  %5552 = vmatmul.mubr.msk.f32.gmra.mrb[6].mxu1 %vm189_vm2, %v6887_v41 }
  0x75   : > { %5347 = vmatprep.mubr.msk.f32.mxu0 %vm6561_vm1, %v6560_v1  ;;  %5554 = vmatprep.mubr.msk.f32.mxu1 %vm6561_vm1, %v6560_v1 }
  0x78   : > { %5348 = vmatmul.mubr.msk.f32.gmra.mrb[8].mxu0 %vm189_vm2, %v6898_v42  ;;  %5555 = vmatmul.mubr.msk.f32.gmra.mrb[8].mxu1 %vm189_vm2, %v6901_v43 }
  0x79   : > { %5350 = vmatprep.mubr.msk.f32.mxu0 %vm6561_vm1, %v6560_v1  ;;  %5557 = vmatprep.mubr.msk.f32.mxu1 %vm6561_vm1, %v6560_v1 }
  0x7c   : > { %5351 = vmatmul.mubr.msk.f32.gmra.mrb[10].mxu0 %vm189_vm2, %v6912_v44  ;;  %5558 = vmatmul.mubr.msk.f32.gmra.mrb[10].mxu1 %vm189_vm2, %v6915_v45 }
  0x7d   : > { %5353 = vmatprep.mubr.msk.f32.mxu0 %vm6561_vm1, %v6560_v1  ;;  %5560 = vmatprep.mubr.msk.f32.mxu1 %vm6561_vm1, %v6560_v1 }
  0x80   : > { %5354 = vmatmul.mubr.msk.f32.gmra.mrb[12].mxu0 %vm189_vm2, %v6926_v46  ;;  %5561 = vmatmul.mubr.msk.f32.gmra.mrb[12].mxu1 %vm189_vm2, %v6929_v47 }
  0x81   : > { %5358 = vmatprep.mubr.msk.f32.mxu0 %vm6561_vm1, %v6560_v1  ;;  %5565 = vmatprep.mubr.msk.f32.mxu1 %vm6561_vm1, %v6560_v1 }
  0x84   : > { %5359 = vmatmul.mubr.msk.f32.vlgmr.msra.gmra.mrb[0].mxu0 %vm189_vm2, %v6834_v34  ;;  %5566 = vmatmul.mubr.msk.f32.vlgmr.msra.gmra.mrb[0].mxu1 %vm189_vm2, %v6940_v48 }
  0x85   : > { %5380 = vmatpush3.msk.msra.mxu0 %vm211_vm0, %v6945_v49  ;;  %5587 = vmatpush3.msk.msra.mxu1 %vm211_vm0, %v6945_v49 }
  0x86   : > { %5361 = vmatprep.mubr.msk.f32.mxu0 %vm6561_vm1, %v6560_v1  ;;  %5568 = vmatprep.mubr.msk.f32.mxu1 %vm6561_vm1, %v6560_v1 }
  0x87   : > { %5402 = vmatprep.subr.mxu0 %v6560_v1  ;;  %5609 = vmatprep.subr.mxu1 %v6560_v1 }
  0x88   : > { %5362 = vmatmul.mubr.msk.f32.gmra.mrb[2].mxu0 %vm189_vm2, %v6853_v37  ;;  %5569 = vmatmul.mubr.msk.f32.gmra.mrb[2].mxu1 %vm189_vm2, %v6956_v50 }
  0x89   : > { %5364 = vmatprep.mubr.msk.f32.mxu0 %vm6561_vm1, %v6560_v1  ;;  %5571 = vmatprep.mubr.msk.f32.mxu1 %vm6561_vm1, %v6560_v1 }
  0x8c   : > { %5365 = vmatmul.mubr.msk.f32.gmra.mrb[4].mxu0 %vm189_vm2, %v6873_v39  ;;  %5572 = vmatmul.mubr.msk.f32.gmra.mrb[4].mxu1 %vm189_vm2, %v6973_v51 }
  0x8d   : > { %5367 = vmatprep.mubr.msk.f32.mxu0 %vm6561_vm1, %v6560_v1  ;;  %5574 = vmatprep.mubr.msk.f32.mxu1 %vm6561_vm1, %v6560_v1 }
  0x90   : > { %5368 = vmatmul.mubr.msk.f32.gmra.mrb[6].mxu0 %vm189_vm2, %v6887_v41  ;;  %5575 = vmatmul.mubr.msk.f32.gmra.mrb[6].mxu1 %vm189_vm2, %v6984_v52 }
  0x91   : > { %5370 = vmatprep.mubr.msk.f32.mxu0 %vm6561_vm1, %v6560_v1  ;;  %5577 = vmatprep.mubr.msk.f32.mxu1 %vm6561_vm1, %v6560_v1 }
  0x94   : > { %5371 = vmatmul.mubr.msk.f32.gmra.mrb[8].mxu0 %vm189_vm2, %v6901_v43  ;;  %5578 = vmatmul.mubr.msk.f32.gmra.mrb[8].mxu1 %vm189_vm2, %v6995_v53 }
  0x95   : > { %5373 = vmatprep.mubr.msk.f32.mxu0 %vm6561_vm1, %v6560_v1  ;;  %5580 = vmatprep.mubr.msk.f32.mxu1 %vm6561_vm1, %v6560_v1 }
  0x98   : > { %5374 = vmatmul.mubr.msk.f32.gmra.mrb[10].mxu0 %vm189_vm2, %v6915_v45  ;;  %5581 = vmatmul.mubr.msk.f32.gmra.mrb[10].mxu1 %vm189_vm2, %v7006_v54 }
  0x99   : > { %5376 = vmatprep.mubr.msk.f32.mxu0 %vm6561_vm1, %v6560_v1  ;;  %5583 = vmatprep.mubr.msk.f32.mxu1 %vm6561_vm1, %v6560_v1 }
  0x9c   : > { %5377 = vmatmul.mubr.msk.f32.gmra.mrb[12].mxu0 %vm189_vm2, %v6929_v47  ;;  %5584 = vmatmul.mubr.msk.f32.gmra.mrb[12].mxu1 %vm189_vm2, %v7017_v55 }
  0x9d   : > { %5381 = vmatprep.mubr.msk.f32.mxu0 %vm6561_vm1, %v6560_v1  ;;  %5588 = vmatprep.mubr.msk.f32.mxu1 %vm6561_vm1, %v6560_v1 }
  0xa0   : > { %5382 = vmatmul.mubr.msk.f32.vlgmr.msra.gmra.mrb[0].mxu0 %vm189_vm2, %v6940_v48  ;;  %5589 = vmatmul.mubr.msk.f32.vlgmr.msra.gmra.mrb[0].mxu1 %vm189_vm2, %v7028_v56 }
  0xa1   : > { %5403 = vmatpush3.msk.msra.mxu0 %vm211_vm0, %v7033_v57  ;;  %5610 = vmatpush3.msk.msra.mxu1 %vm211_vm0, %v7033_v57 }
  0xa2   : > { %5384 = vmatprep.mubr.msk.f32.mxu0 %vm6561_vm1, %v6560_v1  ;;  %5591 = vmatprep.mubr.msk.f32.mxu1 %vm6561_vm1, %v6560_v1 }
  0xa3   : > { %5425 = vmatprep.subr.mxu0 %v6560_v1  ;;  %5632 = vmatprep.subr.mxu1 %v6560_v1 }
  0xa4   : > { %5385 = vmatmul.mubr.msk.f32.gmra.mrb[2].mxu0 %vm189_vm2, %v6956_v50  ;;  %5592 = vmatmul.mubr.msk.f32.gmra.mrb[2].mxu1 %vm189_vm2, %v7044_v58 }
  0xa5   : > { %5387 = vmatprep.mubr.msk.f32.mxu0 %vm6561_vm1, %v6560_v1  ;;  %5594 = vmatprep.mubr.msk.f32.mxu1 %vm6561_vm1, %v6560_v1 }
  0xa8   : > { %5388 = vmatmul.mubr.msk.f32.gmra.mrb[4].mxu0 %vm189_vm2, %v6973_v51  ;;  %5595 = vmatmul.mubr.msk.f32.gmra.mrb[4].mxu1 %vm189_vm2, %v7061_v59 }
  0xa9   : > { %5390 = vmatprep.mubr.msk.f32.mxu0 %vm6561_vm1, %v6560_v1  ;;  %5597 = vmatprep.mubr.msk.f32.mxu1 %vm6561_vm1, %v6560_v1 }
  0xac   : > { %5391 = vmatmul.mubr.msk.f32.gmra.mrb[6].mxu0 %vm189_vm2, %v6984_v52  ;;  %5598 = vmatmul.mubr.msk.f32.gmra.mrb[6].mxu1 %vm189_vm2, %v7072_v60 }
  0xad   : > { %5393 = vmatprep.mubr.msk.f32.mxu0 %vm6561_vm1, %v6560_v1  ;;  %5600 = vmatprep.mubr.msk.f32.mxu1 %vm6561_vm1, %v6560_v1 }
  0xb0   : > { %5394 = vmatmul.mubr.msk.f32.gmra.mrb[8].mxu0 %vm189_vm2, %v6995_v53  ;;  %5601 = vmatmul.mubr.msk.f32.gmra.mrb[8].mxu1 %vm189_vm2, %v7083_v61 }
  0xb1   : > { %5396 = vmatprep.mubr.msk.f32.mxu0 %vm6561_vm1, %v6560_v1  ;;  %5603 = vmatprep.mubr.msk.f32.mxu1 %vm6561_vm1, %v6560_v1 }
  0xb4   : > { %5397 = vmatmul.mubr.msk.f32.gmra.mrb[10].mxu0 %vm189_vm2, %v7006_v54  ;;  %5604 = vmatmul.mubr.msk.f32.gmra.mrb[10].mxu1 %vm189_vm2, %v7094_v62 }
  0xb5   : > { %5399 = vmatprep.mubr.msk.f32.mxu0 %vm6561_vm1, %v6560_v1  ;;  %5606 = vmatprep.mubr.msk.f32.mxu1 %vm6561_vm1, %v6560_v1 }
  0xb8   : > { %5400 = vmatmul.mubr.msk.f32.gmra.mrb[12].mxu0 %vm189_vm2, %v7017_v55  ;;  %5607 = vmatmul.mubr.msk.f32.gmra.mrb[12].mxu1 %vm189_vm2, %v7105_v63 }
  0xb9   : > { %5404 = vmatprep.mubr.msk.f32.mxu0 %vm6561_vm1, %v6560_v1  ;;  %5611 = vmatprep.mubr.msk.f32.mxu1 %vm6561_vm1, %v6560_v1 }
  0xbc   : > { %5405 = vmatmul.mubr.msk.f32.vlgmr.msra.gmra.mrb[0].mxu0 %vm189_vm2, %v7116_v3  ;;  %5612 = vmatmul.mubr.msk.f32.vlgmr.msra.gmra.mrb[0].mxu1 %vm189_vm2, %v7119_v4 }
  0xbd   : > { %5426 = vmatpush3.msk.msra.mxu0 %vm211_vm0, %v7124_v5  ;;  %5633 = vmatpush3.msk.msra.mxu1 %vm211_vm0, %v7124_v5 }
  0xbe   : > { %5407 = vmatprep.mubr.msk.f32.mxu0 %vm6561_vm1, %v6560_v1  ;;  %5614 = vmatprep.mubr.msk.f32.mxu1 %vm6561_vm1, %v6560_v1 }
  0xbf   : > { %5448 = vmatprep.subr.mxu0 %v6560_v1  ;;  %5655 = vmatprep.subr.mxu1 %v6560_v1 }
  0xc0   : > { %5408 = vmatmul.mubr.msk.f32.gmra.mrb[2].mxu0 %vm189_vm2, %v7135_v6  ;;  %5615 = vmatmul.mubr.msk.f32.gmra.mrb[2].mxu1 %vm189_vm2, %v7138_v7 }
  0xc1   : > { %5410 = vmatprep.mubr.msk.f32.mxu0 %vm6561_vm1, %v6560_v1  ;;  %5617 = vmatprep.mubr.msk.f32.mxu1 %vm6561_vm1, %v6560_v1 }
  0xc4   : > { %5411 = vmatmul.mubr.msk.f32.gmra.mrb[4].mxu0 %vm189_vm2, %v7155_v8  ;;  %5618 = vmatmul.mubr.msk.f32.gmra.mrb[4].mxu1 %vm189_vm2, %v7158_v9 }
  0xc5   : > { %5413 = vmatprep.mubr.msk.f32.mxu0 %vm6561_vm1, %v6560_v1  ;;  %5620 = vmatprep.mubr.msk.f32.mxu1 %vm6561_vm1, %v6560_v1 }
  0xc8   : > { %5414 = vmatmul.mubr.msk.f32.gmra.mrb[6].mxu0 %vm189_vm2, %v7169_v10  ;;  %5621 = vmatmul.mubr.msk.f32.gmra.mrb[6].mxu1 %vm189_vm2, %v7172_v11 }
  0xc9   : > { %5416 = vmatprep.mubr.msk.f32.mxu0 %vm6561_vm1, %v6560_v1  ;;  %5623 = vmatprep.mubr.msk.f32.mxu1 %vm6561_vm1, %v6560_v1 }
  0xcc   : > { %5417 = vmatmul.mubr.msk.f32.gmra.mrb[8].mxu0 %vm189_vm2, %v7183_v12  ;;  %5624 = vmatmul.mubr.msk.f32.gmra.mrb[8].mxu1 %vm189_vm2, %v7186_v13 }
  0xcd   : > { %5419 = vmatprep.mubr.msk.f32.mxu0 %vm6561_vm1, %v6560_v1  ;;  %5626 = vmatprep.mubr.msk.f32.mxu1 %vm6561_vm1, %v6560_v1 }
  0xd0   : > { %5420 = vmatmul.mubr.msk.f32.gmra.mrb[10].mxu0 %vm189_vm2, %v7197_v14  ;;  %5627 = vmatmul.mubr.msk.f32.gmra.mrb[10].mxu1 %vm189_vm2, %v7200_v15 }
  0xd1   : > { %5422 = vmatprep.mubr.msk.f32.mxu0 %vm6561_vm1, %v6560_v1  ;;  %5629 = vmatprep.mubr.msk.f32.mxu1 %vm6561_vm1, %v6560_v1 }
  0xd4   : > { %5423 = vmatmul.mubr.msk.f32.gmra.mrb[12].mxu0 %vm189_vm2, %v7211_v16  ;;  %5630 = vmatmul.mubr.msk.f32.gmra.mrb[12].mxu1 %vm189_vm2, %v7214_v17 }
  0xd5   : > { %5427 = vmatprep.mubr.msk.f32.mxu0 %vm6561_vm1, %v6560_v1  ;;  %5634 = vmatprep.mubr.msk.f32.mxu1 %vm6561_vm1, %v6560_v1 }
  0xd8   : > { %5428 = vmatmul.mubr.msk.f32.vlgmr.msra.gmra.mrb[0].mxu0 %vm189_vm2, %v7119_v4  ;;  %5635 = vmatmul.mubr.msk.f32.vlgmr.msra.gmra.mrb[0].mxu1 %vm189_vm2, %v7225_v19 }
  0xd9   : > { %5449 = vmatpush3.msk.msra.mxu0 %vm211_vm0, %v7230_v20  ;;  %5656 = vmatpush3.msk.msra.mxu1 %vm211_vm0, %v7230_v20  ;;  %v7385_v20 = vld [vmem:[%s6613_s19 + $0xdf] sm:$0x1] }
  0xda   : > { %5430 = vmatprep.mubr.msk.f32.mxu0 %vm6561_vm1, %v6560_v1  ;;  %5637 = vmatprep.mubr.msk.f32.mxu1 %vm6561_vm1, %v6560_v1 }
  0xdb   : > { %5678 = vmatprep.subr.mxu0 %v6560_v1  ;;  %5885 = vmatprep.subr.mxu1 %v6560_v1 }
  0xdc   : > { %5431 = vmatmul.mubr.msk.f32.gmra.mrb[2].mxu0 %vm189_vm2, %v7138_v7  ;;  %5638 = vmatmul.mubr.msk.f32.gmra.mrb[2].mxu1 %vm189_vm2, %v7241_v21 }
  0xdd   : > { %5433 = vmatprep.mubr.msk.f32.mxu0 %vm6561_vm1, %v6560_v1  ;;  %5640 = vmatprep.mubr.msk.f32.mxu1 %vm6561_vm1, %v6560_v1 }
  0xe0   : > { %5434 = vmatmul.mubr.msk.f32.gmra.mrb[4].mxu0 %vm189_vm2, %v7158_v9  ;;  %5641 = vmatmul.mubr.msk.f32.gmra.mrb[4].mxu1 %vm189_vm2, %v7258_v22 }
  0xe1   : > { %5436 = vmatprep.mubr.msk.f32.mxu0 %vm6561_vm1, %v6560_v1  ;;  %5643 = vmatprep.mubr.msk.f32.mxu1 %vm6561_vm1, %v6560_v1 }
  0xe4   : > { %5437 = vmatmul.mubr.msk.f32.gmra.mrb[6].mxu0 %vm189_vm2, %v7172_v11  ;;  %5644 = vmatmul.mubr.msk.f32.gmra.mrb[6].mxu1 %vm189_vm2, %v7269_v23 }
  0xe5   : > { %5439 = vmatprep.mubr.msk.f32.mxu0 %vm6561_vm1, %v6560_v1  ;;  %5646 = vmatprep.mubr.msk.f32.mxu1 %vm6561_vm1, %v6560_v1 }
  0xe8   : > { %5440 = vmatmul.mubr.msk.f32.gmra.mrb[8].mxu0 %vm189_vm2, %v7186_v13  ;;  %5647 = vmatmul.mubr.msk.f32.gmra.mrb[8].mxu1 %vm189_vm2, %v7280_v24 }
  0xe9   : > { %5442 = vmatprep.mubr.msk.f32.mxu0 %vm6561_vm1, %v6560_v1  ;;  %5649 = vmatprep.mubr.msk.f32.mxu1 %vm6561_vm1, %v6560_v1 }
  0xec   : > { %5443 = vmatmul.mubr.msk.f32.gmra.mrb[10].mxu0 %vm189_vm2, %v7200_v15  ;;  %5650 = vmatmul.mubr.msk.f32.gmra.mrb[10].mxu1 %vm189_vm2, %v7291_v25 }
  0xed   : > { %5445 = vmatprep.mubr.msk.f32.mxu0 %vm6561_vm1, %v6560_v1  ;;  %5652 = vmatprep.mubr.msk.f32.mxu1 %vm6561_vm1, %v6560_v1 }
  0xf0   : > { %5446 = vmatmul.mubr.msk.f32.gmra.mrb[12].mxu0 %vm189_vm2, %v7214_v17  ;;  %5653 = vmatmul.mubr.msk.f32.gmra.mrb[12].mxu1 %vm189_vm2, %v7302_v27 }
  0xf1   : > { %5450 = vmatprep.mubr.msk.f32.mxu0 %vm6561_vm1, %v6560_v1  ;;  %5657 = vmatprep.mubr.msk.f32.mxu1 %vm6561_vm1, %v6560_v1 }
  0xf4   : > { %5451 = vmatmul.mubr.msk.f32.vlgmr.msra.gmra.mrb[0].mxu0 %vm189_vm2, %v7225_v19  ;;  %5658 = vmatmul.mubr.msk.f32.vlgmr.msra.gmra.mrb[0].mxu1 %vm189_vm2, %v7313_v28 }
  0xf5   : > { %5679 = vmatpush3.msk.msra.mxu0 %vm211_vm0, %v6593_v0  ;;  %5886 = vmatpush3.msk.msra.mxu1 %vm211_vm0, %v6593_v0  ;;  %v7341_v0 = vld [vmem:[%s6613_s19 + $0xbf] sm:$0xff] }
  0xf6   : > { %5453 = vmatprep.mubr.msk.f32.mxu0 %vm6561_vm1, %v6560_v1  ;;  %5660 = vmatprep.mubr.msk.f32.mxu1 %vm6561_vm1, %v6560_v1 }
  0xf7   : > { %5701 = vmatprep.subr.mxu0 %v6560_v1  ;;  %5908 = vmatprep.subr.mxu1 %v6560_v1 }
  0xf8   : > { %5454 = vmatmul.mubr.msk.f32.gmra.mrb[2].mxu0 %vm189_vm2, %v7241_v21  ;;  %5661 = vmatmul.mubr.msk.f32.gmra.mrb[2].mxu1 %vm189_vm2, %v7324_v29 }
  0xf9   : > { %5456 = vmatprep.mubr.msk.f32.mxu0 %vm6561_vm1, %v6560_v1  ;;  %5663 = vmatprep.mubr.msk.f32.mxu1 %vm6561_vm1, %v6560_v1 }
  0xfc   : > { %5457 = vmatmul.mubr.msk.f32.gmra.mrb[4].mxu0 %vm189_vm2, %v7258_v22  ;;  %5664 = vmatmul.mubr.msk.f32.gmra.mrb[4].mxu1 %vm189_vm2, %v7341_v0 }
  0xfd   : > { %5459 = vmatprep.mubr.msk.f32.mxu0 %vm6561_vm1, %v6560_v1  ;;  %5666 = vmatprep.mubr.msk.f32.mxu1 %vm6561_vm1, %v6560_v1 }
 0x100   : > { %5460 = vmatmul.mubr.msk.f32.gmra.mrb[6].mxu0 %vm189_vm2, %v7269_v23  ;;  %5667 = vmatmul.mubr.msk.f32.gmra.mrb[6].mxu1 %vm189_vm2, %v7352_v30 }
 0x101   : > { %5462 = vmatprep.mubr.msk.f32.mxu0 %vm6561_vm1, %v6560_v1  ;;  %5669 = vmatprep.mubr.msk.f32.mxu1 %vm6561_vm1, %v6560_v1 }
 0x104   : > { %5463 = vmatmul.mubr.msk.f32.gmra.mrb[8].mxu0 %vm189_vm2, %v7280_v24  ;;  %5670 = vmatmul.mubr.msk.f32.gmra.mrb[8].mxu1 %vm189_vm2, %v7363_v31 }
 0x105   : > { %5465 = vmatprep.mubr.msk.f32.mxu0 %vm6561_vm1, %v6560_v1  ;;  %5672 = vmatprep.mubr.msk.f32.mxu1 %vm6561_vm1, %v6560_v1 }
 0x108   : > { %5466 = vmatmul.mubr.msk.f32.gmra.mrb[10].mxu0 %vm189_vm2, %v7291_v25  ;;  %5673 = vmatmul.mubr.msk.f32.gmra.mrb[10].mxu1 %vm189_vm2, %v7374_v32 }
 0x109   : > { %5468 = vmatprep.mubr.msk.f32.mxu0 %vm6561_vm1, %v6560_v1  ;;  %5675 = vmatprep.mubr.msk.f32.mxu1 %vm6561_vm1, %v6560_v1 }
 0x10c   : > { %5469 = vmatmul.mubr.msk.f32.gmra.mrb[12].mxu0 %vm189_vm2, %v7302_v27  ;;  %5676 = vmatmul.mubr.msk.f32.gmra.mrb[12].mxu1 %vm189_vm2, %v7385_v20 }
 0x10d   : > { %5680 = vmatprep.mubr.msk.f32.mxu0 %vm6561_vm1, %v6560_v1  ;;  %5887 = vmatprep.mubr.msk.f32.mxu1 %vm6561_vm1, %v6560_v1 }
 0x110   : > { %5681 = vmatmul.mubr.msk.f32.vlgmr.msra.gmra.mrb[14].mxu0 %vm189_vm2, %v6834_v34  ;;  %5888 = vmatmul.mubr.msk.f32.vlgmr.msra.gmra.mrb[14].mxu1 %vm189_vm2, %v6940_v48 }
 0x111   : > { %5702 = vmatpush3.msk.msra.mxu0 %vm211_vm0, %v6618_v2  ;;  %5909 = vmatpush3.msk.msra.mxu1 %vm211_vm0, %v6618_v2  ;;  %v4849_v2 = vld [vmem:[%s6613_s19 + $0xe7] sm:$0xff] }
 0x112   : > { %5683 = vmatprep.mubr.msk.f32.mxu0 %vm6561_vm1, %v6560_v1  ;;  %5890 = vmatprep.mubr.msk.f32.mxu1 %vm6561_vm1, %v6560_v1 }
 0x113   : > { %5724 = vmatprep.subr.mxu0 %v6560_v1  ;;  %5931 = vmatprep.subr.mxu1 %v6560_v1 }
 0x114   : > { %5684 = vmatmul.mubr.msk.f32.gmra.mrb[16].mxu0 %vm189_vm2, %v6853_v37  ;;  %5891 = vmatmul.mubr.msk.f32.gmra.mrb[16].mxu1 %vm189_vm2, %v6956_v50 }
 0x115   : > { %5686 = vmatprep.mubr.msk.f32.mxu0 %vm6561_vm1, %v6560_v1  ;;  %5893 = vmatprep.mubr.msk.f32.mxu1 %vm6561_vm1, %v6560_v1 }
 0x118   : > { %5687 = vmatmul.mubr.msk.f32.gmra.mrb[18].mxu0 %vm189_vm2, %v6873_v39  ;;  %5894 = vmatmul.mubr.msk.f32.gmra.mrb[18].mxu1 %vm189_vm2, %v6973_v51 }
 0x119   : > { %5689 = vmatprep.mubr.msk.f32.mxu0 %vm6561_vm1, %v6560_v1  ;;  %5896 = vmatprep.mubr.msk.f32.mxu1 %vm6561_vm1, %v6560_v1 }
 0x11c   : > { %5690 = vmatmul.mubr.msk.f32.gmra.mrb[20].mxu0 %vm189_vm2, %v6887_v41  ;;  %5897 = vmatmul.mubr.msk.f32.gmra.mrb[20].mxu1 %vm189_vm2, %v6984_v52 }
 0x11d   : > { %5692 = vmatprep.mubr.msk.f32.mxu0 %vm6561_vm1, %v6560_v1  ;;  %5899 = vmatprep.mubr.msk.f32.mxu1 %vm6561_vm1, %v6560_v1 }
 0x120   : > { %5693 = vmatmul.mubr.msk.f32.gmra.mrb[22].mxu0 %vm189_vm2, %v6901_v43  ;;  %5900 = vmatmul.mubr.msk.f32.gmra.mrb[22].mxu1 %vm189_vm2, %v6995_v53 }
 0x121   : > { %5695 = vmatprep.mubr.msk.f32.mxu0 %vm6561_vm1, %v6560_v1  ;;  %5902 = vmatprep.mubr.msk.f32.mxu1 %vm6561_vm1, %v6560_v1 }
 0x124   : > { %5696 = vmatmul.mubr.msk.f32.gmra.mrb[24].mxu0 %vm189_vm2, %v6915_v45  ;;  %5903 = vmatmul.mubr.msk.f32.gmra.mrb[24].mxu1 %vm189_vm2, %v7006_v54 }
 0x125   : > { %5698 = vmatprep.mubr.msk.f32.mxu0 %vm6561_vm1, %v6560_v1  ;;  %5905 = vmatprep.mubr.msk.f32.mxu1 %vm6561_vm1, %v6560_v1 }
 0x128   : > { %5699 = vmatmul.mubr.msk.f32.gmra.mrb[26].mxu0 %vm189_vm2, %v6929_v47  ;;  %5906 = vmatmul.mubr.msk.f32.gmra.mrb[26].mxu1 %vm189_vm2, %v7017_v55 }
 0x129   : > { %5703 = vmatprep.mubr.msk.f32.mxu0 %vm6561_vm1, %v6560_v1  ;;  %5910 = vmatprep.mubr.msk.f32.mxu1 %vm6561_vm1, %v6560_v1 }
 0x12c   : > { %5704 = vmatmul.mubr.msk.f32.vlgmr.msra.gmra.mrb[14].mxu0 %vm189_vm2, %v6831_v33  ;;  %5911 = vmatmul.mubr.msk.f32.vlgmr.msra.gmra.mrb[14].mxu1 %vm189_vm2, %v6834_v34  ;;  %v7780_v33 = vld [vmem:[%s6613_s19 + $0x127] sm:$0xff]  ;;  %v4851_v34 = vld [vmem:[%s6613_s19 + $0xf7] sm:$0xff] }
 0x12d   : > { %5725 = vmatpush3.msk.msra.mxu0 %vm211_vm0, %v6707_v18  ;;  %5932 = vmatpush3.msk.msra.mxu1 %vm211_vm0, %v6707_v18  ;;  %v7769_v18 = vld [vmem:[%s6613_s19 + $0x11f] sm:$0xff] }
 0x12e   : > { %5706 = vmatprep.mubr.msk.f32.mxu0 %vm6561_vm1, %v6560_v1  ;;  %5913 = vmatprep.mubr.msk.f32.mxu1 %vm6561_vm1, %v6560_v1 }
 0x12f   : > { %5747 = vmatprep.subr.mxu0 %v6560_v1  ;;  %5954 = vmatprep.subr.mxu1 %v6560_v1 }
 0x130   : > { %5707 = vmatmul.mubr.msk.f32.gmra.mrb[16].mxu0 %vm189_vm2, %v6850_v36  ;;  %5914 = vmatmul.mubr.msk.f32.gmra.mrb[16].mxu1 %vm189_vm2, %v6853_v37  ;;  %v4852_v36 = vld [vmem:[%s6613_s19 + $0xff] sm:$0xff]  ;;  %v7808_v37 = vld [vmem:[%s6613_s19 + $0x137] sm:$0xff] }
 0x131   : > { %5709 = vmatprep.mubr.msk.f32.mxu0 %vm6561_vm1, %v6560_v1  ;;  %5916 = vmatprep.mubr.msk.f32.mxu1 %vm6561_vm1, %v6560_v1 }
 0x134   : > { %5710 = vmatmul.mubr.msk.f32.gmra.mrb[18].mxu0 %vm189_vm2, %v6870_v38  ;;  %5917 = vmatmul.mubr.msk.f32.gmra.mrb[18].mxu1 %vm189_vm2, %v6873_v39  ;;  %v4853_v38 = vld [vmem:[%s6613_s19 + $0x107] sm:$0xff]  ;;  %v7819_v39 = vld [vmem:[%s6613_s19 + $0x13f] sm:$0xff] }
 0x135   : > { %5712 = vmatprep.mubr.msk.f32.mxu0 %vm6561_vm1, %v6560_v1  ;;  %5919 = vmatprep.mubr.msk.f32.mxu1 %vm6561_vm1, %v6560_v1 }
 0x138   : > { %5713 = vmatmul.mubr.msk.f32.gmra.mrb[20].mxu0 %vm189_vm2, %v6884_v40  ;;  %5920 = vmatmul.mubr.msk.f32.gmra.mrb[20].mxu1 %vm189_vm2, %v6887_v41 }
 0x139   : > { %5715 = vmatprep.mubr.msk.f32.mxu0 %vm6561_vm1, %v6560_v1  ;;  %5922 = vmatprep.mubr.msk.f32.mxu1 %vm6561_vm1, %v6560_v1 }
 0x13c   : > { %5716 = vmatmul.mubr.msk.f32.gmra.mrb[22].mxu0 %vm189_vm2, %v6898_v42  ;;  %5923 = vmatmul.mubr.msk.f32.gmra.mrb[22].mxu1 %vm189_vm2, %v6901_v43 }
 0x13d   : > { %5718 = vmatprep.mubr.msk.f32.mxu0 %vm6561_vm1, %v6560_v1  ;;  %5925 = vmatprep.mubr.msk.f32.mxu1 %vm6561_vm1, %v6560_v1 }
 0x140   : > { %5719 = vmatmul.mubr.msk.f32.gmra.mrb[24].mxu0 %vm189_vm2, %v6912_v44  ;;  %5926 = vmatmul.mubr.msk.f32.gmra.mrb[24].mxu1 %vm189_vm2, %v6915_v45  ;;  %v4854_v45 = vld [vmem:[%s6613_s19 + $0x10f] sm:$0xff] }
 0x141   : > { %5721 = vmatprep.mubr.msk.f32.mxu0 %vm6561_vm1, %v6560_v1  ;;  %5928 = vmatprep.mubr.msk.f32.mxu1 %vm6561_vm1, %v6560_v1 }
 0x144   : > { %5722 = vmatmul.mubr.msk.f32.gmra.mrb[26].mxu0 %vm189_vm2, %v6926_v46  ;;  %5929 = vmatmul.mubr.msk.f32.gmra.mrb[26].mxu1 %vm189_vm2, %v6929_v47  ;;  %v7836_v46 = vld [vmem:[%s6613_s19 + $0x147] sm:$0xff] }
 0x145   : > { %5726 = vmatprep.mubr.msk.f32.mxu0 %vm6561_vm1, %v6560_v1  ;;  %5933 = vmatprep.mubr.msk.f32.mxu1 %vm6561_vm1, %v6560_v1 }
 0x148   : > { %5727 = vmatmul.mubr.msk.f32.vlgmr.msra.gmra.mrb[14].mxu0 %vm189_vm2, %v6940_v48  ;;  %5934 = vmatmul.mubr.msk.f32.vlgmr.msra.gmra.mrb[14].mxu1 %vm189_vm2, %v7028_v56 }
 0x149   : > { %5748 = vmatpush3.msk.msra.mxu0 %vm211_vm0, %v6767_v26  ;;  %5955 = vmatpush3.msk.msra.mxu1 %vm211_vm0, %v6767_v26  ;;  %v4850_v26 = vld [vmem:[%s6613_s19 + $0xef] sm:$0xff] }
 0x14a   : > { %5729 = vmatprep.mubr.msk.f32.mxu0 %vm6561_vm1, %v6560_v1  ;;  %5936 = vmatprep.mubr.msk.f32.mxu1 %vm6561_vm1, %v6560_v1 }
 0x14b   : > { %5770 = vmatprep.subr.mxu0 %v6560_v1  ;;  %5977 = vmatprep.subr.mxu1 %v6560_v1 }
 0x14c   : > { %5730 = vmatmul.mubr.msk.f32.gmra.mrb[16].mxu0 %vm189_vm2, %v6956_v50  ;;  %5937 = vmatmul.mubr.msk.f32.gmra.mrb[16].mxu1 %vm189_vm2, %v7044_v58 }
 0x14d   : > { %5732 = vmatprep.mubr.msk.f32.mxu0 %vm6561_vm1, %v6560_v1  ;;  %5939 = vmatprep.mubr.msk.f32.mxu1 %vm6561_vm1, %v6560_v1 }
 0x150   : > { %5733 = vmatmul.mubr.msk.f32.gmra.mrb[18].mxu0 %vm189_vm2, %v6973_v51  ;;  %5940 = vmatmul.mubr.msk.f32.gmra.mrb[18].mxu1 %vm189_vm2, %v7061_v59  ;;  %v4879_v59 = vld [vmem:[%s6613_s19 + $0x157] sm:$0xff] }
 0x151   : > { %5735 = vmatprep.mubr.msk.f32.mxu0 %vm6561_vm1, %v6560_v1  ;;  %5942 = vmatprep.mubr.msk.f32.mxu1 %vm6561_vm1, %v6560_v1 }
 0x154   : > { %5736 = vmatmul.mubr.msk.f32.gmra.mrb[20].mxu0 %vm189_vm2, %v6984_v52  ;;  %5943 = vmatmul.mubr.msk.f32.gmra.mrb[20].mxu1 %vm189_vm2, %v7072_v60  ;;  %v4855_v52 = vld [vmem:[%s6613_s19 + $0x117] sm:$0x1] }
 0x155   : > { %5738 = vmatprep.mubr.msk.f32.mxu0 %vm6561_vm1, %v6560_v1  ;;  %5945 = vmatprep.mubr.msk.f32.mxu1 %vm6561_vm1, %v6560_v1 }
 0x158   : > { %5739 = vmatmul.mubr.msk.f32.gmra.mrb[22].mxu0 %vm189_vm2, %v6995_v53  ;;  %5946 = vmatmul.mubr.msk.f32.gmra.mrb[22].mxu1 %vm189_vm2, %v7083_v61  ;;  %v7853_v53 = vld [vmem:[%s6613_s19 + $0x14f] sm:$0x1] }
 0x159   : > { %5741 = vmatprep.mubr.msk.f32.mxu0 %vm6561_vm1, %v6560_v1  ;;  %5948 = vmatprep.mubr.msk.f32.mxu1 %vm6561_vm1, %v6560_v1 }
 0x15c   : > { %5742 = vmatmul.mubr.msk.f32.gmra.mrb[24].mxu0 %vm189_vm2, %v7006_v54  ;;  %5949 = vmatmul.mubr.msk.f32.gmra.mrb[24].mxu1 %vm189_vm2, %v7094_v62 }
 0x15d   : > { %5744 = vmatprep.mubr.msk.f32.mxu0 %vm6561_vm1, %v6560_v1  ;;  %5951 = vmatprep.mubr.msk.f32.mxu1 %vm6561_vm1, %v6560_v1 }
 0x160   : > { %5745 = vmatmul.mubr.msk.f32.gmra.mrb[26].mxu0 %vm189_vm2, %v7017_v55  ;;  %5952 = vmatmul.mubr.msk.f32.gmra.mrb[26].mxu1 %vm189_vm2, %v7105_v63 }
 0x161   : > { %5749 = vmatprep.mubr.msk.f32.mxu0 %vm6561_vm1, %v6560_v1  ;;  %5956 = vmatprep.mubr.msk.f32.mxu1 %vm6561_vm1, %v6560_v1 }
 0x164   : > { %5750 = vmatmul.mubr.msk.f32.vlgmr.msra.gmra.mrb[14].mxu0 %vm189_vm2, %v7116_v3  ;;  %5957 = vmatmul.mubr.msk.f32.vlgmr.msra.gmra.mrb[14].mxu1 %vm189_vm2, %v7119_v4 }
 0x165   : > { %5771 = vmatpush3.msk.msra.mxu0 %vm211_vm0, %v6839_v35  ;;  %5978 = vmatpush3.msk.msra.mxu1 %vm211_vm0, %v6839_v35  ;;  %v7797_v35 = vld [vmem:[%s6613_s19 + $0x12f] sm:$0xff] }
 0x166   : > { %5752 = vmatprep.mubr.msk.f32.mxu0 %vm6561_vm1, %v6560_v1  ;;  %5959 = vmatprep.mubr.msk.f32.mxu1 %vm6561_vm1, %v6560_v1 }
 0x167   : > { %5793 = vmatprep.subr.mxu0 %v6560_v1  ;;  %6000 = vmatprep.subr.mxu1 %v6560_v1 }
 0x168   : > { %5753 = vmatmul.mubr.msk.f32.gmra.mrb[16].mxu0 %vm189_vm2, %v7135_v6  ;;  %5960 = vmatmul.mubr.msk.f32.gmra.mrb[16].mxu1 %vm189_vm2, %v7138_v7 }
 0x169   : > { %5755 = vmatprep.mubr.msk.f32.mxu0 %vm6561_vm1, %v6560_v1  ;;  %5962 = vmatprep.mubr.msk.f32.mxu1 %vm6561_vm1, %v6560_v1 }
 0x16c   : > { %5756 = vmatmul.mubr.msk.f32.gmra.mrb[18].mxu0 %vm189_vm2, %v7155_v8  ;;  %5963 = vmatmul.mubr.msk.f32.gmra.mrb[18].mxu1 %vm189_vm2, %v7158_v9 }
 0x16d   : > { %5758 = vmatprep.mubr.msk.f32.mxu0 %vm6561_vm1, %v6560_v1  ;;  %5965 = vmatprep.mubr.msk.f32.mxu1 %vm6561_vm1, %v6560_v1 }
 0x170   : > { %5759 = vmatmul.mubr.msk.f32.gmra.mrb[20].mxu0 %vm189_vm2, %v7169_v10  ;;  %5966 = vmatmul.mubr.msk.f32.gmra.mrb[20].mxu1 %vm189_vm2, %v7172_v11 }
 0x171   : > { %5761 = vmatprep.mubr.msk.f32.mxu0 %vm6561_vm1, %v6560_v1  ;;  %5968 = vmatprep.mubr.msk.f32.mxu1 %vm6561_vm1, %v6560_v1 }
 0x174   : > { %5762 = vmatmul.mubr.msk.f32.gmra.mrb[22].mxu0 %vm189_vm2, %v7183_v12  ;;  %5969 = vmatmul.mubr.msk.f32.gmra.mrb[22].mxu1 %vm189_vm2, %v7186_v13 }
 0x175   : > { %5764 = vmatprep.mubr.msk.f32.mxu0 %vm6561_vm1, %v6560_v1  ;;  %5971 = vmatprep.mubr.msk.f32.mxu1 %vm6561_vm1, %v6560_v1 }
 0x178   : > { %5765 = vmatmul.mubr.msk.f32.gmra.mrb[24].mxu0 %vm189_vm2, %v7197_v14  ;;  %5972 = vmatmul.mubr.msk.f32.gmra.mrb[24].mxu1 %vm189_vm2, %v7200_v15 }
 0x179   : > { %5767 = vmatprep.mubr.msk.f32.mxu0 %vm6561_vm1, %v6560_v1  ;;  %5974 = vmatprep.mubr.msk.f32.mxu1 %vm6561_vm1, %v6560_v1 }
 0x17c   : > { %5768 = vmatmul.mubr.msk.f32.gmra.mrb[26].mxu0 %vm189_vm2, %v7211_v16  ;;  %5975 = vmatmul.mubr.msk.f32.gmra.mrb[26].mxu1 %vm189_vm2, %v7214_v17 }
 0x17d   : > { %5772 = vmatprep.mubr.msk.f32.mxu0 %vm6561_vm1, %v6560_v1  ;;  %5979 = vmatprep.mubr.msk.f32.mxu1 %vm6561_vm1, %v6560_v1 }
 0x180   : > { %5773 = vmatmul.mubr.msk.f32.vlgmr.msra.gmra.mrb[14].mxu0 %vm189_vm2, %v7119_v4  ;;  %5980 = vmatmul.mubr.msk.f32.vlgmr.msra.gmra.mrb[14].mxu1 %vm189_vm2, %v7225_v19  ;;  %v8044_v4 = vld [vmem:[#allocation2_spill] sm:$0xff] }
 0x181   : > { %5794 = vmatpush3.msk.msra.mxu0 %vm211_vm0, %v6945_v49  ;;  %6001 = vmatpush3.msk.msra.mxu1 %vm211_vm0, %v6945_v49 }
 0x182   : > { %5775 = vmatprep.mubr.msk.f32.mxu0 %vm6561_vm1, %v6560_v1  ;;  %5982 = vmatprep.mubr.msk.f32.mxu1 %vm6561_vm1, %v6560_v1 }
 0x183   : > { %5816 = vmatprep.subr.mxu0 %v6560_v1  ;;  %6023 = vmatprep.subr.mxu1 %v6560_v1 }
 0x184   : > { %5776 = vmatmul.mubr.msk.f32.gmra.mrb[16].mxu0 %vm189_vm2, %v7138_v7  ;;  %5983 = vmatmul.mubr.msk.f32.gmra.mrb[16].mxu1 %vm189_vm2, %v7241_v21 }
 0x185   : > { %5778 = vmatprep.mubr.msk.f32.mxu0 %vm6561_vm1, %v6560_v1  ;;  %5985 = vmatprep.mubr.msk.f32.mxu1 %vm6561_vm1, %v6560_v1 }
 0x188   : > { %5779 = vmatmul.mubr.msk.f32.gmra.mrb[18].mxu0 %vm189_vm2, %v7158_v9  ;;  %5986 = vmatmul.mubr.msk.f32.gmra.mrb[18].mxu1 %vm189_vm2, %v7258_v22 }
 0x189   : > { %5781 = vmatprep.mubr.msk.f32.mxu0 %vm6561_vm1, %v6560_v1  ;;  %5988 = vmatprep.mubr.msk.f32.mxu1 %vm6561_vm1, %v6560_v1 }
 0x18c   : > { %5782 = vmatmul.mubr.msk.f32.gmra.mrb[20].mxu0 %vm189_vm2, %v7172_v11  ;;  %5989 = vmatmul.mubr.msk.f32.gmra.mrb[20].mxu1 %vm189_vm2, %v7269_v23  ;;  %v4881_v11 = vld [vmem:[%s6613_s19 + $0x167] sm:$0xff] }
 0x18d   : > { %5784 = vmatprep.mubr.msk.f32.mxu0 %vm6561_vm1, %v6560_v1  ;;  %5991 = vmatprep.mubr.msk.f32.mxu1 %vm6561_vm1, %v6560_v1 }
 0x190   : > { %5785 = vmatmul.mubr.msk.f32.gmra.mrb[22].mxu0 %vm189_vm2, %v7186_v13  ;;  %5992 = vmatmul.mubr.msk.f32.gmra.mrb[22].mxu1 %vm189_vm2, %v7280_v24 }
 0x191   : > { %5787 = vmatprep.mubr.msk.f32.mxu0 %vm6561_vm1, %v6560_v1  ;;  %5994 = vmatprep.mubr.msk.f32.mxu1 %vm6561_vm1, %v6560_v1 }
 0x194   : > { %5788 = vmatmul.mubr.msk.f32.gmra.mrb[24].mxu0 %vm189_vm2, %v7200_v15  ;;  %5995 = vmatmul.mubr.msk.f32.gmra.mrb[24].mxu1 %vm189_vm2, %v7291_v25 }
 0x195   : > { %5790 = vmatprep.mubr.msk.f32.mxu0 %vm6561_vm1, %v6560_v1  ;;  %5997 = vmatprep.mubr.msk.f32.mxu1 %vm6561_vm1, %v6560_v1 }
 0x198   : > { %5791 = vmatmul.mubr.msk.f32.gmra.mrb[26].mxu0 %vm189_vm2, %v7214_v17  ;;  %5998 = vmatmul.mubr.msk.f32.gmra.mrb[26].mxu1 %vm189_vm2, %v7302_v27  ;;  %v4882_v17 = vld [vmem:[%s6613_s19 + $0x16f] sm:$0xff] }
 0x199   : > { %5795 = vmatprep.mubr.msk.f32.mxu0 %vm6561_vm1, %v6560_v1  ;;  %6002 = vmatprep.mubr.msk.f32.mxu1 %vm6561_vm1, %v6560_v1 }
 0x19c   : > { %5796 = vmatmul.mubr.msk.f32.vlgmr.msra.gmra.mrb[14].mxu0 %vm189_vm2, %v7225_v19  ;;  %6003 = vmatmul.mubr.msk.f32.vlgmr.msra.gmra.mrb[14].mxu1 %vm189_vm2, %v7313_v28  ;;  %v4958_v28 = vld [vmem:[%s6613_s19 + $0x18f] sm:$0xff] }
 0x19d   : > { %5817 = vmatpush3.msk.msra.mxu0 %vm211_vm0, %v7033_v57  ;;  %6024 = vmatpush3.msk.msra.mxu1 %vm211_vm0, %v7033_v57 }
 0x19e   : > { %5798 = vmatprep.mubr.msk.f32.mxu0 %vm6561_vm1, %v6560_v1  ;;  %6005 = vmatprep.mubr.msk.f32.mxu1 %vm6561_vm1, %v6560_v1 }
 0x19f   : > { %5839 = vmatprep.subr.mxu0 %v6560_v1  ;;  %6046 = vmatprep.subr.mxu1 %v6560_v1 }
 0x1a0   : > { %5799 = vmatmul.mubr.msk.f32.gmra.mrb[16].mxu0 %vm189_vm2, %v7241_v21  ;;  %6006 = vmatmul.mubr.msk.f32.gmra.mrb[16].mxu1 %vm189_vm2, %v7324_v29  ;;  %v4959_v29 = vld [vmem:[%s6613_s19 + $0x197] sm:$0xff] }
 0x1a1   : > { %5801 = vmatprep.mubr.msk.f32.mxu0 %vm6561_vm1, %v6560_v1  ;;  %6008 = vmatprep.mubr.msk.f32.mxu1 %vm6561_vm1, %v6560_v1 }
 0x1a4   : > { %5802 = vmatmul.mubr.msk.f32.gmra.mrb[18].mxu0 %vm189_vm2, %v7258_v22  ;;  %6009 = vmatmul.mubr.msk.f32.gmra.mrb[18].mxu1 %vm189_vm2, %v7341_v0  ;;  %v4960_v0 = vld [vmem:[%s6613_s19 + $0x19f] sm:$0xff] }
 0x1a5   : > { %5804 = vmatprep.mubr.msk.f32.mxu0 %vm6561_vm1, %v6560_v1  ;;  %6011 = vmatprep.mubr.msk.f32.mxu1 %vm6561_vm1, %v6560_v1 }
 0x1a8   : > { %5805 = vmatmul.mubr.msk.f32.gmra.mrb[20].mxu0 %vm189_vm2, %v7269_v23  ;;  %6012 = vmatmul.mubr.msk.f32.gmra.mrb[20].mxu1 %vm189_vm2, %v7352_v30  ;;  %v4961_v30 = vld [vmem:[%s6613_s19 + $0x1a7] sm:$0xff] }
 0x1a9   : > { %5807 = vmatprep.mubr.msk.f32.mxu0 %vm6561_vm1, %v6560_v1  ;;  %6014 = vmatprep.mubr.msk.f32.mxu1 %vm6561_vm1, %v6560_v1 }
 0x1ac   : > { %5808 = vmatmul.mubr.msk.f32.gmra.mrb[22].mxu0 %vm189_vm2, %v7280_v24  ;;  %6015 = vmatmul.mubr.msk.f32.gmra.mrb[22].mxu1 %vm189_vm2, %v7363_v31  ;;  %v4883_v24 = vld [vmem:[%s6613_s19 + $0x177] sm:$0xff]  ;;  %v4962_v31 = vld [vmem:[%s6613_s19 + $0x1af] sm:$0xff] }
 0x1ad   : > { %5810 = vmatprep.mubr.msk.f32.mxu0 %vm6561_vm1, %v6560_v1  ;;  %6017 = vmatprep.mubr.msk.f32.mxu1 %vm6561_vm1, %v6560_v1 }
 0x1b0   : > { %5811 = vmatmul.mubr.msk.f32.gmra.mrb[24].mxu0 %vm189_vm2, %v7291_v25  ;;  %6018 = vmatmul.mubr.msk.f32.gmra.mrb[24].mxu1 %vm189_vm2, %v7374_v32  ;;  %v4884_v25 = vld [vmem:[%s6613_s19 + $0x17f] sm:$0xff]  ;;  %v4963_v32 = vld [vmem:[%s6613_s19 + $0x1b7] sm:$0xff] }
 0x1b1   : > { %5813 = vmatprep.mubr.msk.f32.mxu0 %vm6561_vm1, %v6560_v1  ;;  %6020 = vmatprep.mubr.msk.f32.mxu1 %vm6561_vm1, %v6560_v1 }
 0x1b4   : > { %5814 = vmatmul.mubr.msk.f32.gmra.mrb[26].mxu0 %vm189_vm2, %v7302_v27  ;;  %6021 = vmatmul.mubr.msk.f32.gmra.mrb[26].mxu1 %vm189_vm2, %v7385_v20  ;;  %v4885_v27 = vld [vmem:[%s6613_s19 + $0x187] sm:$0x1] }
 0x1b5   : > { %5818 = vmatprep.mubr.msk.f32.mxu0 %vm6561_vm1, %v6560_v1  ;;  %6025 = vmatprep.mubr.msk.f32.mxu1 %vm6561_vm1, %v6560_v1 }
 0x1b8   : > { %5819 = vmatmul.mubr.msk.f32.vlgmr.msra.gmra.mrb[14].mxu0 %vm189_vm2, %v4849_v2  ;;  %6026 = vmatmul.mubr.msk.f32.vlgmr.msra.gmra.mrb[14].mxu1 %vm189_vm2, %v7769_v18  ;;  %v4964_v2 = vld [vmem:[%s6613_s19 + $0x1bf] sm:$0x1] }
 0x1b9   : > { %5840 = vmatpush3.msk.msra.mxu0 %vm211_vm0, %v7124_v5  ;;  %6047 = vmatpush3.msk.msra.mxu1 %vm211_vm0, %v7124_v5  ;;  %v4880_v5 = vld [vmem:[%s6613_s19 + $0x15f] sm:$0xff] }
 0x1ba   : > { %5821 = vmatprep.mubr.msk.f32.mxu0 %vm6561_vm1, %v6560_v1  ;;  %6028 = vmatprep.mubr.msk.f32.mxu1 %vm6561_vm1, %v6560_v1 }
 0x1bb   : > { %5862 = vmatprep.subr.mxu0 %v6560_v1  ;;  %6069 = vmatprep.subr.mxu1 %v6560_v1 }
 0x1bc   : > { %5822 = vmatmul.mubr.msk.f32.gmra.mrb[16].mxu0 %vm189_vm2, %v4850_v26  ;;  %6029 = vmatmul.mubr.msk.f32.gmra.mrb[16].mxu1 %vm189_vm2, %v7780_v33 }
 0x1bd   : > { %5824 = vmatprep.mubr.msk.f32.mxu0 %vm6561_vm1, %v6560_v1  ;;  %6031 = vmatprep.mubr.msk.f32.mxu1 %vm6561_vm1, %v6560_v1 }
 0x1c0   : > { %5825 = vmatmul.mubr.msk.f32.gmra.mrb[18].mxu0 %vm189_vm2, %v4851_v34  ;;  %6032 = vmatmul.mubr.msk.f32.gmra.mrb[18].mxu1 %vm189_vm2, %v7797_v35 }
 0x1c1   : > { %5827 = vmatprep.mubr.msk.f32.mxu0 %vm6561_vm1, %v6560_v1  ;;  %6034 = vmatprep.mubr.msk.f32.mxu1 %vm6561_vm1, %v6560_v1 }
 0x1c4   : > { %5828 = vmatmul.mubr.msk.f32.gmra.mrb[20].mxu0 %vm189_vm2, %v4852_v36  ;;  %6035 = vmatmul.mubr.msk.f32.gmra.mrb[20].mxu1 %vm189_vm2, %v7808_v37  ;;  %v4973_v36 = vld [vmem:[%s8039_s2] ss:$0 sm:$0xff] }
 0x1c5   : > { %5830 = vmatprep.mubr.msk.f32.mxu0 %vm6561_vm1, %v6560_v1  ;;  %6037 = vmatprep.mubr.msk.f32.mxu1 %vm6561_vm1, %v6560_v1 }
 0x1c7   : > { %v7821_v40 = vpop.f32.mrb[0].mxu0  ;;  %v7823_v41 = vpop.f32.mrb[0].mxu1 }
 0x1c8   : > { %v2458_v42 = vmax.f32 %v7821_v40, %v7823_v41  ;;  %v5452_v43 = vpop.f32.mrb[1].mxu0  ;;  %v5659_v44 = vpop.f32.mrb[1].mxu1  ;;  %5831 = vmatmul.mubr.msk.f32.gmra.mrb[22].mxu0 %vm189_vm2, %v4853_v38  ;;  %6038 = vmatmul.mubr.msk.f32.gmra.mrb[22].mxu1 %vm189_vm2, %v7819_v39 }
 0x1c9   : > { %5833 = vmatprep.mubr.msk.f32.mxu0 %vm6561_vm1, %v6560_v1  ;;  %6040 = vmatprep.mubr.msk.f32.mxu1 %vm6561_vm1, %v6560_v1 }
 0x1cb   : > { %v7838_v47 = vpop.f32.mrb[2].mxu0  ;;  %v7840_v48 = vpop.f32.mrb[2].mxu1 }
 0x1cc   : > { %v2459_v49 = vmax.f32 %v7838_v47, %v7840_v48  ;;  %v5455_v50 = vpop.f32.mrb[3].mxu0  ;;  %v5662_v51 = vpop.f32.mrb[3].mxu1  ;;  %5834 = vmatmul.mubr.msk.f32.gmra.mrb[24].mxu0 %vm189_vm2, %v4854_v45  ;;  %6041 = vmatmul.mubr.msk.f32.gmra.mrb[24].mxu1 %vm189_vm2, %v7836_v46 }
 0x1cd   : > { %5836 = vmatprep.mubr.msk.f32.mxu0 %vm6561_vm1, %v6560_v1  ;;  %6043 = vmatprep.mubr.msk.f32.mxu1 %vm6561_vm1, %v6560_v1 }
 0x1cf   : > { %v7855_v54 = vpop.f32.mrb[4].mxu0  ;;  %v7857_v55 = vpop.f32.mrb[4].mxu1 }
 0x1d0   : > { %v2460_v56 = vmax.f32 %v7855_v54, %v7857_v55  ;;  %v5458_v57 = vpop.f32.mrb[5].mxu0  ;;  %v5665_v58 = vpop.f32.mrb[5].mxu1  ;;  %5837 = vmatmul.mubr.msk.f32.gmra.mrb[26].mxu0 %vm189_vm2, %v4855_v52  ;;  %6044 = vmatmul.mubr.msk.f32.gmra.mrb[26].mxu1 %vm189_vm2, %v7853_v53 }
 0x1d1   : > { %5841 = vmatprep.mubr.msk.f32.mxu0 %vm6561_vm1, %v6560_v1  ;;  %6048 = vmatprep.mubr.msk.f32.mxu1 %vm6561_vm1, %v6560_v1 }
 0x1d3   : > { %v7869_v60 = vpop.f32.mrb[6].mxu0  ;;  %v7871_v61 = vpop.f32.mrb[6].mxu1 }
 0x1d4   : > { %v2461_v62 = vmax.f32 %v7869_v60, %v7871_v61  ;;  %v5461_v63 = vpop.f32.mrb[7].mxu0  ;;  %v5668_v3 = vpop.f32.mrb[7].mxu1  ;;  %5842 = vmatmul.mubr.msk.f32.vlgmr.msra.gmra.mrb[14].mxu0 %vm189_vm2, %v7769_v18  ;;  %6049 = vmatmul.mubr.msk.f32.vlgmr.msra.gmra.mrb[14].mxu1 %vm189_vm2, %v4879_v59 }
 0x1d5   : > { %5863 = vmatpush3.msk.msra.mxu0 %vm211_vm0, %v8044_v4  ;;  %6070 = vmatpush3.msk.msra.mxu1 %vm211_vm0, %v8044_v4 }
 0x1d6   : > { %5844 = vmatprep.mubr.msk.f32.mxu0 %vm6561_vm1, %v6560_v1  ;;  %6051 = vmatprep.mubr.msk.f32.mxu1 %vm6561_vm1, %v6560_v1 }
 0x1d7   : > { %v7887_v6 = vpop.f32.mrb[8].mxu0  ;;  %v7889_v7 = vpop.f32.mrb[8].mxu1 }
 0x1d8   : > { %v2462_v8 = vmax.f32 %v7887_v6, %v7889_v7  ;;  %v5464_v9 = vpop.f32.mrb[9].mxu0  ;;  %v5671_v10 = vpop.f32.mrb[9].mxu1  ;;  %5845 = vmatmul.mubr.msk.f32.gmra.mrb[16].mxu0 %vm189_vm2, %v7780_v33  ;;  %6052 = vmatmul.mubr.msk.f32.gmra.mrb[16].mxu1 %vm189_vm2, %v4880_v5 }
 0x1d9   : > { %5847 = vmatprep.mubr.msk.f32.mxu0 %vm6561_vm1, %v6560_v1  ;;  %6054 = vmatprep.mubr.msk.f32.mxu1 %vm6561_vm1, %v6560_v1 }
 0x1db   : > { %v7901_v12 = vpop.f32.mrb[10].mxu0  ;;  %v7903_v13 = vpop.f32.mrb[10].mxu1 }
 0x1dc   : > { %v2463_v14 = vmax.f32 %v7901_v12, %v7903_v13  ;;  %v5467_v15 = vpop.f32.mrb[11].mxu0  ;;  %v5674_v16 = vpop.f32.mrb[11].mxu1  ;;  %5848 = vmatmul.mubr.msk.f32.gmra.mrb[18].mxu0 %vm189_vm2, %v7797_v35  ;;  %6055 = vmatmul.mubr.msk.f32.gmra.mrb[18].mxu1 %vm189_vm2, %v4881_v11 }
 0x1dd   : > { %5850 = vmatprep.mubr.msk.f32.mxu0 %vm6561_vm1, %v6560_v1  ;;  %6057 = vmatprep.mubr.msk.f32.mxu1 %vm6561_vm1, %v6560_v1 }
 0x1df   : > { %v7915_v19 = vpop.f32.mrb[12].mxu0  ;;  %v7917_v20 = vpop.f32.mrb[12].mxu1 }
 0x1e0   : > { %v2464_v21 = vmax.f32 %v7915_v19, %v7917_v20  ;;  %v5470_v22 = vpop.f32.mrb[13].mxu0  ;;  %v5677_v23 = vpop.f32.mrb[13].mxu1  ;;  %5851 = vmatmul.mubr.msk.f32.gmra.mrb[20].mxu0 %vm189_vm2, %v7808_v37  ;;  %6058 = vmatmul.mubr.msk.f32.gmra.mrb[20].mxu1 %vm189_vm2, %v4882_v17 }
 0x1e1   : > { %5853 = vmatprep.mubr.msk.f32.mxu0 %vm6561_vm1, %v6560_v1  ;;  %6060 = vmatprep.mubr.msk.f32.mxu1 %vm6561_vm1, %v6560_v1 }
 0x1e4   : > { %5854 = vmatmul.mubr.msk.f32.gmra.mrb[22].mxu0 %vm189_vm2, %v7819_v39  ;;  %6061 = vmatmul.mubr.msk.f32.gmra.mrb[22].mxu1 %vm189_vm2, %v4883_v24 }
 0x1e5   : > { %5856 = vmatprep.mubr.msk.f32.mxu0 %vm6561_vm1, %v6560_v1  ;;  %6063 = vmatprep.mubr.msk.f32.mxu1 %vm6561_vm1, %v6560_v1 }
 0x1e8   : > { %5857 = vmatmul.mubr.msk.f32.gmra.mrb[24].mxu0 %vm189_vm2, %v7836_v46  ;;  %6064 = vmatmul.mubr.msk.f32.gmra.mrb[24].mxu1 %vm189_vm2, %v4884_v25 }
 0x1e9   : > { %5859 = vmatprep.mubr.msk.f32.mxu0 %vm6561_vm1, %v6560_v1  ;;  %6066 = vmatprep.mubr.msk.f32.mxu1 %vm6561_vm1, %v6560_v1 }
 0x1ec   : > { %5860 = vmatmul.mubr.msk.f32.gmra.mrb[26].mxu0 %vm189_vm2, %v7853_v53  ;;  %6067 = vmatmul.mubr.msk.f32.gmra.mrb[26].mxu1 %vm189_vm2, %v4885_v27 }
 0x1ed   : > { %5864 = vmatprep.mubr.msk.f32.mxu0 %vm6561_vm1, %v6560_v1  ;;  %6071 = vmatprep.mubr.msk.f32.mxu1 %vm6561_vm1, %v6560_v1 }
 0x1f0   : > { %5865 = vmatmul.mubr.msk.f32.vlgmr.msra.gmra.mrb[14].mxu0 %vm189_vm2, %v4879_v59  ;;  %6072 = vmatmul.mubr.msk.f32.vlgmr.msra.gmra.mrb[14].mxu1 %vm189_vm2, %v4958_v28 }
 0x1f1   : > { %5867 = vmatprep.mubr.msk.f32.mxu0 %vm6561_vm1, %v6560_v1  ;;  %6074 = vmatprep.mubr.msk.f32.mxu1 %vm6561_vm1, %v6560_v1 }
 0x1f4   : > { %5868 = vmatmul.mubr.msk.f32.gmra.mrb[16].mxu0 %vm189_vm2, %v4880_v5  ;;  %6075 = vmatmul.mubr.msk.f32.gmra.mrb[16].mxu1 %vm189_vm2, %v4959_v29 }
 0x1f5   : > { %5870 = vmatprep.mubr.msk.f32.mxu0 %vm6561_vm1, %v6560_v1  ;;  %6077 = vmatprep.mubr.msk.f32.mxu1 %vm6561_vm1, %v6560_v1 }
 0x1f8   : > { %5871 = vmatmul.mubr.msk.f32.gmra.mrb[18].mxu0 %vm189_vm2, %v4881_v11  ;;  %6078 = vmatmul.mubr.msk.f32.gmra.mrb[18].mxu1 %vm189_vm2, %v4960_v0 }
 0x1f9   : > { %5873 = vmatprep.mubr.msk.f32.mxu0 %vm6561_vm1, %v6560_v1  ;;  %6080 = vmatprep.mubr.msk.f32.mxu1 %vm6561_vm1, %v6560_v1 }
 0x1fc   : > { %5874 = vmatmul.mubr.msk.f32.gmra.mrb[20].mxu0 %vm189_vm2, %v4882_v17  ;;  %6081 = vmatmul.mubr.msk.f32.gmra.mrb[20].mxu1 %vm189_vm2, %v4961_v30 }
 0x1fd   : > { %5876 = vmatprep.mubr.msk.f32.mxu0 %vm6561_vm1, %v6560_v1  ;;  %6083 = vmatprep.mubr.msk.f32.mxu1 %vm6561_vm1, %v6560_v1 }
 0x200   : > { %5877 = vmatmul.mubr.msk.f32.gmra.mrb[22].mxu0 %vm189_vm2, %v4883_v24  ;;  %6084 = vmatmul.mubr.msk.f32.gmra.mrb[22].mxu1 %vm189_vm2, %v4962_v31 }
 0x201   : > { %5879 = vmatprep.mubr.msk.f32.mxu0 %vm6561_vm1, %v6560_v1  ;;  %6086 = vmatprep.mubr.msk.f32.mxu1 %vm6561_vm1, %v6560_v1 }
 0x204   : > { %5880 = vmatmul.mubr.msk.f32.gmra.mrb[24].mxu0 %vm189_vm2, %v4884_v25  ;;  %6087 = vmatmul.mubr.msk.f32.gmra.mrb[24].mxu1 %vm189_vm2, %v4963_v32 }
 0x205   : > { %5882 = vmatprep.mubr.msk.f32.mxu0 %vm6561_vm1, %v6560_v1  ;;  %6089 = vmatprep.mubr.msk.f32.mxu1 %vm6561_vm1, %v6560_v1 }
 0x208   : > { %5883 = vmatmul.mubr.msk.f32.gmra.mrb[26].mxu0 %vm189_vm2, %v4885_v27  ;;  %6090 = vmatmul.mubr.msk.f32.gmra.mrb[26].mxu1 %vm189_vm2, %v4964_v2 }
 0x2c3   : > { %v3457_v18 = vpop.f32.mrb[14].mxu0  ;;  %v4441_v26 = vpop.f32.mrb[14].mxu1 }
 0x2c4   : > { %v3498_v33 = vmax.f32 %v2458_v42, %v3457_v18  ;;  %v5866_v34 = vpop.f32.mrb[15].mxu0  ;;  %v6073_v35 = vpop.f32.mrb[15].mxu1 }
 0x2c6   : > { %v4482_v37 = vmax.f32 %v3498_v33, %v4441_v26 }
 0x2c7   : > { %v3462_v1 = vpop.f32.mrb[16].mxu0  ;;  %v4446_v38 = vpop.f32.mrb[16].mxu1 }
 0x2c8   : > { %v4496_v39 = vadd.f32 %v4973_v36, %v4482_v37  ;;  %v3499_v43 = vmax.f32 %v2459_v49, %v3462_v1  ;;  %v5869_v44 = vpop.f32.mrb[17].mxu0  ;;  %v6076_v45 = vpop.f32.mrb[17].mxu1 }
 0x2ca   : > { %v4503_v40 = vmax.f32 %v4496_v39, 0.0  ;;  %v4483_v41 = vmax.f32 %v3499_v43, %v4446_v38 }
 0x2cb   : > { %v3467_v42 = vpop.f32.mrb[18].mxu0  ;;  %v4451_v46 = vpop.f32.mrb[18].mxu1 }
 0x2cc   : > { %4510 = vst [vmem:[%s8010_s16] sm:$0xff] %v4503_v40  ;;  %v4497_v50 = vadd.f32 %v4973_v36, %v4483_v41  ;;  %v3500_v47 = vmax.f32 %v2460_v56, %v3467_v42  ;;  %v5872_v48 = vpop.f32.mrb[19].mxu0  ;;  %v6079_v49 = vpop.f32.mrb[19].mxu1 }
 0x2ce   : > { %v4504_v51 = vmax.f32 %v4497_v50, 0.0  ;;  %v4484_v52 = vmax.f32 %v3500_v47, %v4451_v46 }
 0x2cf   : > { %v3472_v53 = vpop.f32.mrb[20].mxu0  ;;  %v4456_v57 = vpop.f32.mrb[20].mxu1 }
 0x2d0   : > { %4511 = vst [vmem:[%s8010_s16 + $0x8] sm:$0xff] %v4504_v51  ;;  %v4498_v58 = vadd.f32 %v4973_v36, %v4484_v52  ;;  %v3501_v59 = vmax.f32 %v2461_v62, %v3472_v53  ;;  %v5875_v63 = vpop.f32.mrb[21].mxu0  ;;  %v6082_v3 = vpop.f32.mrb[21].mxu1 }
 0x2d2   : > { %v4505_v4 = vmax.f32 %v4498_v58, 0.0  ;;  %v4485_v5 = vmax.f32 %v3501_v59, %v4456_v57 }
 0x2d3   : > { %v3477_v54 = vpop.f32.mrb[22].mxu0  ;;  %v4461_v55 = vpop.f32.mrb[22].mxu1 }
 0x2d4   : > { %4512 = vst [vmem:[%s8010_s16 + $0x10] sm:$0xff] %v4505_v4  ;;  %v4499_v56 = vadd.f32 %v4973_v36, %v4485_v5  ;;  %v3502_v9 = vmax.f32 %v2462_v8, %v3477_v54  ;;  %v5878_v10 = vpop.f32.mrb[23].mxu0  ;;  %v6085_v11 = vpop.f32.mrb[23].mxu1 }
 0x2d6   : > { %v4506_v15 = vmax.f32 %v4499_v56, 0.0  ;;  %v4486_v16 = vmax.f32 %v3502_v9, %v4461_v55 }
 0x2d7   : > { %v3482_v60 = vpop.f32.mrb[24].mxu0  ;;  %v4466_v61 = vpop.f32.mrb[24].mxu1 }
 0x2d8   : > { %4513 = vst [vmem:[%s8010_s16 + $0x18] sm:$0xff] %v4506_v15  ;;  %v4500_v62 = vadd.f32 %v4973_v36, %v4486_v16  ;;  %v3503_v17 = vmax.f32 %v2463_v14, %v3482_v60  ;;  %v5881_v22 = vpop.f32.mrb[25].mxu0  ;;  %v6088_v23 = vpop.f32.mrb[25].mxu1 }
 0x2da   : > { %v4507_v24 = vmax.f32 %v4500_v62, 0.0  ;;  %v4487_v6 = vmax.f32 %v3503_v17, %v4466_v61 }
 0x2db   : > { %v3487_v7 = vpop.f32.mrb[26].mxu0  ;;  %v4471_v8 = vpop.f32.mrb[26].mxu1 }
 0x2dc   : > { %4514 = vst [vmem:[%s8010_s16 + $0x20] sm:$0xff] %v4507_v24  ;;  %v4501_v25 = vadd.f32 %v4973_v36, %v4487_v6  ;;  %v3504_v27 = vmax.f32 %v2464_v21, %v3487_v7  ;;  %v5884_v28 = vpop.f32.mrb[27].mxu0  ;;  %v6091_v29 = vpop.f32.mrb[27].mxu1 }
 0x2de   : > { %v4508_v0 = vmax.f32 %v4501_v25, 0.0  ;;  %v4488_v30 = vmax.f32 %v3504_v27, %v4471_v8 }
 0x2e0   : > { %4515 = vst [vmem:[%s8010_s16 + $0x28] sm:$0xff] %v4508_v0  ;;  %v4502_v12 = vadd.f32 %v4973_v36, %v4488_v30 }
 0x2e2   : > { %v4509_v13 = vmax.f32 %v4502_v12, 0.0 }
 0x2e4   : > { %4516 = vst [vmem:[%s8010_s16 + $0x30] sm:$0x1] %v4509_v13 }
 0x2e5 PF: > { %s13_s12 = sadd.s32 1, %s6558_s12  }
 0x2e6   : > { %p10_p4 = scmp.ge.s32.totalorder %s13_s12, 4  }
 0x2e8   :  { %12 = sbr.rel (!%p10_p4) target bundleno = 1 (0x1), region = 77 }

</bundles_post_ra>
